<compile_context>
chip_gen: v7x
topology: tpu7x:2x2x1
jax: 0.10.0
libtpu: 0.0.40
codegen_flags: <defaults>
</compile_context>

<pallas_src>
import jax
import jax.numpy as jnp
from jax.experimental import pallas as pl
from jax.experimental.pallas import tpu as pltpu


def rnn_kernel(x_ref, w1i_ref, b1_ref, w1h_ref, w2i_ref, w2h_ref, b2_ref,
               wfc_ref, bfc_ref, out_ref):
    TB, F = x_ref.shape            # (T * Bp, F), time-major
    Hp = w1h_ref.shape[0]          # lane-padded hidden size (multiple of 128)
    Bp = out_ref.shape[0]          # sublane-padded batch (multiple of 8)
    T = TB // Bp

    # Hoist recurrent weights / bias out of the time loop (VMEM/vreg resident).
    w1h = w1h_ref[...]             # (Hp, 4Hp)
    w2i = w2i_ref[...]             # (Hp, 4Hp)
    w2h = w2h_ref[...]             # (Hp, 4Hp)
    b2 = b2_ref[...]               # (1, 4Hp)

    # Non-recurrent input projection for ALL timesteps in one MXU push,
    # with the layer-1 bias folded in (off the recurrence critical path).
    xp = (jnp.dot(x_ref[...], w1i_ref[...], preferred_element_type=jnp.float32)
          + b1_ref[...])           # (T*Bp, 4Hp)

    def cell(gates, c):
        # Gate slabs are lane-aligned at multiples of Hp (>=128): free slices.
        i_g = jax.nn.sigmoid(gates[:, 0 * Hp:1 * Hp])
        f_g = jax.nn.sigmoid(gates[:, 1 * Hp:2 * Hp])
        g_g = jnp.tanh(gates[:, 2 * Hp:3 * Hp])
        o_g = jax.nn.sigmoid(gates[:, 3 * Hp:4 * Hp])
        c_new = f_g * c + i_g * g_g
        h_new = o_g * jnp.tanh(c_new)
        return h_new, c_new

    z = jnp.zeros((Bp, Hp), jnp.float32)
    h1, c1, h2, c2 = z, z, z, z

    # T is small and static -> fully unrolled recurrence; every slice below is
    # static and sublane/lane tile-aligned.
    for t in range(T):
        x_t = xp[t * Bp:(t + 1) * Bp, :]                       # aligned slab
        g1 = x_t + jnp.dot(h1, w1h, preferred_element_type=jnp.float32)
        h1, c1 = cell(g1, c1)
        g2 = (jnp.dot(h1, w2i, preferred_element_type=jnp.float32)
              + jnp.dot(h2, w2h, preferred_element_type=jnp.float32) + b2)
        h2, c2 = cell(g2, c2)

    # Final linear on the last timestep's top-layer hidden state.
    out_ref[...] = (jnp.dot(h2, wfc_ref[...], preferred_element_type=jnp.float32)
                    + bfc_ref[...]).astype(out_ref.dtype)


def rnn_forward(x, params):
    """x: (B, T, F) float32, batch_first. Returns (B, out_dim)."""
    B, T, F = x.shape
    (w1i, w1h, b1, w2i, w2h, b2, wfc, bfc) = params   # already transposed / bias-summed
    H = w1h.shape[0]
    O = wfc.shape[1]

    LANE, SUB = 128, 8
    Hp = ((H + LANE - 1) // LANE) * LANE               # lane-aligned hidden
    Bp = ((B + SUB - 1) // SUB) * SUB                  # sublane-aligned batch

    def pad_gate_cols(w):
        # (K, 4H) -> (K, 4Hp): each PyTorch gate block [i,f,g,o] becomes a
        # lane-aligned slab at column offset k*Hp, zero-padded elsewhere.
        out = jnp.zeros(w.shape[:-1] + (4 * Hp,), w.dtype)
        for g in range(4):
            out = out.at[..., g * Hp:g * Hp + H].set(w[..., g * H:(g + 1) * H])
        return out

    def pad_rows(w, kp):
        return jnp.zeros((kp,) + w.shape[1:], w.dtype).at[:w.shape[0]].set(w)

    w1i_p = pad_gate_cols(w1i)                          # (F,  4Hp)
    b1_p = pad_gate_cols(b1)                            # (1,  4Hp)
    w1h_p = pad_rows(pad_gate_cols(w1h), Hp)            # (Hp, 4Hp)
    w2i_p = pad_rows(pad_gate_cols(w2i), Hp)            # (Hp, 4Hp)
    w2h_p = pad_rows(pad_gate_cols(w2h), Hp)            # (Hp, 4Hp)
    b2_p = pad_gate_cols(b2)                            # (1,  4Hp)
    wfc_p = pad_rows(wfc, Hp)                           # (Hp, O)

    # Time-major, batch padded to a sublane multiple, flattened to (T*Bp, F)
    # so the per-step access in the kernel is a tile-aligned static slab.
    x_tm = jnp.zeros((T, Bp, F), x.dtype).at[:, :B, :].set(jnp.transpose(x, (1, 0, 2)))
    x_tm = x_tm.reshape(T * Bp, F)

    vmem = lambda: pl.BlockSpec(memory_space=pltpu.MemorySpace.VMEM)
    out = pl.pallas_call(
        rnn_kernel,
        out_shape=jax.ShapeDtypeStruct((Bp, O), jnp.float32),
        in_specs=[vmem() for _ in range(9)],
        out_specs=vmem(),
    )(x_tm, w1i_p, b1_p, w1h_p, w2i_p, w2h_p, b2_p, wfc_p, bfc)
    return out[:B]


def init_params(key, features_dim, hidden_dim, out_dim):
    """Deterministic init matching PyTorch LSTM/Linear shapes (uniform(-1/sqrt(H)))."""
    H, F, O = hidden_dim, features_dim, out_dim
    k_lstm = 1.0 / jnp.sqrt(H)
    keys = jax.random.split(key, 10)
    u = lambda k, shape, bound: jax.random.uniform(
        k, shape, jnp.float32, minval=-bound, maxval=bound)

    # layer 1: weight_ih (4H,F), weight_hh (4H,H), biases (4H,)
    w1_ih = u(keys[0], (4 * H, F), k_lstm)
    w1_hh = u(keys[1], (4 * H, H), k_lstm)
    b1 = u(keys[2], (4 * H,), k_lstm) + u(keys[3], (4 * H,), k_lstm)  # b_ih + b_hh
    # layer 2: weight_ih (4H,H)
    w2_ih = u(keys[4], (4 * H, H), k_lstm)
    w2_hh = u(keys[5], (4 * H, H), k_lstm)
    b2 = u(keys[6], (4 * H,), k_lstm) + u(keys[7], (4 * H,), k_lstm)
    # fc: (O, H), bias (O,)
    k_fc = 1.0 / jnp.sqrt(H)
    w_fc = u(keys[8], (O, H), k_fc)
    b_fc = u(keys[9], (O,), k_fc)

    # pre-transpose for the x @ W layout used in the kernel
    return (w1_ih.T, w1_hh.T, b1[None, :],
            w2_ih.T, w2_hh.T, b2[None, :],
            w_fc.T, b_fc[None, :])


def rnn_reference(x, params):
    """Pure-JAX reference (same math, unpadded/unfused) for validation."""
    (w1i, w1h, b1, w2i, w2h, b2, wfc, bfc) = params
    B, T, F = x.shape
    H = w1h.shape[0]

    def cell(xt, h, c, wi, wh, b):
        g = xt @ wi + h @ wh + b
        i = jax.nn.sigmoid(g[:, 0 * H:1 * H])
        f = jax.nn.sigmoid(g[:, 1 * H:2 * H])
        gg = jnp.tanh(g[:, 2 * H:3 * H])
        o = jax.nn.sigmoid(g[:, 3 * H:4 * H])
        c_new = f * c + i * gg
        return o * jnp.tanh(c_new), c_new

    def step(carry, xt):
        h1, c1, h2, c2 = carry
        h1, c1 = cell(xt, h1, c1, w1i, w1h, b1)
        h2, c2 = cell(h1, h2, c2, w2i, w2h, b2)
        return (h1, c1, h2, c2), None

    z = jnp.zeros((B, H), jnp.float32)
    (h1, c1, h2, c2), _ = jax.lax.scan(step, (z, z, z, z),
                                       jnp.transpose(x, (1, 0, 2)))
    return h2 @ wfc + bfc


if __name__ == "__main__":
    batch, seq, features_dim, hidden_dim, out_dim = 2, 8, 16, 32, 8

    key = jax.random.PRNGKey(0)
    kx, kp = jax.random.split(key)
    x = jax.random.normal(kx, (batch, seq, features_dim), dtype=jnp.float32)
    params = init_params(kp, features_dim, hidden_dim, out_dim)

    out = rnn_forward(x, params)
    out = jax.block_until_ready(out)

    ref = rnn_reference(x, params)
    assert out.shape == (batch, out_dim)
    assert jnp.allclose(out, ref, atol=1e-4, rtol=1e-4), "mismatch vs reference"
    print("KERNEL_OK")
</pallas_src>

<mosaic_0001>
module attributes {stable_mosaic.version = 11 : i64} {
  func.func @rnn_kernel(%arg0: memref<64x16xf32, #tpu.memory_space<vmem>>, %arg1: memref<16x512xf32, #tpu.memory_space<vmem>>, %arg2: memref<1x512xf32, #tpu.memory_space<vmem>>, %arg3: memref<128x512xf32, #tpu.memory_space<vmem>>, %arg4: memref<128x512xf32, #tpu.memory_space<vmem>>, %arg5: memref<128x512xf32, #tpu.memory_space<vmem>>, %arg6: memref<1x512xf32, #tpu.memory_space<vmem>>, %arg7: memref<128x8xf32, #tpu.memory_space<vmem>>, %arg8: memref<1x8xf32, #tpu.memory_space<vmem>>, %arg9: memref<8x8xf32, #tpu.memory_space<vmem>>) attributes {dimension_semantics = [], scalar_prefetch = 0 : i64, scratch_operands = 0 : i64, tpu.core_type = #tpu.core_type<tc>} {
    %c0 = arith.constant 0 : index
    %c0_0 = arith.constant 0 : index
    %0 = vector.load %arg3[%c0, %c0_0] : memref<128x512xf32, #tpu.memory_space<vmem>>, vector<128x512xf32>
    %c0_1 = arith.constant 0 : index
    %c0_2 = arith.constant 0 : index
    %1 = vector.load %arg4[%c0_1, %c0_2] : memref<128x512xf32, #tpu.memory_space<vmem>>, vector<128x512xf32>
    %c0_3 = arith.constant 0 : index
    %c0_4 = arith.constant 0 : index
    %2 = vector.load %arg5[%c0_3, %c0_4] : memref<128x512xf32, #tpu.memory_space<vmem>>, vector<128x512xf32>
    %c0_5 = arith.constant 0 : index
    %c0_6 = arith.constant 0 : index
    %3 = vector.load %arg6[%c0_5, %c0_6] : memref<1x512xf32, #tpu.memory_space<vmem>>, vector<1x512xf32>
    %c0_7 = arith.constant 0 : index
    %c0_8 = arith.constant 0 : index
    %4 = vector.load %arg0[%c0_7, %c0_8] : memref<64x16xf32, #tpu.memory_space<vmem>>, vector<64x16xf32>
    %c0_9 = arith.constant 0 : index
    %c0_10 = arith.constant 0 : index
    %5 = vector.load %arg1[%c0_9, %c0_10] : memref<16x512xf32, #tpu.memory_space<vmem>>, vector<16x512xf32>
    %cst = arith.constant dense<0.000000e+00> : vector<64x512xf32>
    %6 = tpu.matmul %4, %5, %cst {dimension_numbers = #tpu.dot_dimension_numbers<[1], [0], [0], [1], [0, 0, 1, 1], [], []>} : vector<64x16xf32>, vector<16x512xf32>, vector<64x512xf32> -> vector<64x512xf32>
    %c0_11 = arith.constant 0 : index
    %c0_12 = arith.constant 0 : index
    %7 = vector.load %arg2[%c0_11, %c0_12] : memref<1x512xf32, #tpu.memory_space<vmem>>, vector<1x512xf32>
    %8 = vector.broadcast %7 : vector<1x512xf32> to vector<64x512xf32>
    %9 = arith.addf %6, %8 : vector<64x512xf32>
    %cst_13 = arith.constant 0.000000e+00 : f32
    %10 = vector.broadcast %cst_13 : f32 to vector<8x128xf32>
    %11 = vector.extract_strided_slice %9 {offsets = [0, 0], sizes = [8, 512], strides = [1, 1]} : vector<64x512xf32> to vector<8x512xf32>
    %cst_14 = arith.constant dense<0.000000e+00> : vector<8x512xf32>
    %12 = tpu.matmul %10, %0, %cst_14 {dimension_numbers = #tpu.dot_dimension_numbers<[1], [0], [0], [1], [0, 0, 1, 1], [], []>} : vector<8x128xf32>, vector<128x512xf32>, vector<8x512xf32> -> vector<8x512xf32>
    %13 = arith.addf %11, %12 : vector<8x512xf32>
    %14 = vector.extract_strided_slice %13 {offsets = [0, 0], sizes = [8, 128], strides = [1, 1]} : vector<8x512xf32> to vector<8x128xf32>
    %15 = arith.negf %14 : vector<8x128xf32>
    %16 = math.exp %15 : vector<8x128xf32>
    %cst_15 = arith.constant 1.000000e+00 : f32
    %17 = vector.broadcast %cst_15 : f32 to vector<8x128xf32>
    %18 = arith.addf %17, %16 : vector<8x128xf32>
    %19 = arith.divf %17, %18 : vector<8x128xf32>
    %20 = vector.extract_strided_slice %13 {offsets = [0, 128], sizes = [8, 128], strides = [1, 1]} : vector<8x512xf32> to vector<8x128xf32>
    %21 = arith.negf %20 : vector<8x128xf32>
    %22 = math.exp %21 : vector<8x128xf32>
    %cst_16 = arith.constant 1.000000e+00 : f32
    %23 = vector.broadcast %cst_16 : f32 to vector<8x128xf32>
    %24 = arith.addf %23, %22 : vector<8x128xf32>
    %25 = arith.divf %23, %24 : vector<8x128xf32>
    %26 = vector.extract_strided_slice %13 {offsets = [0, 256], sizes = [8, 128], strides = [1, 1]} : vector<8x512xf32> to vector<8x128xf32>
    %27 = math.tanh %26 : vector<8x128xf32>
    %28 = vector.extract_strided_slice %13 {offsets = [0, 384], sizes = [8, 128], strides = [1, 1]} : vector<8x512xf32> to vector<8x128xf32>
    %29 = arith.negf %28 : vector<8x128xf32>
    %30 = math.exp %29 : vector<8x128xf32>
    %cst_17 = arith.constant 1.000000e+00 : f32
    %31 = vector.broadcast %cst_17 : f32 to vector<8x128xf32>
    %32 = arith.addf %31, %30 : vector<8x128xf32>
    %33 = arith.divf %31, %32 : vector<8x128xf32>
    %34 = arith.mulf %25, %10 : vector<8x128xf32>
    %35 = arith.mulf %19, %27 : vector<8x128xf32>
    %36 = arith.addf %34, %35 : vector<8x128xf32>
    %37 = math.tanh %36 : vector<8x128xf32>
    %38 = arith.mulf %33, %37 : vector<8x128xf32>
    %cst_18 = arith.constant dense<0.000000e+00> : vector<8x512xf32>
    %39 = tpu.matmul %38, %1, %cst_18 {dimension_numbers = #tpu.dot_dimension_numbers<[1], [0], [0], [1], [0, 0, 1, 1], [], []>} : vector<8x128xf32>, vector<128x512xf32>, vector<8x512xf32> -> vector<8x512xf32>
    %cst_19 = arith.constant dense<0.000000e+00> : vector<8x512xf32>
    %40 = tpu.matmul %10, %2, %cst_19 {dimension_numbers = #tpu.dot_dimension_numbers<[1], [0], [0], [1], [0, 0, 1, 1], [], []>} : vector<8x128xf32>, vector<128x512xf32>, vector<8x512xf32> -> vector<8x512xf32>
    %41 = arith.addf %39, %40 : vector<8x512xf32>
    %42 = vector.broadcast %3 : vector<1x512xf32> to vector<8x512xf32>
    %43 = arith.addf %41, %42 : vector<8x512xf32>
    %44 = vector.extract_strided_slice %43 {offsets = [0, 0], sizes = [8, 128], strides = [1, 1]} : vector<8x512xf32> to vector<8x128xf32>
    %45 = arith.negf %44 : vector<8x128xf32>
    %46 = math.exp %45 : vector<8x128xf32>
    %cst_20 = arith.constant 1.000000e+00 : f32
    %47 = vector.broadcast %cst_20 : f32 to vector<8x128xf32>
    %48 = arith.addf %47, %46 : vector<8x128xf32>
    %49 = arith.divf %47, %48 : vector<8x128xf32>
    %50 = vector.extract_strided_slice %43 {offsets = [0, 128], sizes = [8, 128], strides = [1, 1]} : vector<8x512xf32> to vector<8x128xf32>
    %51 = arith.negf %50 : vector<8x128xf32>
    %52 = math.exp %51 : vector<8x128xf32>
    %cst_21 = arith.constant 1.000000e+00 : f32
    %53 = vector.broadcast %cst_21 : f32 to vector<8x128xf32>
    %54 = arith.addf %53, %52 : vector<8x128xf32>
    %55 = arith.divf %53, %54 : vector<8x128xf32>
    %56 = vector.extract_strided_slice %43 {offsets = [0, 256], sizes = [8, 128], strides = [1, 1]} : vector<8x512xf32> to vector<8x128xf32>
    %57 = math.tanh %56 : vector<8x128xf32>
    %58 = vector.extract_strided_slice %43 {offsets = [0, 384], sizes = [8, 128], strides = [1, 1]} : vector<8x512xf32> to vector<8x128xf32>
    %59 = arith.negf %58 : vector<8x128xf32>
    %60 = math.exp %59 : vector<8x128xf32>
    %cst_22 = arith.constant 1.000000e+00 : f32
    %61 = vector.broadcast %cst_22 : f32 to vector<8x128xf32>
    %62 = arith.addf %61, %60 : vector<8x128xf32>
    %63 = arith.divf %61, %62 : vector<8x128xf32>
    %64 = arith.mulf %55, %10 : vector<8x128xf32>
    %65 = arith.mulf %49, %57 : vector<8x128xf32>
    %66 = arith.addf %64, %65 : vector<8x128xf32>
    %67 = math.tanh %66 : vector<8x128xf32>
    %68 = arith.mulf %63, %67 : vector<8x128xf32>
    %69 = vector.extract_strided_slice %9 {offsets = [8, 0], sizes = [8, 512], strides = [1, 1]} : vector<64x512xf32> to vector<8x512xf32>
    %cst_23 = arith.constant dense<0.000000e+00> : vector<8x512xf32>
    %70 = tpu.matmul %38, %0, %cst_23 {dimension_numbers = #tpu.dot_dimension_numbers<[1], [0], [0], [1], [0, 0, 1, 1], [], []>} : vector<8x128xf32>, vector<128x512xf32>, vector<8x512xf32> -> vector<8x512xf32>
    %71 = arith.addf %69, %70 : vector<8x512xf32>
    %72 = vector.extract_strided_slice %71 {offsets = [0, 0], sizes = [8, 128], strides = [1, 1]} : vector<8x512xf32> to vector<8x128xf32>
    %73 = arith.negf %72 : vector<8x128xf32>
    %74 = math.exp %73 : vector<8x128xf32>
    %cst_24 = arith.constant 1.000000e+00 : f32
    %75 = vector.broadcast %cst_24 : f32 to vector<8x128xf32>
    %76 = arith.addf %75, %74 : vector<8x128xf32>
    %77 = arith.divf %75, %76 : vector<8x128xf32>
    %78 = vector.extract_strided_slice %71 {offsets = [0, 128], sizes = [8, 128], strides = [1, 1]} : vector<8x512xf32> to vector<8x128xf32>
    %79 = arith.negf %78 : vector<8x128xf32>
    %80 = math.exp %79 : vector<8x128xf32>
    %cst_25 = arith.constant 1.000000e+00 : f32
    %81 = vector.broadcast %cst_25 : f32 to vector<8x128xf32>
    %82 = arith.addf %81, %80 : vector<8x128xf32>
    %83 = arith.divf %81, %82 : vector<8x128xf32>
    %84 = vector.extract_strided_slice %71 {offsets = [0, 256], sizes = [8, 128], strides = [1, 1]} : vector<8x512xf32> to vector<8x128xf32>
    %85 = math.tanh %84 : vector<8x128xf32>
    %86 = vector.extract_strided_slice %71 {offsets = [0, 384], sizes = [8, 128], strides = [1, 1]} : vector<8x512xf32> to vector<8x128xf32>
    %87 = arith.negf %86 : vector<8x128xf32>
    %88 = math.exp %87 : vector<8x128xf32>
    %cst_26 = arith.constant 1.000000e+00 : f32
    %89 = vector.broadcast %cst_26 : f32 to vector<8x128xf32>
    %90 = arith.addf %89, %88 : vector<8x128xf32>
    %91 = arith.divf %89, %90 : vector<8x128xf32>
    %92 = arith.mulf %83, %36 : vector<8x128xf32>
    %93 = arith.mulf %77, %85 : vector<8x128xf32>
    %94 = arith.addf %92, %93 : vector<8x128xf32>
    %95 = math.tanh %94 : vector<8x128xf32>
    %96 = arith.mulf %91, %95 : vector<8x128xf32>
    %cst_27 = arith.constant dense<0.000000e+00> : vector<8x512xf32>
    %97 = tpu.matmul %96, %1, %cst_27 {dimension_numbers = #tpu.dot_dimension_numbers<[1], [0], [0], [1], [0, 0, 1, 1], [], []>} : vector<8x128xf32>, vector<128x512xf32>, vector<8x512xf32> -> vector<8x512xf32>
    %cst_28 = arith.constant dense<0.000000e+00> : vector<8x512xf32>
    %98 = tpu.matmul %68, %2, %cst_28 {dimension_numbers = #tpu.dot_dimension_numbers<[1], [0], [0], [1], [0, 0, 1, 1], [], []>} : vector<8x128xf32>, vector<128x512xf32>, vector<8x512xf32> -> vector<8x512xf32>
    %99 = arith.addf %97, %98 : vector<8x512xf32>
    %100 = vector.broadcast %3 : vector<1x512xf32> to vector<8x512xf32>
    %101 = arith.addf %99, %100 : vector<8x512xf32>
    %102 = vector.extract_strided_slice %101 {offsets = [0, 0], sizes = [8, 128], strides = [1, 1]} : vector<8x512xf32> to vector<8x128xf32>
    %103 = arith.negf %102 : vector<8x128xf32>
    %104 = math.exp %103 : vector<8x128xf32>
    %cst_29 = arith.constant 1.000000e+00 : f32
    %105 = vector.broadcast %cst_29 : f32 to vector<8x128xf32>
    %106 = arith.addf %105, %104 : vector<8x128xf32>
    %107 = arith.divf %105, %106 : vector<8x128xf32>
    %108 = vector.extract_strided_slice %101 {offsets = [0, 128], sizes = [8, 128], strides = [1, 1]} : vector<8x512xf32> to vector<8x128xf32>
    %109 = arith.negf %108 : vector<8x128xf32>
    %110 = math.exp %109 : vector<8x128xf32>
    %cst_30 = arith.constant 1.000000e+00 : f32
    %111 = vector.broadcast %cst_30 : f32 to vector<8x128xf32>
    %112 = arith.addf %111, %110 : vector<8x128xf32>
    %113 = arith.divf %111, %112 : vector<8x128xf32>
    %114 = vector.extract_strided_slice %101 {offsets = [0, 256], sizes = [8, 128], strides = [1, 1]} : vector<8x512xf32> to vector<8x128xf32>
    %115 = math.tanh %114 : vector<8x128xf32>
    %116 = vector.extract_strided_slice %101 {offsets = [0, 384], sizes = [8, 128], strides = [1, 1]} : vector<8x512xf32> to vector<8x128xf32>
    %117 = arith.negf %116 : vector<8x128xf32>
    %118 = math.exp %117 : vector<8x128xf32>
    %cst_31 = arith.constant 1.000000e+00 : f32
    %119 = vector.broadcast %cst_31 : f32 to vector<8x128xf32>
    %120 = arith.addf %119, %118 : vector<8x128xf32>
    %121 = arith.divf %119, %120 : vector<8x128xf32>
    %122 = arith.mulf %113, %66 : vector<8x128xf32>
    %123 = arith.mulf %107, %115 : vector<8x128xf32>
    %124 = arith.addf %122, %123 : vector<8x128xf32>
    %125 = math.tanh %124 : vector<8x128xf32>
    %126 = arith.mulf %121, %125 : vector<8x128xf32>
    %127 = vector.extract_strided_slice %9 {offsets = [16, 0], sizes = [8, 512], strides = [1, 1]} : vector<64x512xf32> to vector<8x512xf32>
    %cst_32 = arith.constant dense<0.000000e+00> : vector<8x512xf32>
    %128 = tpu.matmul %96, %0, %cst_32 {dimension_numbers = #tpu.dot_dimension_numbers<[1], [0], [0], [1], [0, 0, 1, 1], [], []>} : vector<8x128xf32>, vector<128x512xf32>, vector<8x512xf32> -> vector<8x512xf32>
    %129 = arith.addf %127, %128 : vector<8x512xf32>
    %130 = vector.extract_strided_slice %129 {offsets = [0, 0], sizes = [8, 128], strides = [1, 1]} : vector<8x512xf32> to vector<8x128xf32>
    %131 = arith.negf %130 : vector<8x128xf32>
    %132 = math.exp %131 : vector<8x128xf32>
    %cst_33 = arith.constant 1.000000e+00 : f32
    %133 = vector.broadcast %cst_33 : f32 to vector<8x128xf32>
    %134 = arith.addf %133, %132 : vector<8x128xf32>
    %135 = arith.divf %133, %134 : vector<8x128xf32>
    %136 = vector.extract_strided_slice %129 {offsets = [0, 128], sizes = [8, 128], strides = [1, 1]} : vector<8x512xf32> to vector<8x128xf32>
    %137 = arith.negf %136 : vector<8x128xf32>
    %138 = math.exp %137 : vector<8x128xf32>
    %cst_34 = arith.constant 1.000000e+00 : f32
    %139 = vector.broadcast %cst_34 : f32 to vector<8x128xf32>
    %140 = arith.addf %139, %138 : vector<8x128xf32>
    %141 = arith.divf %139, %140 : vector<8x128xf32>
    %142 = vector.extract_strided_slice %129 {offsets = [0, 256], sizes = [8, 128], strides = [1, 1]} : vector<8x512xf32> to vector<8x128xf32>
    %143 = math.tanh %142 : vector<8x128xf32>
    %144 = vector.extract_strided_slice %129 {offsets = [0, 384], sizes = [8, 128], strides = [1, 1]} : vector<8x512xf32> to vector<8x128xf32>
    %145 = arith.negf %144 : vector<8x128xf32>
    %146 = math.exp %145 : vector<8x128xf32>
    %cst_35 = arith.constant 1.000000e+00 : f32
    %147 = vector.broadcast %cst_35 : f32 to vector<8x128xf32>
    %148 = arith.addf %147, %146 : vector<8x128xf32>
    %149 = arith.divf %147, %148 : vector<8x128xf32>
    %150 = arith.mulf %141, %94 : vector<8x128xf32>
    %151 = arith.mulf %135, %143 : vector<8x128xf32>
    %152 = arith.addf %150, %151 : vector<8x128xf32>
    %153 = math.tanh %152 : vector<8x128xf32>
    %154 = arith.mulf %149, %153 : vector<8x128xf32>
    %cst_36 = arith.constant dense<0.000000e+00> : vector<8x512xf32>
    %155 = tpu.matmul %154, %1, %cst_36 {dimension_numbers = #tpu.dot_dimension_numbers<[1], [0], [0], [1], [0, 0, 1, 1], [], []>} : vector<8x128xf32>, vector<128x512xf32>, vector<8x512xf32> -> vector<8x512xf32>
    %cst_37 = arith.constant dense<0.000000e+00> : vector<8x512xf32>
    %156 = tpu.matmul %126, %2, %cst_37 {dimension_numbers = #tpu.dot_dimension_numbers<[1], [0], [0], [1], [0, 0, 1, 1], [], []>} : vector<8x128xf32>, vector<128x512xf32>, vector<8x512xf32> -> vector<8x512xf32>
    %157 = arith.addf %155, %156 : vector<8x512xf32>
    %158 = vector.broadcast %3 : vector<1x512xf32> to vector<8x512xf32>
    %159 = arith.addf %157, %158 : vector<8x512xf32>
    %160 = vector.extract_strided_slice %159 {offsets = [0, 0], sizes = [8, 128], strides = [1, 1]} : vector<8x512xf32> to vector<8x128xf32>
    %161 = arith.negf %160 : vector<8x128xf32>
    %162 = math.exp %161 : vector<8x128xf32>
    %cst_38 = arith.constant 1.000000e+00 : f32
    %163 = vector.broadcast %cst_38 : f32 to vector<8x128xf32>
    %164 = arith.addf %163, %162 : vector<8x128xf32>
    %165 = arith.divf %163, %164 : vector<8x128xf32>
    %166 = vector.extract_strided_slice %159 {offsets = [0, 128], sizes = [8, 128], strides = [1, 1]} : vector<8x512xf32> to vector<8x128xf32>
    %167 = arith.negf %166 : vector<8x128xf32>
    %168 = math.exp %167 : vector<8x128xf32>
    %cst_39 = arith.constant 1.000000e+00 : f32
    %169 = vector.broadcast %cst_39 : f32 to vector<8x128xf32>
    %170 = arith.addf %169, %168 : vector<8x128xf32>
    %171 = arith.divf %169, %170 : vector<8x128xf32>
    %172 = vector.extract_strided_slice %159 {offsets = [0, 256], sizes = [8, 128], strides = [1, 1]} : vector<8x512xf32> to vector<8x128xf32>
    %173 = math.tanh %172 : vector<8x128xf32>
    %174 = vector.extract_strided_slice %159 {offsets = [0, 384], sizes = [8, 128], strides = [1, 1]} : vector<8x512xf32> to vector<8x128xf32>
    %175 = arith.negf %174 : vector<8x128xf32>
    %176 = math.exp %175 : vector<8x128xf32>
    %cst_40 = arith.constant 1.000000e+00 : f32
    %177 = vector.broadcast %cst_40 : f32 to vector<8x128xf32>
    %178 = arith.addf %177, %176 : vector<8x128xf32>
    %179 = arith.divf %177, %178 : vector<8x128xf32>
    %180 = arith.mulf %171, %124 : vector<8x128xf32>
    %181 = arith.mulf %165, %173 : vector<8x128xf32>
    %182 = arith.addf %180, %181 : vector<8x128xf32>
    %183 = math.tanh %182 : vector<8x128xf32>
    %184 = arith.mulf %179, %183 : vector<8x128xf32>
    %185 = vector.extract_strided_slice %9 {offsets = [24, 0], sizes = [8, 512], strides = [1, 1]} : vector<64x512xf32> to vector<8x512xf32>
    %cst_41 = arith.constant dense<0.000000e+00> : vector<8x512xf32>
    %186 = tpu.matmul %154, %0, %cst_41 {dimension_numbers = #tpu.dot_dimension_numbers<[1], [0], [0], [1], [0, 0, 1, 1], [], []>} : vector<8x128xf32>, vector<128x512xf32>, vector<8x512xf32> -> vector<8x512xf32>
    %187 = arith.addf %185, %186 : vector<8x512xf32>
    %188 = vector.extract_strided_slice %187 {offsets = [0, 0], sizes = [8, 128], strides = [1, 1]} : vector<8x512xf32> to vector<8x128xf32>
    %189 = arith.negf %188 : vector<8x128xf32>
    %190 = math.exp %189 : vector<8x128xf32>
    %cst_42 = arith.constant 1.000000e+00 : f32
    %191 = vector.broadcast %cst_42 : f32 to vector<8x128xf32>
    %192 = arith.addf %191, %190 : vector<8x128xf32>
    %193 = arith.divf %191, %192 : vector<8x128xf32>
    %194 = vector.extract_strided_slice %187 {offsets = [0, 128], sizes = [8, 128], strides = [1, 1]} : vector<8x512xf32> to vector<8x128xf32>
    %195 = arith.negf %194 : vector<8x128xf32>
    %196 = math.exp %195 : vector<8x128xf32>
    %cst_43 = arith.constant 1.000000e+00 : f32
    %197 = vector.broadcast %cst_43 : f32 to vector<8x128xf32>
    %198 = arith.addf %197, %196 : vector<8x128xf32>
    %199 = arith.divf %197, %198 : vector<8x128xf32>
    %200 = vector.extract_strided_slice %187 {offsets = [0, 256], sizes = [8, 128], strides = [1, 1]} : vector<8x512xf32> to vector<8x128xf32>
    %201 = math.tanh %200 : vector<8x128xf32>
    %202 = vector.extract_strided_slice %187 {offsets = [0, 384], sizes = [8, 128], strides = [1, 1]} : vector<8x512xf32> to vector<8x128xf32>
    %203 = arith.negf %202 : vector<8x128xf32>
    %204 = math.exp %203 : vector<8x128xf32>
    %cst_44 = arith.constant 1.000000e+00 : f32
    %205 = vector.broadcast %cst_44 : f32 to vector<8x128xf32>
    %206 = arith.addf %205, %204 : vector<8x128xf32>
    %207 = arith.divf %205, %206 : vector<8x128xf32>
    %208 = arith.mulf %199, %152 : vector<8x128xf32>
    %209 = arith.mulf %193, %201 : vector<8x128xf32>
    %210 = arith.addf %208, %209 : vector<8x128xf32>
    %211 = math.tanh %210 : vector<8x128xf32>
    %212 = arith.mulf %207, %211 : vector<8x128xf32>
    %cst_45 = arith.constant dense<0.000000e+00> : vector<8x512xf32>
    %213 = tpu.matmul %212, %1, %cst_45 {dimension_numbers = #tpu.dot_dimension_numbers<[1], [0], [0], [1], [0, 0, 1, 1], [], []>} : vector<8x128xf32>, vector<128x512xf32>, vector<8x512xf32> -> vector<8x512xf32>
    %cst_46 = arith.constant dense<0.000000e+00> : vector<8x512xf32>
    %214 = tpu.matmul %184, %2, %cst_46 {dimension_numbers = #tpu.dot_dimension_numbers<[1], [0], [0], [1], [0, 0, 1, 1], [], []>} : vector<8x128xf32>, vector<128x512xf32>, vector<8x512xf32> -> vector<8x512xf32>
    %215 = arith.addf %213, %214 : vector<8x512xf32>
    %216 = vector.broadcast %3 : vector<1x512xf32> to vector<8x512xf32>
    %217 = arith.addf %215, %216 : vector<8x512xf32>
    %218 = vector.extract_strided_slice %217 {offsets = [0, 0], sizes = [8, 128], strides = [1, 1]} : vector<8x512xf32> to vector<8x128xf32>
    %219 = arith.negf %218 : vector<8x128xf32>
    %220 = math.exp %219 : vector<8x128xf32>
    %cst_47 = arith.constant 1.000000e+00 : f32
    %221 = vector.broadcast %cst_47 : f32 to vector<8x128xf32>
    %222 = arith.addf %221, %220 : vector<8x128xf32>
    %223 = arith.divf %221, %222 : vector<8x128xf32>
    %224 = vector.extract_strided_slice %217 {offsets = [0, 128], sizes = [8, 128], strides = [1, 1]} : vector<8x512xf32> to vector<8x128xf32>
    %225 = arith.negf %224 : vector<8x128xf32>
    %226 = math.exp %225 : vector<8x128xf32>
    %cst_48 = arith.constant 1.000000e+00 : f32
    %227 = vector.broadcast %cst_48 : f32 to vector<8x128xf32>
    %228 = arith.addf %227, %226 : vector<8x128xf32>
    %229 = arith.divf %227, %228 : vector<8x128xf32>
    %230 = vector.extract_strided_slice %217 {offsets = [0, 256], sizes = [8, 128], strides = [1, 1]} : vector<8x512xf32> to vector<8x128xf32>
    %231 = math.tanh %230 : vector<8x128xf32>
    %232 = vector.extract_strided_slice %217 {offsets = [0, 384], sizes = [8, 128], strides = [1, 1]} : vector<8x512xf32> to vector<8x128xf32>
    %233 = arith.negf %232 : vector<8x128xf32>
    %234 = math.exp %233 : vector<8x128xf32>
    %cst_49 = arith.constant 1.000000e+00 : f32
    %235 = vector.broadcast %cst_49 : f32 to vector<8x128xf32>
    %236 = arith.addf %235, %234 : vector<8x128xf32>
    %237 = arith.divf %235, %236 : vector<8x128xf32>
    %238 = arith.mulf %229, %182 : vector<8x128xf32>
    %239 = arith.mulf %223, %231 : vector<8x128xf32>
    %240 = arith.addf %238, %239 : vector<8x128xf32>
    %241 = math.tanh %240 : vector<8x128xf32>
    %242 = arith.mulf %237, %241 : vector<8x128xf32>
    %243 = vector.extract_strided_slice %9 {offsets = [32, 0], sizes = [8, 512], strides = [1, 1]} : vector<64x512xf32> to vector<8x512xf32>
    %cst_50 = arith.constant dense<0.000000e+00> : vector<8x512xf32>
    %244 = tpu.matmul %212, %0, %cst_50 {dimension_numbers = #tpu.dot_dimension_numbers<[1], [0], [0], [1], [0, 0, 1, 1], [], []>} : vector<8x128xf32>, vector<128x512xf32>, vector<8x512xf32> -> vector<8x512xf32>
    %245 = arith.addf %243, %244 : vector<8x512xf32>
    %246 = vector.extract_strided_slice %245 {offsets = [0, 0], sizes = [8, 128], strides = [1, 1]} : vector<8x512xf32> to vector<8x128xf32>
    %247 = arith.negf %246 : vector<8x128xf32>
    %248 = math.exp %247 : vector<8x128xf32>
    %cst_51 = arith.constant 1.000000e+00 : f32
    %249 = vector.broadcast %cst_51 : f32 to vector<8x128xf32>
    %250 = arith.addf %249, %248 : vector<8x128xf32>
    %251 = arith.divf %249, %250 : vector<8x128xf32>
    %252 = vector.extract_strided_slice %245 {offsets = [0, 128], sizes = [8, 128], strides = [1, 1]} : vector<8x512xf32> to vector<8x128xf32>
    %253 = arith.negf %252 : vector<8x128xf32>
    %254 = math.exp %253 : vector<8x128xf32>
    %cst_52 = arith.constant 1.000000e+00 : f32
    %255 = vector.broadcast %cst_52 : f32 to vector<8x128xf32>
    %256 = arith.addf %255, %254 : vector<8x128xf32>
    %257 = arith.divf %255, %256 : vector<8x128xf32>
    %258 = vector.extract_strided_slice %245 {offsets = [0, 256], sizes = [8, 128], strides = [1, 1]} : vector<8x512xf32> to vector<8x128xf32>
    %259 = math.tanh %258 : vector<8x128xf32>
    %260 = vector.extract_strided_slice %245 {offsets = [0, 384], sizes = [8, 128], strides = [1, 1]} : vector<8x512xf32> to vector<8x128xf32>
    %261 = arith.negf %260 : vector<8x128xf32>
    %262 = math.exp %261 : vector<8x128xf32>
    %cst_53 = arith.constant 1.000000e+00 : f32
    %263 = vector.broadcast %cst_53 : f32 to vector<8x128xf32>
    %264 = arith.addf %263, %262 : vector<8x128xf32>
    %265 = arith.divf %263, %264 : vector<8x128xf32>
    %266 = arith.mulf %257, %210 : vector<8x128xf32>
    %267 = arith.mulf %251, %259 : vector<8x128xf32>
    %268 = arith.addf %266, %267 : vector<8x128xf32>
    %269 = math.tanh %268 : vector<8x128xf32>
    %270 = arith.mulf %265, %269 : vector<8x128xf32>
    %cst_54 = arith.constant dense<0.000000e+00> : vector<8x512xf32>
    %271 = tpu.matmul %270, %1, %cst_54 {dimension_numbers = #tpu.dot_dimension_numbers<[1], [0], [0], [1], [0, 0, 1, 1], [], []>} : vector<8x128xf32>, vector<128x512xf32>, vector<8x512xf32> -> vector<8x512xf32>
    %cst_55 = arith.constant dense<0.000000e+00> : vector<8x512xf32>
    %272 = tpu.matmul %242, %2, %cst_55 {dimension_numbers = #tpu.dot_dimension_numbers<[1], [0], [0], [1], [0, 0, 1, 1], [], []>} : vector<8x128xf32>, vector<128x512xf32>, vector<8x512xf32> -> vector<8x512xf32>
    %273 = arith.addf %271, %272 : vector<8x512xf32>
    %274 = vector.broadcast %3 : vector<1x512xf32> to vector<8x512xf32>
    %275 = arith.addf %273, %274 : vector<8x512xf32>
    %276 = vector.extract_strided_slice %275 {offsets = [0, 0], sizes = [8, 128], strides = [1, 1]} : vector<8x512xf32> to vector<8x128xf32>
    %277 = arith.negf %276 : vector<8x128xf32>
    %278 = math.exp %277 : vector<8x128xf32>
    %cst_56 = arith.constant 1.000000e+00 : f32
    %279 = vector.broadcast %cst_56 : f32 to vector<8x128xf32>
    %280 = arith.addf %279, %278 : vector<8x128xf32>
    %281 = arith.divf %279, %280 : vector<8x128xf32>
    %282 = vector.extract_strided_slice %275 {offsets = [0, 128], sizes = [8, 128], strides = [1, 1]} : vector<8x512xf32> to vector<8x128xf32>
    %283 = arith.negf %282 : vector<8x128xf32>
    %284 = math.exp %283 : vector<8x128xf32>
    %cst_57 = arith.constant 1.000000e+00 : f32
    %285 = vector.broadcast %cst_57 : f32 to vector<8x128xf32>
    %286 = arith.addf %285, %284 : vector<8x128xf32>
    %287 = arith.divf %285, %286 : vector<8x128xf32>
    %288 = vector.extract_strided_slice %275 {offsets = [0, 256], sizes = [8, 128], strides = [1, 1]} : vector<8x512xf32> to vector<8x128xf32>
    %289 = math.tanh %288 : vector<8x128xf32>
    %290 = vector.extract_strided_slice %275 {offsets = [0, 384], sizes = [8, 128], strides = [1, 1]} : vector<8x512xf32> to vector<8x128xf32>
    %291 = arith.negf %290 : vector<8x128xf32>
    %292 = math.exp %291 : vector<8x128xf32>
    %cst_58 = arith.constant 1.000000e+00 : f32
    %293 = vector.broadcast %cst_58 : f32 to vector<8x128xf32>
    %294 = arith.addf %293, %292 : vector<8x128xf32>
    %295 = arith.divf %293, %294 : vector<8x128xf32>
    %296 = arith.mulf %287, %240 : vector<8x128xf32>
    %297 = arith.mulf %281, %289 : vector<8x128xf32>
    %298 = arith.addf %296, %297 : vector<8x128xf32>
    %299 = math.tanh %298 : vector<8x128xf32>
    %300 = arith.mulf %295, %299 : vector<8x128xf32>
    %301 = vector.extract_strided_slice %9 {offsets = [40, 0], sizes = [8, 512], strides = [1, 1]} : vector<64x512xf32> to vector<8x512xf32>
    %cst_59 = arith.constant dense<0.000000e+00> : vector<8x512xf32>
    %302 = tpu.matmul %270, %0, %cst_59 {dimension_numbers = #tpu.dot_dimension_numbers<[1], [0], [0], [1], [0, 0, 1, 1], [], []>} : vector<8x128xf32>, vector<128x512xf32>, vector<8x512xf32> -> vector<8x512xf32>
    %303 = arith.addf %301, %302 : vector<8x512xf32>
    %304 = vector.extract_strided_slice %303 {offsets = [0, 0], sizes = [8, 128], strides = [1, 1]} : vector<8x512xf32> to vector<8x128xf32>
    %305 = arith.negf %304 : vector<8x128xf32>
    %306 = math.exp %305 : vector<8x128xf32>
    %cst_60 = arith.constant 1.000000e+00 : f32
    %307 = vector.broadcast %cst_60 : f32 to vector<8x128xf32>
    %308 = arith.addf %307, %306 : vector<8x128xf32>
    %309 = arith.divf %307, %308 : vector<8x128xf32>
    %310 = vector.extract_strided_slice %303 {offsets = [0, 128], sizes = [8, 128], strides = [1, 1]} : vector<8x512xf32> to vector<8x128xf32>
    %311 = arith.negf %310 : vector<8x128xf32>
    %312 = math.exp %311 : vector<8x128xf32>
    %cst_61 = arith.constant 1.000000e+00 : f32
    %313 = vector.broadcast %cst_61 : f32 to vector<8x128xf32>
    %314 = arith.addf %313, %312 : vector<8x128xf32>
    %315 = arith.divf %313, %314 : vector<8x128xf32>
    %316 = vector.extract_strided_slice %303 {offsets = [0, 256], sizes = [8, 128], strides = [1, 1]} : vector<8x512xf32> to vector<8x128xf32>
    %317 = math.tanh %316 : vector<8x128xf32>
    %318 = vector.extract_strided_slice %303 {offsets = [0, 384], sizes = [8, 128], strides = [1, 1]} : vector<8x512xf32> to vector<8x128xf32>
    %319 = arith.negf %318 : vector<8x128xf32>
    %320 = math.exp %319 : vector<8x128xf32>
    %cst_62 = arith.constant 1.000000e+00 : f32
    %321 = vector.broadcast %cst_62 : f32 to vector<8x128xf32>
    %322 = arith.addf %321, %320 : vector<8x128xf32>
    %323 = arith.divf %321, %322 : vector<8x128xf32>
    %324 = arith.mulf %315, %268 : vector<8x128xf32>
    %325 = arith.mulf %309, %317 : vector<8x128xf32>
    %326 = arith.addf %324, %325 : vector<8x128xf32>
    %327 = math.tanh %326 : vector<8x128xf32>
    %328 = arith.mulf %323, %327 : vector<8x128xf32>
    %cst_63 = arith.constant dense<0.000000e+00> : vector<8x512xf32>
    %329 = tpu.matmul %328, %1, %cst_63 {dimension_numbers = #tpu.dot_dimension_numbers<[1], [0], [0], [1], [0, 0, 1, 1], [], []>} : vector<8x128xf32>, vector<128x512xf32>, vector<8x512xf32> -> vector<8x512xf32>
    %cst_64 = arith.constant dense<0.000000e+00> : vector<8x512xf32>
    %330 = tpu.matmul %300, %2, %cst_64 {dimension_numbers = #tpu.dot_dimension_numbers<[1], [0], [0], [1], [0, 0, 1, 1], [], []>} : vector<8x128xf32>, vector<128x512xf32>, vector<8x512xf32> -> vector<8x512xf32>
    %331 = arith.addf %329, %330 : vector<8x512xf32>
    %332 = vector.broadcast %3 : vector<1x512xf32> to vector<8x512xf32>
    %333 = arith.addf %331, %332 : vector<8x512xf32>
    %334 = vector.extract_strided_slice %333 {offsets = [0, 0], sizes = [8, 128], strides = [1, 1]} : vector<8x512xf32> to vector<8x128xf32>
    %335 = arith.negf %334 : vector<8x128xf32>
    %336 = math.exp %335 : vector<8x128xf32>
    %cst_65 = arith.constant 1.000000e+00 : f32
    %337 = vector.broadcast %cst_65 : f32 to vector<8x128xf32>
    %338 = arith.addf %337, %336 : vector<8x128xf32>
    %339 = arith.divf %337, %338 : vector<8x128xf32>
    %340 = vector.extract_strided_slice %333 {offsets = [0, 128], sizes = [8, 128], strides = [1, 1]} : vector<8x512xf32> to vector<8x128xf32>
    %341 = arith.negf %340 : vector<8x128xf32>
    %342 = math.exp %341 : vector<8x128xf32>
    %cst_66 = arith.constant 1.000000e+00 : f32
    %343 = vector.broadcast %cst_66 : f32 to vector<8x128xf32>
    %344 = arith.addf %343, %342 : vector<8x128xf32>
    %345 = arith.divf %343, %344 : vector<8x128xf32>
    %346 = vector.extract_strided_slice %333 {offsets = [0, 256], sizes = [8, 128], strides = [1, 1]} : vector<8x512xf32> to vector<8x128xf32>
    %347 = math.tanh %346 : vector<8x128xf32>
    %348 = vector.extract_strided_slice %333 {offsets = [0, 384], sizes = [8, 128], strides = [1, 1]} : vector<8x512xf32> to vector<8x128xf32>
    %349 = arith.negf %348 : vector<8x128xf32>
    %350 = math.exp %349 : vector<8x128xf32>
    %cst_67 = arith.constant 1.000000e+00 : f32
    %351 = vector.broadcast %cst_67 : f32 to vector<8x128xf32>
    %352 = arith.addf %351, %350 : vector<8x128xf32>
    %353 = arith.divf %351, %352 : vector<8x128xf32>
    %354 = arith.mulf %345, %298 : vector<8x128xf32>
    %355 = arith.mulf %339, %347 : vector<8x128xf32>
    %356 = arith.addf %354, %355 : vector<8x128xf32>
    %357 = math.tanh %356 : vector<8x128xf32>
    %358 = arith.mulf %353, %357 : vector<8x128xf32>
    %359 = vector.extract_strided_slice %9 {offsets = [48, 0], sizes = [8, 512], strides = [1, 1]} : vector<64x512xf32> to vector<8x512xf32>
    %cst_68 = arith.constant dense<0.000000e+00> : vector<8x512xf32>
    %360 = tpu.matmul %328, %0, %cst_68 {dimension_numbers = #tpu.dot_dimension_numbers<[1], [0], [0], [1], [0, 0, 1, 1], [], []>} : vector<8x128xf32>, vector<128x512xf32>, vector<8x512xf32> -> vector<8x512xf32>
    %361 = arith.addf %359, %360 : vector<8x512xf32>
    %362 = vector.extract_strided_slice %361 {offsets = [0, 0], sizes = [8, 128], strides = [1, 1]} : vector<8x512xf32> to vector<8x128xf32>
    %363 = arith.negf %362 : vector<8x128xf32>
    %364 = math.exp %363 : vector<8x128xf32>
    %cst_69 = arith.constant 1.000000e+00 : f32
    %365 = vector.broadcast %cst_69 : f32 to vector<8x128xf32>
    %366 = arith.addf %365, %364 : vector<8x128xf32>
    %367 = arith.divf %365, %366 : vector<8x128xf32>
    %368 = vector.extract_strided_slice %361 {offsets = [0, 128], sizes = [8, 128], strides = [1, 1]} : vector<8x512xf32> to vector<8x128xf32>
    %369 = arith.negf %368 : vector<8x128xf32>
    %370 = math.exp %369 : vector<8x128xf32>
    %cst_70 = arith.constant 1.000000e+00 : f32
    %371 = vector.broadcast %cst_70 : f32 to vector<8x128xf32>
    %372 = arith.addf %371, %370 : vector<8x128xf32>
    %373 = arith.divf %371, %372 : vector<8x128xf32>
    %374 = vector.extract_strided_slice %361 {offsets = [0, 256], sizes = [8, 128], strides = [1, 1]} : vector<8x512xf32> to vector<8x128xf32>
    %375 = math.tanh %374 : vector<8x128xf32>
    %376 = vector.extract_strided_slice %361 {offsets = [0, 384], sizes = [8, 128], strides = [1, 1]} : vector<8x512xf32> to vector<8x128xf32>
    %377 = arith.negf %376 : vector<8x128xf32>
    %378 = math.exp %377 : vector<8x128xf32>
    %cst_71 = arith.constant 1.000000e+00 : f32
    %379 = vector.broadcast %cst_71 : f32 to vector<8x128xf32>
    %380 = arith.addf %379, %378 : vector<8x128xf32>
    %381 = arith.divf %379, %380 : vector<8x128xf32>
    %382 = arith.mulf %373, %326 : vector<8x128xf32>
    %383 = arith.mulf %367, %375 : vector<8x128xf32>
    %384 = arith.addf %382, %383 : vector<8x128xf32>
    %385 = math.tanh %384 : vector<8x128xf32>
    %386 = arith.mulf %381, %385 : vector<8x128xf32>
    %cst_72 = arith.constant dense<0.000000e+00> : vector<8x512xf32>
    %387 = tpu.matmul %386, %1, %cst_72 {dimension_numbers = #tpu.dot_dimension_numbers<[1], [0], [0], [1], [0, 0, 1, 1], [], []>} : vector<8x128xf32>, vector<128x512xf32>, vector<8x512xf32> -> vector<8x512xf32>
    %cst_73 = arith.constant dense<0.000000e+00> : vector<8x512xf32>
    %388 = tpu.matmul %358, %2, %cst_73 {dimension_numbers = #tpu.dot_dimension_numbers<[1], [0], [0], [1], [0, 0, 1, 1], [], []>} : vector<8x128xf32>, vector<128x512xf32>, vector<8x512xf32> -> vector<8x512xf32>
    %389 = arith.addf %387, %388 : vector<8x512xf32>
    %390 = vector.broadcast %3 : vector<1x512xf32> to vector<8x512xf32>
    %391 = arith.addf %389, %390 : vector<8x512xf32>
    %392 = vector.extract_strided_slice %391 {offsets = [0, 0], sizes = [8, 128], strides = [1, 1]} : vector<8x512xf32> to vector<8x128xf32>
    %393 = arith.negf %392 : vector<8x128xf32>
    %394 = math.exp %393 : vector<8x128xf32>
    %cst_74 = arith.constant 1.000000e+00 : f32
    %395 = vector.broadcast %cst_74 : f32 to vector<8x128xf32>
    %396 = arith.addf %395, %394 : vector<8x128xf32>
    %397 = arith.divf %395, %396 : vector<8x128xf32>
    %398 = vector.extract_strided_slice %391 {offsets = [0, 128], sizes = [8, 128], strides = [1, 1]} : vector<8x512xf32> to vector<8x128xf32>
    %399 = arith.negf %398 : vector<8x128xf32>
    %400 = math.exp %399 : vector<8x128xf32>
    %cst_75 = arith.constant 1.000000e+00 : f32
    %401 = vector.broadcast %cst_75 : f32 to vector<8x128xf32>
    %402 = arith.addf %401, %400 : vector<8x128xf32>
    %403 = arith.divf %401, %402 : vector<8x128xf32>
    %404 = vector.extract_strided_slice %391 {offsets = [0, 256], sizes = [8, 128], strides = [1, 1]} : vector<8x512xf32> to vector<8x128xf32>
    %405 = math.tanh %404 : vector<8x128xf32>
    %406 = vector.extract_strided_slice %391 {offsets = [0, 384], sizes = [8, 128], strides = [1, 1]} : vector<8x512xf32> to vector<8x128xf32>
    %407 = arith.negf %406 : vector<8x128xf32>
    %408 = math.exp %407 : vector<8x128xf32>
    %cst_76 = arith.constant 1.000000e+00 : f32
    %409 = vector.broadcast %cst_76 : f32 to vector<8x128xf32>
    %410 = arith.addf %409, %408 : vector<8x128xf32>
    %411 = arith.divf %409, %410 : vector<8x128xf32>
    %412 = arith.mulf %403, %356 : vector<8x128xf32>
    %413 = arith.mulf %397, %405 : vector<8x128xf32>
    %414 = arith.addf %412, %413 : vector<8x128xf32>
    %415 = math.tanh %414 : vector<8x128xf32>
    %416 = arith.mulf %411, %415 : vector<8x128xf32>
    %417 = vector.extract_strided_slice %9 {offsets = [56, 0], sizes = [8, 512], strides = [1, 1]} : vector<64x512xf32> to vector<8x512xf32>
    %cst_77 = arith.constant dense<0.000000e+00> : vector<8x512xf32>
    %418 = tpu.matmul %386, %0, %cst_77 {dimension_numbers = #tpu.dot_dimension_numbers<[1], [0], [0], [1], [0, 0, 1, 1], [], []>} : vector<8x128xf32>, vector<128x512xf32>, vector<8x512xf32> -> vector<8x512xf32>
    %419 = arith.addf %417, %418 : vector<8x512xf32>
    %420 = vector.extract_strided_slice %419 {offsets = [0, 0], sizes = [8, 128], strides = [1, 1]} : vector<8x512xf32> to vector<8x128xf32>
    %421 = arith.negf %420 : vector<8x128xf32>
    %422 = math.exp %421 : vector<8x128xf32>
    %cst_78 = arith.constant 1.000000e+00 : f32
    %423 = vector.broadcast %cst_78 : f32 to vector<8x128xf32>
    %424 = arith.addf %423, %422 : vector<8x128xf32>
    %425 = arith.divf %423, %424 : vector<8x128xf32>
    %426 = vector.extract_strided_slice %419 {offsets = [0, 128], sizes = [8, 128], strides = [1, 1]} : vector<8x512xf32> to vector<8x128xf32>
    %427 = arith.negf %426 : vector<8x128xf32>
    %428 = math.exp %427 : vector<8x128xf32>
    %cst_79 = arith.constant 1.000000e+00 : f32
    %429 = vector.broadcast %cst_79 : f32 to vector<8x128xf32>
    %430 = arith.addf %429, %428 : vector<8x128xf32>
    %431 = arith.divf %429, %430 : vector<8x128xf32>
    %432 = vector.extract_strided_slice %419 {offsets = [0, 256], sizes = [8, 128], strides = [1, 1]} : vector<8x512xf32> to vector<8x128xf32>
    %433 = math.tanh %432 : vector<8x128xf32>
    %434 = vector.extract_strided_slice %419 {offsets = [0, 384], sizes = [8, 128], strides = [1, 1]} : vector<8x512xf32> to vector<8x128xf32>
    %435 = arith.negf %434 : vector<8x128xf32>
    %436 = math.exp %435 : vector<8x128xf32>
    %cst_80 = arith.constant 1.000000e+00 : f32
    %437 = vector.broadcast %cst_80 : f32 to vector<8x128xf32>
    %438 = arith.addf %437, %436 : vector<8x128xf32>
    %439 = arith.divf %437, %438 : vector<8x128xf32>
    %440 = arith.mulf %431, %384 : vector<8x128xf32>
    %441 = arith.mulf %425, %433 : vector<8x128xf32>
    %442 = arith.addf %440, %441 : vector<8x128xf32>
    %443 = math.tanh %442 : vector<8x128xf32>
    %444 = arith.mulf %439, %443 : vector<8x128xf32>
    %cst_81 = arith.constant dense<0.000000e+00> : vector<8x512xf32>
    %445 = tpu.matmul %444, %1, %cst_81 {dimension_numbers = #tpu.dot_dimension_numbers<[1], [0], [0], [1], [0, 0, 1, 1], [], []>} : vector<8x128xf32>, vector<128x512xf32>, vector<8x512xf32> -> vector<8x512xf32>
    %cst_82 = arith.constant dense<0.000000e+00> : vector<8x512xf32>
    %446 = tpu.matmul %416, %2, %cst_82 {dimension_numbers = #tpu.dot_dimension_numbers<[1], [0], [0], [1], [0, 0, 1, 1], [], []>} : vector<8x128xf32>, vector<128x512xf32>, vector<8x512xf32> -> vector<8x512xf32>
    %447 = arith.addf %445, %446 : vector<8x512xf32>
    %448 = vector.broadcast %3 : vector<1x512xf32> to vector<8x512xf32>
    %449 = arith.addf %447, %448 : vector<8x512xf32>
    %450 = vector.extract_strided_slice %449 {offsets = [0, 0], sizes = [8, 128], strides = [1, 1]} : vector<8x512xf32> to vector<8x128xf32>
    %451 = arith.negf %450 : vector<8x128xf32>
    %452 = math.exp %451 : vector<8x128xf32>
    %cst_83 = arith.constant 1.000000e+00 : f32
    %453 = vector.broadcast %cst_83 : f32 to vector<8x128xf32>
    %454 = arith.addf %453, %452 : vector<8x128xf32>
    %455 = arith.divf %453, %454 : vector<8x128xf32>
    %456 = vector.extract_strided_slice %449 {offsets = [0, 128], sizes = [8, 128], strides = [1, 1]} : vector<8x512xf32> to vector<8x128xf32>
    %457 = arith.negf %456 : vector<8x128xf32>
    %458 = math.exp %457 : vector<8x128xf32>
    %cst_84 = arith.constant 1.000000e+00 : f32
    %459 = vector.broadcast %cst_84 : f32 to vector<8x128xf32>
    %460 = arith.addf %459, %458 : vector<8x128xf32>
    %461 = arith.divf %459, %460 : vector<8x128xf32>
    %462 = vector.extract_strided_slice %449 {offsets = [0, 256], sizes = [8, 128], strides = [1, 1]} : vector<8x512xf32> to vector<8x128xf32>
    %463 = math.tanh %462 : vector<8x128xf32>
    %464 = vector.extract_strided_slice %449 {offsets = [0, 384], sizes = [8, 128], strides = [1, 1]} : vector<8x512xf32> to vector<8x128xf32>
    %465 = arith.negf %464 : vector<8x128xf32>
    %466 = math.exp %465 : vector<8x128xf32>
    %cst_85 = arith.constant 1.000000e+00 : f32
    %467 = vector.broadcast %cst_85 : f32 to vector<8x128xf32>
    %468 = arith.addf %467, %466 : vector<8x128xf32>
    %469 = arith.divf %467, %468 : vector<8x128xf32>
    %470 = arith.mulf %461, %414 : vector<8x128xf32>
    %471 = arith.mulf %455, %463 : vector<8x128xf32>
    %472 = arith.addf %470, %471 : vector<8x128xf32>
    %473 = math.tanh %472 : vector<8x128xf32>
    %474 = arith.mulf %469, %473 : vector<8x128xf32>
    %c0_86 = arith.constant 0 : index
    %c0_87 = arith.constant 0 : index
    %475 = vector.load %arg7[%c0_86, %c0_87] : memref<128x8xf32, #tpu.memory_space<vmem>>, vector<128x8xf32>
    %cst_88 = arith.constant dense<0.000000e+00> : vector<8x8xf32>
    %476 = tpu.matmul %474, %475, %cst_88 {dimension_numbers = #tpu.dot_dimension_numbers<[1], [0], [0], [1], [0, 0, 1, 1], [], []>} : vector<8x128xf32>, vector<128x8xf32>, vector<8x8xf32> -> vector<8x8xf32>
    %c0_89 = arith.constant 0 : index
    %c0_90 = arith.constant 0 : index
    %477 = vector.load %arg8[%c0_89, %c0_90] : memref<1x8xf32, #tpu.memory_space<vmem>>, vector<1x8xf32>
    %478 = vector.broadcast %477 : vector<1x8xf32> to vector<8x8xf32>
    %479 = arith.addf %476, %478 : vector<8x8xf32>
    %c0_91 = arith.constant 0 : index
    %c0_92 = arith.constant 0 : index
    %480 = vector.load %arg9[%c0_91, %c0_92] : memref<8x8xf32, #tpu.memory_space<vmem>>, vector<8x8xf32>
    tpu.vector_store %arg9[%c0_91, %c0_92], %479 {strides = array<i32>} : memref<8x8xf32, #tpu.memory_space<vmem>>, vector<8x8xf32>,
    return
  }
}

</mosaic_0001>

<bundles_post_ra>
// kernel: tpu_custom_call.1
= control target key start
LH: loop header
LB: loop body
LE: loop exit
PB: predicated region body
PF: predicated region fallthrough
CT: control target
= control target key end

     0   :  { %14 = vsyncpa [#allocation3], 0  ;;  %s8115_s0 = inlined_call_operand.vmem [shape: f32[64,16], index: 0, kind: input, shape index: {}]   ;;  %s8116_s1 = inlined_call_operand.vmem [shape: f32[16,512], index: 1, kind: input, shape index: {}]   ;;  %s8117_s2 = inlined_call_operand.vmem [shape: f32[1,512], index: 2, kind: input, shape index: {}]   ;;  %s8118_s3 = inlined_call_operand.hbm [shape: f32[128,512], index: 3, kind: input, shape index: {}]   ;;  %s8119_s4 = inlined_call_operand.hbm [shape: f32[128,512], index: 4, kind: input, shape index: {}]   ;;  %s8120_s5 = inlined_call_operand.hbm [shape: f32[128,512], index: 5, kind: input, shape index: {}]   ;;  %s8121_s6 = inlined_call_operand.vmem [shape: f32[1,512], index: 6, kind: input, shape index: {}]   ;;  %s8122_s7 = inlined_call_operand.vmem [shape: f32[128,8], index: 7, kind: input, shape index: {}]   ;;  %s8123_s8 = inlined_call_operand.vmem [shape: f32[1,8], index: 8, kind: input, shape index: {}]   ;;  %s8124_s9 = inlined_call_operand.hbm [shape: f32[8,8], index: 9, kind: output, shape index: {}]  }
   0x1   :  { %15 = vsyncpa [#allocation6], 0 }
   0x2   :  { %16 = vsyncpa [#allocation4], 0  ;;  %s6684_s30 = smov [#allocation5]   ;;  %s6685_s11 = smov [#allocation2]  }
   0x3   :  { %s40_s10 = sshll.u32 %s6684_s30, 4  ;;  %s28_s12 = sshll.u32 %s6685_s11, 4  ;;  %s41_s10 = int_to_ptr.vmem [resolvable:$true] %s40_s10  ;;  %s6743_s12 = int_to_ptr.vmem [resolvable:$true] %s28_s12 }
   0x4   :  { %s6590_s15 = scalar_lea.hbm %s8119_s4, 8192 }
   0x5   :  { %p6591_p0 = scmp.ne.s32.totalorder %s8119_s4, %s6590_s15  ;;  %p6594_p1 = scmp.lt.u32.totalorder %s6590_s15, %s8119_s4 }
   0x7   :  { %p6596_p2 = pnand %p6594_p1, %p6591_p0 }
   0x9   :  { %6599 = shalt.err (!%p6596_p2)
}
   0xa   :  { %s6600_s20 = scalar_lea.vmem %s41_s10, 8192  ;;  %p6605_p4 = scmp.lt.s32.totalorder %s41_s10, %s41_s10 }
   0xb   :  { %p6601_p3 = scmp.ne.s32.totalorder %s41_s10, %s6600_s20  ;;  %p6606_p5 = scmp.lt.s32.totalorder %s6600_s20, %s6600_s20 }
   0xd   :  { %p6607_p6 = por %p6606_p5, %p6605_p4 }
   0xf   :  { %p6608_p7 = pnand %p6607_p6, %p6601_p3 }
  0x11   :  { %6611 = shalt.err (!%p6608_p7)
}
  0x12   :  { %s6686_s21 = smov 512   ;;  %s6687_s22 = smov 32  }
  0x13   :  { %46 = dma.hbm_to_vmem [thread:$0]  %s8119_s4, 8192, %s41_s10, [#allocation6], %s6686_s21, %s6686_s21, %s6687_s22  }
  0x14   :  { %s6612_s27 = scalar_lea.hbm %s8118_s3, 8192 }
  0x15   :  { %p6613_p8 = scmp.ne.s32.totalorder %s8118_s3, %s6612_s27  ;;  %p6616_p9 = scmp.lt.u32.totalorder %s6612_s27, %s8118_s3 }
  0x17   :  { %p6618_p10 = pnand %p6616_p9, %p6613_p8 }
  0x19   :  { %6621 = shalt.err (!%p6618_p10)
}
  0x1a   :  { %s6622_s13 = scalar_lea.vmem %s6743_s12, 8192  ;;  %p6627_p12 = scmp.lt.s32.totalorder %s6743_s12, %s6743_s12 }
  0x1b   :  { %p6623_p11 = scmp.ne.s32.totalorder %s6743_s12, %s6622_s13  ;;  %p6628_p13 = scmp.lt.s32.totalorder %s6622_s13, %s6622_s13 }
  0x1d   :  { %p6629_p0 = por %p6628_p13, %p6627_p12 }
  0x1f   :  { %p6630_p1 = pnand %p6629_p0, %p6623_p11 }
  0x21   :  { %6633 = shalt.err (!%p6630_p1)
}
  0x22   :  { %34 = dma.hbm_to_vmem [thread:$0]  %s8118_s3, 8192, %s6743_s12, [#allocation3], %s6686_s21, %s6686_s21, %s6687_s22  }
  0x23   :  { %s6688_s14 = smov [#allocation7]   ;;  %s6634_s18 = scalar_lea.hbm %s8120_s5, 8192 }
  0x24   :  { %s52_s15 = sshll.u32 %s6688_s14, 4  ;;  %p6635_p2 = scmp.ne.s32.totalorder %s8120_s5, %s6634_s18  ;;  %s53_s15 = int_to_ptr.vmem [resolvable:$true] %s52_s15 }
  0x25   :  { %p6638_p3 = scmp.lt.u32.totalorder %s6634_s18, %s8120_s5 }
  0x27   :  { %p6640_p4 = pnand %p6638_p3, %p6635_p2 }
  0x29   :  { %6643 = shalt.err (!%p6640_p4)
}
  0x2a   :  { %s6644_s25 = scalar_lea.vmem %s53_s15, 8192  ;;  %p6649_p6 = scmp.lt.s32.totalorder %s53_s15, %s53_s15 }
  0x2b   :  { %p6645_p5 = scmp.ne.s32.totalorder %s53_s15, %s6644_s25  ;;  %p6650_p7 = scmp.lt.s32.totalorder %s6644_s25, %s6644_s25 }
  0x2d   :  { %p6651_p8 = por %p6650_p7, %p6649_p6 }
  0x2f   :  { %p6652_p9 = pnand %p6651_p8, %p6645_p5 }
  0x31   :  { %6655 = shalt.err (!%p6652_p9)
}
  0x32   :  { %58 = dma.hbm_to_vmem [thread:$0]  %s8120_s5, 8192, %s53_s15, [#allocation6], %s6686_s21, %s6686_s21, %s6687_s22  }
  0x33   :  { %6678 = dma.done.wait [#allocation3], 8192  }
  0x34   :  { %6679 = vsyncadd [#allocation3], 4294959104 }
  0x35   :  { %6680 = dma.done.wait [#allocation6], 16384  }
  0x36   :  { %6681 = vsyncadd [#allocation6], 4294950912  ;;  %v8125_v0 = vmov 0.0   ;;  %v276_v1 = vld [vmem:[%s8116_s1 + $0x8] sm:$0xff]  ;;  %v278_v3 = vld [vmem:[%s8116_s1 + $0x18] sm:$0xff]  ;;  %vm305_vm0 = vcmask 130048  }
  0x37   :  { %394 = vmatprep.mubr.f32.mxu0 %v8125_v0  ;;  %507 = vmatprep.mubr.f32.mxu1 %v8125_v0  ;;  %v280_v2 = vld [vmem:[%s8116_s1 + $0x28] sm:$0xff]  ;;  %v282_v5 = vld [vmem:[%s8116_s1 + $0x38] sm:$0xff]  ;;  %v275_v6 = vld [vmem:[%s8116_s1] sm:$0xff]  ;;  %vm6691_vm1 = vmmov 0   ;;  %s6692_s15 = smov [#allocation8]   ;;  %vm4526_vm2 = vcmask 64512  }
  0x38   :  { %v4661_v4 = vpack.c.bf16 %v280_v2, %v276_v1  ;;  %v279_v7 = vld [vmem:[%s8116_s1 + $0x20] sm:$0xff]  ;;  %v4665_v8 = vpack.c.bf16 %v282_v5, %v278_v3  ;;  %v277_v10 = vld [vmem:[%s8116_s1 + $0x10] sm:$0xff]  ;;  %v75_v14 = vld [vmem:[#allocation2 + $0x8] sm:$0xff]  ;;  %s4534_s16 = sshll.u32 %s6692_s15, 4  ;;  %s4535_s16 = int_to_ptr.vmem [resolvable:$true] %s4534_s16 }
  0x39   :  { %v4663_v9 = vpack.c.bf16 %v279_v7, %v275_v6  ;;  %v281_v11 = vld [vmem:[%s8116_s1 + $0x30] sm:$0xff]  ;;  %v267_v12 = vld [vmem:[%s8115_s0] sm:$0xff]  ;;  %v79_v15 = vld [vmem:[#allocation2 + $0x28] sm:$0xff]  ;;  %s6656_s17 = scalar_lea.vmem %s4535_s16, 128  ;;  %p6661_p11 = scmp.lt.s32.totalorder %s4535_s16, %s4535_s16 }
  0x3a   :  { %4662 = vmatprep.subr.bf16.mxu0 %v4661_v4  ;;  %v4667_v13 = vpack.c.bf16 %v281_v11, %v277_v10  ;;  %v77_v16 = vld [vmem:[#allocation2 + $0x18] sm:$0xff]  ;;  %4666 = vmatprep.subr.bf16.mxu1 %v4665_v8  ;;  %v6824_v17 = vpack.c.bf16 %v79_v15, %v75_v14  ;;  %v74_v19 = vld [vmem:[#allocation2] sm:$0xff]  ;;  %v76_v23 = vld [vmem:[#allocation2 + $0x10] sm:$0xff]  ;;  %p6657_p10 = scmp.ne.s32.totalorder %s4535_s16, %s6656_s17  ;;  %p6662_p12 = scmp.lt.s32.totalorder %s6656_s17, %s6656_s17 }
  0x3b   :  { %4664 = vmatpush1.bf16.msra.mxu0 %v4663_v9  ;;  %v81_v18 = vld [vmem:[#allocation2 + $0x38] sm:$0xff]  ;;  %v78_v20 = vld [vmem:[#allocation2 + $0x20] sm:$0xff]  ;;  %v80_v24 = vld [vmem:[#allocation2 + $0x30] sm:$0xff] }
  0x3c   :  { %8326 = vst [vmem:[#allocation12_spill] sm:$0xff] %v6824_v17  ;;  %4668 = vmatpush1.bf16.msra.mxu1 %v4667_v13  ;;  %v6826_v21 = vpack.c.bf16 %v81_v18, %v77_v16  ;;  %v6828_v22 = vpack.c.bf16 %v78_v20, %v74_v19  ;;  %4670 = vmatprep.subr.bf16.mxu0 %v6824_v17  ;;  %v83_v26 = vld [vmem:[#allocation2 + $0x48] sm:$0xff]  ;;  %v85_v28 = vld [vmem:[#allocation2 + $0x58] sm:$0xff]  ;;  %v82_v31 = vld [vmem:[#allocation2 + $0x40] sm:$0xff]  ;;  %p6663_p13 = por %p6662_p12, %p6661_p11 }
  0x3d   :  { %v6831_v25 = vpack.c.bf16 %v80_v24, %v76_v23  ;;  %v87_v27 = vld [vmem:[#allocation2 + $0x68] sm:$0xff]  ;;  %v89_v30 = vld [vmem:[#allocation2 + $0x78] sm:$0xff]  ;;  %v86_v32 = vld [vmem:[#allocation2 + $0x60] sm:$0xff] }
  0x3e   :  { %8327 = vst [vmem:[#allocation13_spill] sm:$0xff] %v6826_v21  ;;  %4544 = vmatmul.mubr.msk.f32.vlgmr.msra.gmra.mrb[0].mxu0 %vm305_vm0, %v267_v12  ;;  %4702 = vmatprep.subr.bf16.mxu1 %v6826_v21  ;;  %v6835_v29 = vpack.c.bf16 %v87_v27, %v83_v26  ;;  %v268_v33 = vld [vmem:[%s8115_s0 + $0x8] sm:$0xff]  ;;  %v6842_v34 = vpack.c.bf16 %v89_v30, %v85_v28  ;;  %v84_v36 = vld [vmem:[#allocation2 + $0x50] sm:$0xff]  ;;  %v93_v41 = vld [vmem:[#allocation2 + $0x98] sm:$0xff]  ;;  %p6664_p0 = pnand %p6663_p13, %p6657_p10 }
  0x3f   :  { %4552 = vmatmul.mubr.msk.f32.vlgmr.msra.gmra.mrb[0].mxu1 %vm305_vm0, %v267_v12  ;;  %4672 = vmatpush1.bf16.msra.mxu0 %v6828_v22  ;;  %v6844_v35 = vpack.c.bf16 %v86_v32, %v82_v31  ;;  %v88_v37 = vld [vmem:[#allocation2 + $0x70] sm:$0xff]  ;;  %v91_v39 = vld [vmem:[#allocation2 + $0x88] sm:$0xff]  ;;  %v97_v43 = vld [vmem:[#allocation2 + $0xb8] sm:$0xff] }
  0x40   :  { %4704 = vmatpush1.bf16.msra.mxu1 %v6831_v25  ;;  %400 = vmatprep.mubr.f32.mxu0 %v8125_v0  ;;  %v6848_v38 = vpack.c.bf16 %v88_v37, %v84_v36  ;;  %v95_v40 = vld [vmem:[#allocation2 + $0xa8] sm:$0xff]  ;;  %v90_v44 = vld [vmem:[#allocation2 + $0x80] sm:$0xff]  ;;  %v269_v46 = vld [vmem:[%s8115_s0 + $0x10] sm:$0xff]  ;;  %v6859_v47 = vpack.c.bf16 %v97_v43, %v93_v41 }
  0x41   :  { %513 = vmatprep.mubr.f32.mxu1 %v8125_v0  ;;  %4674 = vmatprep.subr.bf16.mxu0 %v6835_v29  ;;  %v6852_v42 = vpack.c.bf16 %v95_v40, %v91_v39  ;;  %v94_v45 = vld [vmem:[#allocation2 + $0xa0] sm:$0xff]  ;;  %v92_v48 = vld [vmem:[#allocation2 + $0x90] sm:$0xff]  ;;  %v99_v51 = vld [vmem:[#allocation2 + $0xc8] sm:$0xff] }
  0x42   :  { %4545 = vmatmul.mubr.msk.f32.gmra.mrb[2].mxu0 %vm305_vm0, %v268_v33  ;;  %4706 = vmatprep.subr.bf16.mxu1 %v6842_v34  ;;  %8329 = vst [vmem:[#allocation15_spill] sm:$0xff] %v6859_v47  ;;  %v96_v49 = vld [vmem:[#allocation2 + $0xb0] sm:$0xff]  ;;  %v6863_v50 = vpack.c.bf16 %v94_v45, %v90_v44  ;;  %v103_v52 = vld [vmem:[#allocation2 + $0xe8] sm:$0xff]  ;;  %v101_v53 = vld [vmem:[#allocation2 + $0xd8] sm:$0xff] }
  0x43   :  { %8328 = vst [vmem:[#allocation14_spill] sm:$0xff] %v6852_v42  ;;  %4553 = vmatmul.mubr.msk.f32.gmra.mrb[2].mxu1 %vm305_vm0, %v268_v33  ;;  %4676 = vmatpush1.bf16.msra.mxu0 %v6844_v35  ;;  %v6867_v54 = vpack.c.bf16 %v96_v49, %v92_v48  ;;  %v105_v55 = vld [vmem:[#allocation2 + $0xf8] sm:$0xff]  ;;  %v98_v56 = vld [vmem:[#allocation2 + $0xc0] sm:$0xff]  ;;  %v6871_v58 = vpack.c.bf16 %v103_v52, %v99_v51  ;;  %v100_v59 = vld [vmem:[#allocation2 + $0xd0] sm:$0xff] }
  0x44   :  { %8330 = vst [vmem:[#allocation16_spill] sm:$0xff] %v6863_v50  ;;  %4708 = vmatpush1.bf16.msra.mxu1 %v6848_v38  ;;  %406 = vmatprep.mubr.f32.mxu0 %v8125_v0  ;;  %v102_v57 = vld [vmem:[#allocation2 + $0xe0] sm:$0xff]  ;;  %v104_v60 = vld [vmem:[#allocation2 + $0xf0] sm:$0xff]  ;;  %v6875_v61 = vpack.c.bf16 %v105_v55, %v101_v53  ;;  %v107_v62 = vld [vmem:[#allocation2 + $0x108] sm:$0xff] }
  0x45   :  { %8331 = vst [vmem:[#allocation17_spill] sm:$0xff] %v6867_v54  ;;  %519 = vmatprep.mubr.f32.mxu1 %v8125_v0  ;;  %4678 = vmatprep.subr.bf16.mxu0 %v6852_v42  ;;  %8332 = vst [vmem:[#allocation18_spill] sm:$0xff] %v6871_v58  ;;  %v111_v63 = vld [vmem:[#allocation2 + $0x128] sm:$0xff]  ;;  %v270_v1 = vld [vmem:[%s8115_s0 + $0x18] sm:$0xff]  ;;  %v6882_v2 = vpack.c.bf16 %v102_v57, %v98_v56  ;;  %v6886_v5 = vpack.c.bf16 %v104_v60, %v100_v59 }
  0x46   :  { %4546 = vmatmul.mubr.msk.f32.gmra.mrb[4].mxu0 %vm305_vm0, %v269_v46  ;;  %4710 = vmatprep.subr.bf16.mxu1 %v6859_v47  ;;  %8333 = vst [vmem:[#allocation19_spill] sm:$0xff] %v6875_v61  ;;  %v109_v3 = vld [vmem:[#allocation2 + $0x118] sm:$0xff]  ;;  %v106_v6 = vld [vmem:[#allocation2 + $0x100] sm:$0xff]  ;;  %v6890_v8 = vpack.c.bf16 %v111_v63, %v107_v62  ;;  %v108_v9 = vld [vmem:[#allocation2 + $0x110] sm:$0xff] }
  0x47   :  { %4554 = vmatmul.mubr.msk.f32.gmra.mrb[4].mxu1 %vm305_vm0, %v269_v46  ;;  %4680 = vmatpush1.bf16.msra.mxu0 %v6863_v50  ;;  %8334 = vst [vmem:[#allocation20_spill] sm:$0xff] %v6882_v2  ;;  %v113_v4 = vld [vmem:[#allocation2 + $0x138] sm:$0xff]  ;;  %8335 = vst [vmem:[#allocation21_spill] sm:$0xff] %v6886_v5  ;;  %v110_v7 = vld [vmem:[#allocation2 + $0x120] sm:$0xff] }
  0x48   :  { %4712 = vmatpush1.bf16.msra.mxu1 %v6867_v54  ;;  %412 = vmatprep.mubr.f32.mxu0 %v8125_v0  ;;  %8336 = vst [vmem:[#allocation22_spill] sm:$0xff] %v6890_v8  ;;  %v112_v10 = vld [vmem:[#allocation2 + $0x130] sm:$0xff]  ;;  %v6894_v11 = vpack.c.bf16 %v113_v4, %v109_v3  ;;  %v115_v12 = vld [vmem:[#allocation2 + $0x148] sm:$0xff]  ;;  %v271_v14 = vld [vmem:[%s8115_s0 + $0x20] sm:$0xff]  ;;  %v6901_v15 = vpack.c.bf16 %v110_v7, %v106_v6 }
  0x49   :  { %525 = vmatprep.mubr.f32.mxu1 %v8125_v0  ;;  %4682 = vmatprep.subr.bf16.mxu0 %v6871_v58  ;;  %v119_v13 = vld [vmem:[#allocation2 + $0x168] sm:$0xff]  ;;  %v117_v16 = vld [vmem:[#allocation2 + $0x158] sm:$0xff]  ;;  %v6905_v19 = vpack.c.bf16 %v112_v10, %v108_v9  ;;  %v114_v20 = vld [vmem:[#allocation2 + $0x140] sm:$0xff] }
  0x4a   :  { %4547 = vmatmul.mubr.msk.f32.gmra.mrb[6].mxu0 %vm305_vm0, %v270_v1  ;;  %4714 = vmatprep.subr.bf16.mxu1 %v6875_v61  ;;  %8337 = vst [vmem:[#allocation23_spill] sm:$0xff] %v6894_v11  ;;  %8338 = vst [vmem:[#allocation24_spill] sm:$0xff] %v6901_v15  ;;  %v121_v18 = vld [vmem:[#allocation2 + $0x178] sm:$0xff]  ;;  %v118_v23 = vld [vmem:[#allocation2 + $0x160] sm:$0xff]  ;;  %v6909_v24 = vpack.c.bf16 %v119_v13, %v115_v12 }
  0x4b   :  { %4555 = vmatmul.mubr.msk.f32.gmra.mrb[6].mxu1 %vm305_vm0, %v270_v1  ;;  %4684 = vmatpush1.bf16.msra.mxu0 %v6882_v2  ;;  %8339 = vst [vmem:[#allocation25_spill] sm:$0xff] %v6905_v19  ;;  %v116_v26 = vld [vmem:[#allocation2 + $0x150] sm:$0xff]  ;;  %v6913_v28 = vpack.c.bf16 %v121_v18, %v117_v16  ;;  %v123_v30 = vld [vmem:[#allocation2 + $0x188] sm:$0xff]  ;;  %v6920_v33 = vpack.c.bf16 %v118_v23, %v114_v20  ;;  %v125_v36 = vld [vmem:[#allocation2 + $0x198] sm:$0xff] }
  0x4c   :  { %4716 = vmatpush1.bf16.msra.mxu1 %v6886_v5  ;;  %418 = vmatprep.mubr.f32.mxu0 %v8125_v0  ;;  %8340 = vst [vmem:[#allocation26_spill] sm:$0xff] %v6909_v24  ;;  %v120_v27 = vld [vmem:[#allocation2 + $0x170] sm:$0xff]  ;;  %v127_v31 = vld [vmem:[#allocation2 + $0x1a8] sm:$0xff]  ;;  %v129_v37 = vld [vmem:[#allocation2 + $0x1b8] sm:$0xff] }
  0x4d   :  { %531 = vmatprep.mubr.f32.mxu1 %v8125_v0  ;;  %4686 = vmatprep.subr.bf16.mxu0 %v6890_v8  ;;  %8341 = vst [vmem:[#allocation27_spill] sm:$0xff] %v6913_v28  ;;  %v272_v32 = vld [vmem:[%s8115_s0 + $0x28] sm:$0xff]  ;;  %8342 = vst [vmem:[#allocation28_spill] sm:$0xff] %v6920_v33  ;;  %v6924_v39 = vpack.c.bf16 %v120_v27, %v116_v26  ;;  %v122_v40 = vld [vmem:[#allocation2 + $0x180] sm:$0xff]  ;;  %v6928_v43 = vpack.c.bf16 %v127_v31, %v123_v30 }
  0x4e   :  { %4548 = vmatmul.mubr.msk.f32.gmra.mrb[8].mxu0 %vm305_vm0, %v271_v14  ;;  %4718 = vmatprep.subr.bf16.mxu1 %v6894_v11  ;;  %v126_v41 = vld [vmem:[#allocation2 + $0x1a0] sm:$0xff]  ;;  %v124_v44 = vld [vmem:[#allocation2 + $0x190] sm:$0xff]  ;;  %v6932_v46 = vpack.c.bf16 %v129_v37, %v125_v36  ;;  %v131_v48 = vld [vmem:[#allocation2 + $0x1c8] sm:$0xff] }
  0x4f   :  { %4556 = vmatmul.mubr.msk.f32.gmra.mrb[8].mxu1 %vm305_vm0, %v271_v14  ;;  %4688 = vmatpush1.bf16.msra.mxu0 %v6901_v15  ;;  %8343 = vst [vmem:[#allocation29_spill] sm:$0xff] %v6924_v39  ;;  %8344 = vst [vmem:[#allocation30_spill] sm:$0xff] %v6928_v43  ;;  %v128_v45 = vld [vmem:[#allocation2 + $0x1b0] sm:$0xff]  ;;  %v135_v49 = vld [vmem:[#allocation2 + $0x1e8] sm:$0xff]  ;;  %v6939_v52 = vpack.c.bf16 %v126_v41, %v122_v40 }
  0x50   :  { %4720 = vmatpush1.bf16.msra.mxu1 %v6905_v19  ;;  %424 = vmatprep.mubr.f32.mxu0 %v8125_v0  ;;  %8345 = vst [vmem:[#allocation31_spill] sm:$0xff] %v6932_v46  ;;  %v273_v51 = vld [vmem:[%s8115_s0 + $0x30] sm:$0xff]  ;;  %v133_v53 = vld [vmem:[#allocation2 + $0x1d8] sm:$0xff]  ;;  %v6943_v56 = vpack.c.bf16 %v128_v45, %v124_v44  ;;  %v130_v57 = vld [vmem:[#allocation2 + $0x1c0] sm:$0xff]  ;;  %v6947_v60 = vpack.c.bf16 %v135_v49, %v131_v48 }
  0x51   :  { %537 = vmatprep.mubr.f32.mxu1 %v8125_v0  ;;  %4690 = vmatprep.subr.bf16.mxu0 %v6909_v24  ;;  %8346 = vst [vmem:[#allocation32_spill] sm:$0xff] %v6939_v52  ;;  %v137_v55 = vld [vmem:[#allocation2 + $0x1f8] sm:$0xff]  ;;  %v134_v59 = vld [vmem:[#allocation2 + $0x1e0] sm:$0xff]  ;;  %v132_v62 = vld [vmem:[#allocation2 + $0x1d0] sm:$0xff] }
  0x52   :  { %4549 = vmatmul.mubr.msk.f32.gmra.mrb[10].mxu0 %vm305_vm0, %v272_v32  ;;  %4722 = vmatprep.subr.bf16.mxu1 %v6913_v28  ;;  %8347 = vst [vmem:[#allocation33_spill] sm:$0xff] %v6943_v56  ;;  %8348 = vst [vmem:[#allocation34_spill] sm:$0xff] %v6947_v60  ;;  %v136_v63 = vld [vmem:[#allocation2 + $0x1f0] sm:$0xff]  ;;  %v6951_v1 = vpack.c.bf16 %v137_v55, %v133_v53  ;;  %v203_v3 = vld [vmem:[#allocation7 + $0x8] sm:$0xff]  ;;  %v6958_v7 = vpack.c.bf16 %v134_v59, %v130_v57 }
  0x53   :  { %4557 = vmatmul.mubr.msk.f32.gmra.mrb[10].mxu1 %vm305_vm0, %v272_v32  ;;  %4692 = vmatpush1.bf16.msra.mxu0 %v6920_v33  ;;  %v207_v4 = vld [vmem:[#allocation7 + $0x28] sm:$0xff]  ;;  %v274_v6 = vld [vmem:[%s8115_s0 + $0x38] sm:$0xff]  ;;  %v6962_v12 = vpack.c.bf16 %v136_v63, %v132_v62  ;;  %v202_v13 = vld [vmem:[#allocation7] sm:$0xff] }
  0x54   :  { %4724 = vmatpush1.bf16.msra.mxu1 %v6924_v39  ;;  %430 = vmatprep.mubr.f32.mxu0 %v8125_v0  ;;  %8349 = vst [vmem:[#allocation35_spill] sm:$0xff] %v6951_v1  ;;  %8350 = vst [vmem:[#allocation36_spill] sm:$0xff] %v6958_v7  ;;  %v205_v9 = vld [vmem:[#allocation7 + $0x18] sm:$0xff]  ;;  %v206_v14 = vld [vmem:[#allocation7 + $0x20] sm:$0xff]  ;;  %v6966_v18 = vpack.c.bf16 %v207_v4, %v203_v3 }
  0x55   :  { %543 = vmatprep.mubr.f32.mxu1 %v8125_v0  ;;  %4694 = vmatprep.subr.bf16.mxu0 %v6928_v43  ;;  %v209_v10 = vld [vmem:[#allocation7 + $0x38] sm:$0xff]  ;;  %8351 = vst [vmem:[#allocation37_spill] sm:$0xff] %v6962_v12  ;;  %v204_v16 = vld [vmem:[#allocation7 + $0x10] sm:$0xff]  ;;  %v211_v23 = vld [vmem:[#allocation7 + $0x48] sm:$0xff]  ;;  %v6974_v32 = vpack.c.bf16 %v206_v14, %v202_v13 }
  0x56   :  { %4550 = vmatmul.mubr.msk.f32.gmra.mrb[12].mxu0 %vm305_vm0, %v273_v51  ;;  %4726 = vmatprep.subr.bf16.mxu1 %v6932_v46  ;;  %8352 = vst [vmem:[#allocation38_spill] sm:$0xff] %v6966_v18  ;;  %v208_v20 = vld [vmem:[#allocation7 + $0x30] sm:$0xff]  ;;  %v215_v26 = vld [vmem:[#allocation7 + $0x68] sm:$0xff]  ;;  %v6970_v27 = vpack.c.bf16 %v209_v10, %v205_v9  ;;  %v213_v30 = vld [vmem:[#allocation7 + $0x58] sm:$0xff] }
  0x57   :  { %4558 = vmatmul.mubr.msk.f32.gmra.mrb[12].mxu1 %vm305_vm0, %v273_v51  ;;  %4696 = vmatpush1.bf16.msra.mxu0 %v6939_v52  ;;  %v217_v31 = vld [vmem:[#allocation7 + $0x78] sm:$0xff]  ;;  %8354 = vst [vmem:[#allocation40_spill] sm:$0xff] %v6974_v32  ;;  %v6978_v36 = vpack.c.bf16 %v208_v20, %v204_v16  ;;  %v6980_v37 = vpack.c.bf16 %v215_v26, %v211_v23  ;;  %v210_v40 = vld [vmem:[#allocation7 + $0x40] sm:$0xff]  ;;  %v212_v44 = vld [vmem:[#allocation7 + $0x50] sm:$0xff] }
  0x58   :  { %4728 = vmatpush1.bf16.msra.mxu1 %v6943_v56  ;;  %436 = vmatprep.mubr.f32.mxu0 %v8125_v0  ;;  %8353 = vst [vmem:[#allocation39_spill] sm:$0xff] %v6970_v27  ;;  %v214_v41 = vld [vmem:[#allocation7 + $0x60] sm:$0xff]  ;;  %v6984_v45 = vpack.c.bf16 %v217_v31, %v213_v30  ;;  %v216_v48 = vld [vmem:[#allocation7 + $0x70] sm:$0xff]  ;;  %v219_v49 = vld [vmem:[#allocation7 + $0x88] sm:$0xff] }
  0x59   :  { %549 = vmatprep.mubr.f32.mxu1 %v8125_v0  ;;  %4698 = vmatprep.subr.bf16.mxu0 %v6947_v60  ;;  %8355 = vst [vmem:[#allocation41_spill] sm:$0xff] %v6978_v36  ;;  %8356 = vst [vmem:[#allocation42_spill] sm:$0xff] %v6980_v37  ;;  %v223_v51 = vld [vmem:[#allocation7 + $0xa8] sm:$0xff]  ;;  %v221_v53 = vld [vmem:[#allocation7 + $0x98] sm:$0xff]  ;;  %v6990_v57 = vpack.c.bf16 %v214_v41, %v210_v40  ;;  %v6994_v59 = vpack.c.bf16 %v216_v48, %v212_v44 }
  0x5a   :  { %4551 = vmatmul.mubr.msk.f32.gmra.mrb[14].mxu0 %vm305_vm0, %v274_v6  ;;  %4730 = vmatprep.subr.bf16.mxu1 %v6951_v1  ;;  %8357 = vst [vmem:[#allocation43_spill] sm:$0xff] %v6984_v45  ;;  %v225_v55 = vld [vmem:[#allocation7 + $0xb8] sm:$0xff]  ;;  %v6996_v62 = vpack.c.bf16 %v223_v51, %v219_v49  ;;  %v218_v63 = vld [vmem:[#allocation7 + $0x80] sm:$0xff]  ;;  %v220_v4 = vld [vmem:[#allocation7 + $0x90] sm:$0xff] }
  0x5b   :  { %4559 = vmatmul.mubr.msk.f32.gmra.mrb[14].mxu1 %vm305_vm0, %v274_v6  ;;  %4700 = vmatpush1.bf16.msra.mxu0 %v6958_v7  ;;  %8358 = vst [vmem:[#allocation44_spill] sm:$0xff] %v6990_v57  ;;  %8359 = vst [vmem:[#allocation45_spill] sm:$0xff] %v6994_v59  ;;  %v222_v3 = vld [vmem:[#allocation7 + $0xa0] sm:$0xff]  ;;  %v6999_v6 = vpack.c.bf16 %v225_v55, %v221_v53  ;;  %v224_v9 = vld [vmem:[#allocation7 + $0xb0] sm:$0xff] }
  0x5c   :  { %4732 = vmatpush1.bf16.msra.mxu1 %v6962_v12  ;;  %620 = vmatprep.mubr.f32.mxu0 %v8125_v0  ;;  %8360 = vst [vmem:[#allocation46_spill] sm:$0xff] %v6996_v62  ;;  %v227_v10 = vld [vmem:[#allocation7 + $0xc8] sm:$0xff]  ;;  %v229_v14 = vld [vmem:[#allocation7 + $0xd8] sm:$0xff]  ;;  %v7004_v20 = vpack.c.bf16 %v222_v3, %v218_v63  ;;  %v7008_v23 = vpack.c.bf16 %v224_v9, %v220_v4  ;;  %v226_v30 = vld [vmem:[#allocation7 + $0xc0] sm:$0xff] }
  0x5d   :  { %691 = vmatprep.mubr.f32.mxu1 %v8125_v0  ;;  %4734 = vmatprep.subr.bf16.mxu0 %v6966_v18  ;;  %8361 = vst [vmem:[#allocation47_spill] sm:$0xff] %v6999_v6  ;;  %v231_v13 = vld [vmem:[#allocation7 + $0xe8] sm:$0xff]  ;;  %v233_v16 = vld [vmem:[#allocation7 + $0xf8] sm:$0xff]  ;;  %v230_v31 = vld [vmem:[#allocation7 + $0xe0] sm:$0xff] }
  0x5e   :  { %621 = vmatmul.mubr.f32.vlgmr.msra.gmra.mrb[0].mxu0 %v8125_v0  ;;  %4766 = vmatprep.subr.bf16.mxu1 %v6970_v27  ;;  %8362 = vst [vmem:[#allocation48_spill] sm:$0xff] %v7004_v20  ;;  %8363 = vst [vmem:[#allocation49_spill] sm:$0xff] %v7008_v23  ;;  %v7010_v26 = vpack.c.bf16 %v231_v13, %v227_v10  ;;  %v228_v40 = vld [vmem:[#allocation7 + $0xd0] sm:$0xff]  ;;  %v7013_v41 = vpack.c.bf16 %v233_v16, %v229_v14  ;;  %v235_v48 = vld [vmem:[#allocation7 + $0x108] sm:$0xff] }
  0x5f   :  { %692 = vmatmul.mubr.f32.vlgmr.msra.gmra.mrb[0].mxu1 %v8125_v0  ;;  %4736 = vmatpush1.bf16.msra.mxu0 %v6974_v32  ;;  %v232_v44 = vld [vmem:[#allocation7 + $0xf0] sm:$0xff]  ;;  %v239_v49 = vld [vmem:[#allocation7 + $0x128] sm:$0xff]  ;;  %v237_v51 = vld [vmem:[#allocation7 + $0x118] sm:$0xff]  ;;  %v7016_v55 = vpack.c.bf16 %v230_v31, %v226_v30 }
  0x60   :  { %4768 = vmatpush1.bf16.msra.mxu1 %v6978_v36  ;;  %4738 = vmatprep.subr.bf16.mxu0 %v6980_v37  ;;  %8364 = vst [vmem:[#allocation50_spill] sm:$0xff] %v7010_v26  ;;  %8365 = vst [vmem:[#allocation51_spill] sm:$0xff] %v7013_v41  ;;  %v241_v53 = vld [vmem:[#allocation7 + $0x138] sm:$0xff]  ;;  %v7020_v63 = vpack.c.bf16 %v232_v44, %v228_v40  ;;  %v7022_v3 = vpack.c.bf16 %v239_v49, %v235_v48  ;;  %v234_v4 = vld [vmem:[#allocation7 + $0x100] sm:$0xff] }
  0x61   :  { %4770 = vmatprep.subr.bf16.mxu1 %v6984_v45  ;;  %790 = vmatprep.mubr.f32.mxu0 %v8125_v0  ;;  %8366 = vst [vmem:[#allocation52_spill] sm:$0xff] %v7016_v55  ;;  %v238_v9 = vld [vmem:[#allocation7 + $0x120] sm:$0xff]  ;;  %v7025_v10 = vpack.c.bf16 %v241_v53, %v237_v51  ;;  %v236_v13 = vld [vmem:[#allocation7 + $0x110] sm:$0xff]  ;;  %v243_v31 = vld [vmem:[#allocation7 + $0x148] sm:$0xff] }
  0x62   :  { %861 = vmatprep.mubr.f32.mxu1 %v8125_v0  ;;  %8367 = vst [vmem:[#allocation53_spill] sm:$0xff] %v7020_v63  ;;  %8368 = vst [vmem:[#allocation54_spill] sm:$0xff] %v7022_v3  ;;  %v240_v14 = vld [vmem:[#allocation7 + $0x130] sm:$0xff]  ;;  %v7028_v16 = vpack.c.bf16 %v238_v9, %v234_v4  ;;  %v247_v40 = vld [vmem:[#allocation7 + $0x168] sm:$0xff] }
  0x63   :  { %4740 = vmatpush1.bf16.msra.mxu0 %v6990_v57  ;;  %8369 = vst [vmem:[#allocation55_spill] sm:$0xff] %v7025_v10  ;;  %v7032_v30 = vpack.c.bf16 %v240_v14, %v236_v13  ;;  %v245_v44 = vld [vmem:[#allocation7 + $0x158] sm:$0xff]  ;;  %v7037_v48 = vpack.c.bf16 %v247_v40, %v243_v31  ;;  %v242_v51 = vld [vmem:[#allocation7 + $0x140] sm:$0xff]  ;;  %v244_v13 = vld [vmem:[#allocation7 + $0x150] sm:$0xff] }
  0x64   :  { %4772 = vmatpush1.bf16.msra.mxu1 %v6994_v59  ;;  %4742 = vmatprep.subr.bf16.mxu0 %v6996_v62  ;;  %8370 = vst [vmem:[#allocation56_spill] sm:$0xff] %v7028_v16  ;;  %v249_v49 = vld [vmem:[#allocation7 + $0x178] sm:$0xff]  ;;  %v246_v53 = vld [vmem:[#allocation7 + $0x160] sm:$0xff]  ;;  %v248_v14 = vld [vmem:[#allocation7 + $0x170] sm:$0xff] }
  0x65   :  { %4774 = vmatprep.subr.bf16.mxu1 %v6999_v6  ;;  %8371 = vst [vmem:[#allocation57_spill] sm:$0xff] %v7032_v30  ;;  %8372 = vst [vmem:[#allocation58_spill] sm:$0xff] %v7037_v48  ;;  %v7039_v4 = vpack.c.bf16 %v249_v49, %v245_v44  ;;  %v7041_v9 = vpack.c.bf16 %v246_v53, %v242_v51  ;;  %v7044_v0 = vpack.c.bf16 %v248_v14, %v244_v13  ;;  %v255_v31 = vld [vmem:[#allocation7 + $0x1a8] sm:$0xff]  ;;  %v253_v40 = vld [vmem:[#allocation7 + $0x198] sm:$0xff] }
  0x66   :  { %v257_v44 = vld [vmem:[#allocation7 + $0x1b8] sm:$0xff]  ;;  %v250_v49 = vld [vmem:[#allocation7 + $0x180] sm:$0xff]  ;;  %v252_v13 = vld [vmem:[#allocation7 + $0x190] sm:$0xff] }
  0x67   :  { %4744 = vmatpush1.bf16.msra.mxu0 %v7004_v20  ;;  %8373 = vst [vmem:[#allocation59_spill] sm:$0xff] %v7039_v4  ;;  %8374 = vst [vmem:[#allocation60_spill] sm:$0xff] %v7041_v9  ;;  %v254_v51 = vld [vmem:[#allocation7 + $0x1a0] sm:$0xff]  ;;  %v7051_v53 = vpack.c.bf16 %v257_v44, %v253_v40  ;;  %v256_v14 = vld [vmem:[#allocation7 + $0x1b0] sm:$0xff] }
  0x68   :  { %4776 = vmatpush1.bf16.msra.mxu1 %v7008_v23  ;;  %4746 = vmatprep.subr.bf16.mxu0 %v7010_v26  ;;  %8375 = vst [vmem:[#allocation61_spill] sm:$0xff] %v7044_v0  ;;  %v265_v40 = vld [vmem:[#allocation7 + $0x1f8] sm:$0xff]  ;;  %v258_v44 = vld [vmem:[#allocation7 + $0x1c0] sm:$0xff] }
  0x69   :  { %4778 = vmatprep.subr.bf16.mxu1 %v7013_v41  ;;  %8377 = vst [vmem:[#allocation63_spill] sm:$0xff] %v7051_v53 }
  0x6b   :  { %4748 = vmatpush1.bf16.msra.mxu0 %v7016_v55  ;;  %v193_v55 = vld [vmem:[#allocation5 + $0x1b8] sm:$0xff] }
  0x6c   :  { %4780 = vmatpush1.bf16.msra.mxu1 %v7020_v63  ;;  %4750 = vmatprep.subr.bf16.mxu0 %v7022_v3  ;;  %v191_v63 = vld [vmem:[#allocation5 + $0x1a8] sm:$0xff] }
  0x6d   :  { %4782 = vmatprep.subr.bf16.mxu1 %v7025_v10  ;;  %v7053_v10 = vpack.c.bf16 %v254_v51, %v250_v49  ;;  %v262_v49 = vld [vmem:[#allocation7 + $0x1e0] sm:$0xff] }
  0x6f   :  { %4752 = vmatpush1.bf16.msra.mxu0 %v7028_v16  ;;  %8378 = vst [vmem:[#allocation64_spill] sm:$0xff] %v7053_v10 }
  0x70   :  { %4784 = vmatpush1.bf16.msra.mxu1 %v7032_v30  ;;  %4754 = vmatprep.subr.bf16.mxu0 %v7037_v48  ;;  %v251_v30 = vld [vmem:[#allocation7 + $0x188] sm:$0xff]  ;;  %v7065_v48 = vpack.c.bf16 %v262_v49, %v258_v44  ;;  %v142_v44 = vld [vmem:[#allocation5 + $0x20] sm:$0xff] }
  0x71   :  { %4786 = vmatprep.subr.bf16.mxu1 %v7039_v4  ;;  %v7049_v16 = vpack.c.bf16 %v255_v31, %v251_v30  ;;  %v7056_v4 = vpack.c.bf16 %v256_v14, %v252_v13  ;;  %v263_v30 = vld [vmem:[#allocation7 + $0x1e8] sm:$0xff]  ;;  %v261_v31 = vld [vmem:[#allocation7 + $0x1d8] sm:$0xff]  ;;  %v260_v13 = vld [vmem:[#allocation7 + $0x1d0] sm:$0xff] }
  0x72   :  { %v7063_v51 = vpack.c.bf16 %v265_v40, %v261_v31  ;;  %8382 = vst [vmem:[#allocation68_spill] sm:$0xff] %v7065_v48  ;;  %v264_v14 = vld [vmem:[#allocation7 + $0x1f0] sm:$0xff]  ;;  %v145_v31 = vld [vmem:[#allocation5 + $0x38] sm:$0xff]  ;;  %v138_v40 = vld [vmem:[#allocation5] sm:$0xff] }
  0x73   :  { %4756 = vmatpush1.bf16.msra.mxu0 %v7041_v9  ;;  %8376 = vst [vmem:[#allocation62_spill] sm:$0xff] %v7049_v16  ;;  %8379 = vst [vmem:[#allocation65_spill] sm:$0xff] %v7056_v4 }
  0x74   :  { %4788 = vmatpush1.bf16.msra.mxu1 %v7044_v0  ;;  %4758 = vmatprep.subr.bf16.mxu0 %v7049_v16  ;;  %v259_v0 = vld [vmem:[#allocation7 + $0x1c8] sm:$0xff]  ;;  %8381 = vst [vmem:[#allocation67_spill] sm:$0xff] %v7063_v51  ;;  %v7077_v16 = vpack.c.bf16 %v142_v44, %v138_v40  ;;  %v146_v40 = vld [vmem:[#allocation5 + $0x40] sm:$0xff] }
  0x75   :  { %4790 = vmatprep.subr.bf16.mxu1 %v7051_v53  ;;  %v7061_v9 = vpack.c.bf16 %v263_v30, %v259_v0  ;;  %v7068_v53 = vpack.c.bf16 %v264_v14, %v260_v13  ;;  %v143_v0 = vld [vmem:[#allocation5 + $0x28] sm:$0xff]  ;;  %v141_v30 = vld [vmem:[#allocation5 + $0x18] sm:$0xff]  ;;  %v140_v13 = vld [vmem:[#allocation5 + $0x10] sm:$0xff] }
  0x76   :  { %v7075_v49 = vpack.c.bf16 %v145_v31, %v141_v30  ;;  %8386 = vst [vmem:[#allocation72_spill] sm:$0xff] %v7077_v16  ;;  %v144_v14 = vld [vmem:[#allocation5 + $0x30] sm:$0xff]  ;;  %v153_v31 = vld [vmem:[#allocation5 + $0x78] sm:$0xff]  ;;  %v150_v44 = vld [vmem:[#allocation5 + $0x60] sm:$0xff] }
  0x77   :  { %4760 = vmatpush1.bf16.msra.mxu0 %v7053_v10  ;;  %8380 = vst [vmem:[#allocation66_spill] sm:$0xff] %v7061_v9  ;;  %8383 = vst [vmem:[#allocation69_spill] sm:$0xff] %v7068_v53 }
  0x78   :  { %4792 = vmatpush1.bf16.msra.mxu1 %v7056_v4  ;;  %4762 = vmatprep.subr.bf16.mxu0 %v7061_v9  ;;  %v139_v4 = vld [vmem:[#allocation5 + $0x8] sm:$0xff]  ;;  %8385 = vst [vmem:[#allocation71_spill] sm:$0xff] %v7075_v49 }
  0x79   :  { %4794 = vmatprep.subr.bf16.mxu1 %v7063_v51  ;;  %v7073_v10 = vpack.c.bf16 %v143_v0, %v139_v4  ;;  %v8387_v51 = vmov 0.0   ;;  %v147_v4 = vld [vmem:[#allocation5 + $0x48] sm:$0xff] }
  0x7a   :  { %v151_v0 = vld [vmem:[#allocation5 + $0x68] sm:$0xff] }
  0x7b   :  { %4764 = vmatpush1.bf16.msra.mxu0 %v7065_v48  ;;  %8384 = vst [vmem:[#allocation70_spill] sm:$0xff] %v7073_v10  ;;  %v7081_v48 = vpack.c.bf16 %v144_v14, %v140_v13  ;;  %v7087_v30 = vpack.c.bf16 %v151_v0, %v147_v4  ;;  %v7091_v13 = vpack.c.bf16 %v150_v44, %v146_v40  ;;  %v148_v14 = vld [vmem:[#allocation5 + $0x50] sm:$0xff]  ;;  %v155_v4 = vld [vmem:[#allocation5 + $0x88] sm:$0xff]  ;;  %v154_v40 = vld [vmem:[#allocation5 + $0x80] sm:$0xff] }
  0x7c   :  { %4796 = vmatpush1.bf16.msra.mxu1 %v7068_v53  ;;  %4798 = vmatprep.subr.bf16.mxu0 %v7073_v10  ;;  %v149_v53 = vld [vmem:[#allocation5 + $0x58] sm:$0xff]  ;;  %v159_v0 = vld [vmem:[#allocation5 + $0xa8] sm:$0xff]  ;;  %v158_v44 = vld [vmem:[#allocation5 + $0xa0] sm:$0xff] }
  0x7d   :  { %8388 = vst [vmem:[#allocation73_spill] sm:$0xff] %v7081_v48  ;;  %4830 = vmatprep.subr.bf16.mxu1 %v7075_v49  ;;  %8389 = vst [vmem:[#allocation74_spill] sm:$0xff] %v7087_v30  ;;  %v7089_v10 = vpack.c.bf16 %v153_v31, %v149_v53  ;;  %v152_v49 = vld [vmem:[#allocation5 + $0x70] sm:$0xff]  ;;  %v7101_v53 = vpack.c.bf16 %v159_v0, %v155_v4  ;;  %v161_v31 = vld [vmem:[#allocation5 + $0xb8] sm:$0xff]  ;;  %v7105_v3 = vpack.c.bf16 %v158_v44, %v154_v40 }
  0x7e   :  { %791 = vmatmul.mubr.f32.vlgmr.msra.gmra.mrb[16].mxu0 %v8387_v51  ;;  %8391 = vst [vmem:[#allocation76_spill] sm:$0xff] %v7091_v13  ;;  %v162_v0 = vld [vmem:[#allocation5 + $0xc0] sm:$0xff] }
  0x7f   :  { %862 = vmatmul.mubr.f32.vlgmr.msra.gmra.mrb[16].mxu1 %v8387_v51  ;;  %4800 = vmatpush1.bf16.msra.mxu0 %v7077_v16  ;;  %8390 = vst [vmem:[#allocation75_spill] sm:$0xff] %v7089_v10  ;;  %v7096_v16 = vpack.c.bf16 %v152_v49, %v148_v14  ;;  %8393 = vst [vmem:[#allocation78_spill] sm:$0xff] %v7101_v53  ;;  %v156_v49 = vld [vmem:[#allocation5 + $0x90] sm:$0xff] }
  0x80   :  { %4832 = vmatpush1.bf16.msra.mxu1 %v7081_v48  ;;  %932 = vmatprep.mubr.f32.mxu0 %v8387_v51  ;;  %v157_v48 = vld [vmem:[#allocation5 + $0x98] sm:$0xff]  ;;  %8395 = vst [vmem:[#allocation80_spill] sm:$0xff] %v7105_v3  ;;  %v160_v14 = vld [vmem:[#allocation5 + $0xb0] sm:$0xff] }
  0x81   :  { %1003 = vmatprep.mubr.f32.mxu1 %v8387_v51  ;;  %4802 = vmatprep.subr.bf16.mxu0 %v7087_v30  ;;  %8392 = vst [vmem:[#allocation77_spill] sm:$0xff] %v7096_v16  ;;  %v7103_v9 = vpack.c.bf16 %v161_v31, %v157_v48  ;;  %v167_v30 = vld [vmem:[#allocation5 + $0xe8] sm:$0xff]  ;;  %v169_v48 = vld [vmem:[#allocation5 + $0xf8] sm:$0xff]  ;;  %v166_v31 = vld [vmem:[#allocation5 + $0xe0] sm:$0xff] }
  0x82   :  { %4834 = vmatprep.subr.bf16.mxu1 %v7089_v10  ;;  %v7108_v10 = vpack.c.bf16 %v160_v14, %v156_v49  ;;  %v7117_v44 = vpack.c.bf16 %v166_v31, %v162_v0  ;;  %v164_v49 = vld [vmem:[#allocation5 + $0xd0] sm:$0xff] }
  0x83   :  { %4804 = vmatpush1.bf16.msra.mxu0 %v7091_v13  ;;  %8394 = vst [vmem:[#allocation79_spill] sm:$0xff] %v7103_v9  ;;  %v163_v13 = vld [vmem:[#allocation5 + $0xc8] sm:$0xff]  ;;  %v168_v14 = vld [vmem:[#allocation5 + $0xf0] sm:$0xff] }
  0x84   :  { %4836 = vmatpush1.bf16.msra.mxu1 %v7096_v16  ;;  %4806 = vmatprep.subr.bf16.mxu0 %v7101_v53  ;;  %8396 = vst [vmem:[#allocation81_spill] sm:$0xff] %v7108_v10  ;;  %v165_v16 = vld [vmem:[#allocation5 + $0xd8] sm:$0xff]  ;;  %v7113_v4 = vpack.c.bf16 %v167_v30, %v163_v13  ;;  %8399 = vst [vmem:[#allocation84_spill] sm:$0xff] %v7117_v44  ;;  %v175_v53 = vld [vmem:[#allocation5 + $0x128] sm:$0xff] }
  0x85   :  { %4838 = vmatprep.subr.bf16.mxu1 %v7103_v9  ;;  %v7115_v40 = vpack.c.bf16 %v169_v48, %v165_v16  ;;  %v7120_v9 = vpack.c.bf16 %v168_v14, %v164_v49  ;;  %v177_v16 = vld [vmem:[#allocation5 + $0x138] sm:$0xff]  ;;  %v170_v13 = vld [vmem:[#allocation5 + $0x100] sm:$0xff]  ;;  %v172_v49 = vld [vmem:[#allocation5 + $0x110] sm:$0xff] }
  0x86   :  { %8397 = vst [vmem:[#allocation82_spill] sm:$0xff] %v7113_v4  ;;  %v174_v48 = vld [vmem:[#allocation5 + $0x120] sm:$0xff]  ;;  %v176_v14 = vld [vmem:[#allocation5 + $0x130] sm:$0xff] }
  0x87   :  { %4808 = vmatpush1.bf16.msra.mxu0 %v7105_v3  ;;  %8398 = vst [vmem:[#allocation83_spill] sm:$0xff] %v7115_v40  ;;  %8400 = vst [vmem:[#allocation85_spill] sm:$0xff] %v7120_v9  ;;  %v171_v3 = vld [vmem:[#allocation5 + $0x108] sm:$0xff]  ;;  %v7129_v31 = vpack.c.bf16 %v174_v48, %v170_v13 }
  0x88   :  { %4840 = vmatpush1.bf16.msra.mxu1 %v7108_v10  ;;  %4810 = vmatprep.subr.bf16.mxu0 %v7113_v4  ;;  %v173_v10 = vld [vmem:[#allocation5 + $0x118] sm:$0xff]  ;;  %v7125_v30 = vpack.c.bf16 %v175_v53, %v171_v3  ;;  %v183_v4 = vld [vmem:[#allocation5 + $0x168] sm:$0xff]  ;;  %v178_v53 = vld [vmem:[#allocation5 + $0x140] sm:$0xff] }
  0x89   :  { %4842 = vmatprep.subr.bf16.mxu1 %v7115_v40  ;;  %v7127_v0 = vpack.c.bf16 %v177_v16, %v173_v10  ;;  %8403 = vst [vmem:[#allocation88_spill] sm:$0xff] %v7129_v31  ;;  %v7132_v40 = vpack.c.bf16 %v176_v14, %v172_v49  ;;  %v185_v10 = vld [vmem:[#allocation5 + $0x178] sm:$0xff]  ;;  %v182_v16 = vld [vmem:[#allocation5 + $0x160] sm:$0xff]  ;;  %v180_v49 = vld [vmem:[#allocation5 + $0x150] sm:$0xff] }
  0x8a   :  { %8401 = vst [vmem:[#allocation86_spill] sm:$0xff] %v7125_v30  ;;  %v7141_v48 = vpack.c.bf16 %v182_v16, %v178_v53  ;;  %v184_v14 = vld [vmem:[#allocation5 + $0x170] sm:$0xff] }
  0x8b   :  { %4812 = vmatpush1.bf16.msra.mxu0 %v7117_v44  ;;  %8402 = vst [vmem:[#allocation87_spill] sm:$0xff] %v7127_v0  ;;  %8404 = vst [vmem:[#allocation89_spill] sm:$0xff] %v7132_v40  ;;  %v179_v44 = vld [vmem:[#allocation5 + $0x148] sm:$0xff]  ;;  %v188_v53 = vld [vmem:[#allocation5 + $0x190] sm:$0xff] }
  0x8c   :  { %4844 = vmatpush1.bf16.msra.mxu1 %v7120_v9  ;;  %4814 = vmatprep.subr.bf16.mxu0 %v7125_v30  ;;  %v181_v9 = vld [vmem:[#allocation5 + $0x158] sm:$0xff]  ;;  %v7137_v3 = vpack.c.bf16 %v183_v4, %v179_v44  ;;  %8407 = vst [vmem:[#allocation92_spill] sm:$0xff] %v7141_v48  ;;  %v187_v30 = vld [vmem:[#allocation5 + $0x188] sm:$0xff] }
  0x8d   :  { %4846 = vmatprep.subr.bf16.mxu1 %v7127_v0  ;;  %v7139_v13 = vpack.c.bf16 %v185_v10, %v181_v9  ;;  %v7144_v0 = vpack.c.bf16 %v184_v14, %v180_v49  ;;  %v7147_v4 = vpack.c.bf16 %v191_v63, %v187_v30  ;;  %v186_v9 = vld [vmem:[#allocation5 + $0x180] sm:$0xff]  ;;  %v192_v49 = vld [vmem:[#allocation5 + $0x1b0] sm:$0xff]  ;;  %v195_v14 = vld [vmem:[#allocation5 + $0x1c8] sm:$0xff] }
  0x8e   :  { %8405 = vst [vmem:[#allocation90_spill] sm:$0xff] %v7137_v3  ;;  %v190_v10 = vld [vmem:[#allocation5 + $0x1a0] sm:$0xff]  ;;  %v7157_v63 = vpack.c.bf16 %v192_v49, %v188_v53  ;;  %v197_v30 = vld [vmem:[#allocation5 + $0x1d8] sm:$0xff] }
  0x8f   :  { %4816 = vmatpush1.bf16.msra.mxu0 %v7129_v31  ;;  %8406 = vst [vmem:[#allocation91_spill] sm:$0xff] %v7139_v13  ;;  %8408 = vst [vmem:[#allocation93_spill] sm:$0xff] %v7144_v0  ;;  %v189_v31 = vld [vmem:[#allocation5 + $0x198] sm:$0xff]  ;;  %v7153_v16 = vpack.c.bf16 %v190_v10, %v186_v9  ;;  %v200_v9 = vld [vmem:[#allocation5 + $0x1f0] sm:$0xff] }
  0x90   :  { %4848 = vmatpush1.bf16.msra.mxu1 %v7132_v40  ;;  %4818 = vmatprep.subr.bf16.mxu0 %v7137_v3  ;;  %8409 = vst [vmem:[#allocation94_spill] sm:$0xff] %v7147_v4  ;;  %v7149_v44 = vpack.c.bf16 %v193_v55, %v189_v31  ;;  %v199_v3 = vld [vmem:[#allocation5 + $0x1e8] sm:$0xff]  ;;  %8412 = vst [vmem:[#allocation97_spill] sm:$0xff] %v7157_v63  ;;  %v201_v31 = vld [vmem:[#allocation5 + $0x1f8] sm:$0xff] }
  0x91   :  { %4850 = vmatprep.subr.bf16.mxu1 %v7139_v13  ;;  %8411 = vst [vmem:[#allocation96_spill] sm:$0xff] %v7153_v16  ;;  %v7159_v55 = vpack.c.bf16 %v199_v3, %v195_v14  ;;  %v194_v13 = vld [vmem:[#allocation5 + $0x1c0] sm:$0xff]  ;;  %v7161_v40 = vpack.c.bf16 %v201_v31, %v197_v30  ;;  %v285_v3 = vlaneseq }
  0x92   :  { %8410 = vst [vmem:[#allocation95_spill] sm:$0xff] %v7149_v44 }
  0x93   :  { %4820 = vmatpush1.bf16.msra.mxu0 %v7141_v48  ;;  %8413 = vst [vmem:[#allocation98_spill] sm:$0xff] %v7159_v55  ;;  %8414 = vst [vmem:[#allocation99_spill] sm:$0xff] %v7161_v40  ;;  %v198_v48 = vld [vmem:[#allocation5 + $0x1e0] sm:$0xff]  ;;  %v7175_v53 = vshrl.u32 %v285_v3, 7 }
  0x94   :  { %4852 = vmatpush1.bf16.msra.mxu1 %v7144_v0  ;;  %4822 = vmatprep.subr.bf16.mxu0 %v7147_v4  ;;  %v196_v0 = vld [vmem:[#allocation5 + $0x1d0] sm:$0xff]  ;;  %v7165_v10 = vpack.c.bf16 %v198_v48, %v194_v13 }
  0x95   :  { %4854 = vmatprep.subr.bf16.mxu1 %v7149_v44  ;;  %v7167_v4 = vpack.c.bf16 %v200_v9, %v196_v0  ;;  %v8223_v13 = vsub.s32 0, %v7175_v53  ;;  %v283_v0 = vld [vmem:[%s8117_s2] sm:$0xf]  ;;  %v8224_v48 = vsub.s32 1, %v7175_v53  ;;  %v8231_v31 = vsub.s32 3, %v7175_v53 }
  0x96   :  { %8415 = vst [vmem:[#allocation100_spill] sm:$0xff] %v7165_v10 }
  0x97   :  { %4824 = vmatpush1.bf16.msra.mxu0 %v7153_v16  ;;  %8416 = vst [vmem:[#allocation101_spill] sm:$0xff] %v7167_v4  ;;  %v7184_v49 = vrot.slane %v283_v0, %v8223_v13  ;;  %v7188_v14 = vrot.slane %v283_v0, %v8224_v48  ;;  %v7195_v13 = vrot.slane %v283_v0, %v8231_v31  ;;  %v8240_v48 = vsub.s32 2, %v7175_v53 }
  0x98   :  { %4856 = vmatpush1.bf16.msra.mxu1 %v7157_v63  ;;  %4826 = vmatprep.subr.bf16.mxu0 %v7159_v55 }
  0x99   :  { %4858 = vmatprep.subr.bf16.mxu1 %v7161_v40  ;;  %8417 = vst [vmem:[#allocation102_spill] sm:$0xff] %v7184_v49  ;;  %8418 = vst [vmem:[#allocation103_spill] sm:$0xff] %v7188_v14 }
  0x9a   :  { %8419 = vst [vmem:[#allocation104_spill] sm:$0xff] %v7195_v13 }
  0x9b   :  { %4828 = vmatpush1.bf16.msra.mxu0 %v7165_v10 }
  0x9c   :  { %4860 = vmatpush1.bf16.msra.mxu1 %v7167_v4  ;;  %4862 = vmatprep.subr.bf16.mxu0 %v6824_v17 }
  0x9d   :  { %4894 = vmatprep.subr.bf16.mxu1 %v6826_v21 }
 0x131   :  { %v622_v30 = vpop.f32.mrb[0].mxu0 }
 0x132   :  { %v6229_v9 = vadd.f32 %v622_v30, %v7184_v49  ;;  %v693_v3 = vpop.f32.mrb[0].mxu1  ;;  %v624_v21 = vpop.f32.mrb[1].mxu0  ;;  %v7201_v30 = vrot.slane %v283_v0, %v8240_v48  ;;  %v8435_v48 = vld [vmem:[#allocation67_spill] sm:$0xff] }
 0x133   :  { %v6230_v17 = vadd.f32 %v624_v21, %v7188_v14  ;;  %v695_v4 = vpop.f32.mrb[1].mxu1 }
 0x134   :  { %v4560_v10 = vmul.f32 -1.442695, %v6229_v9  ;;  %v6246_v55 = vadd.f32 %v695_v4, %v7195_v13  ;;  %v6245_v21 = vadd.f32 %v693_v3, %v7201_v30 }
 0x135   :  { %v4561_v40 = vmul.f32 -1.442695, %v6230_v17 }
 0x136   :  { %6334 = vpow2.f32 %v4560_v10  ;;  %v4562_v63 = vmul.f32 -1.442695, %v6246_v55 }
 0x137   :  { %6336 = vpow2.f32 %v4561_v40 }
 0x138   :  { %6338 = vpow2.f32 %v4562_v63  ;;  %v8421_v63 = vld [vmem:[#allocation53_spill] sm:$0xff] }
 0x139   :  { %6340 = vtanh.f32 %v6245_v21  ;;  %v8426_v21 = vld [vmem:[#allocation58_spill] sm:$0xff] }
 0x140   :  { %v6335_v16 = vpop.eup %6334 }
 0x141   :  { %v6337_v9 = vpop.eup %6336  ;;  %v705_v17 = vadd.f32 1.0, %v6335_v16 }
 0x142   :  { %v711_v31 = vadd.f32 1.0, %v6337_v9  ;;  %v6339_v10 = vpop.eup %6338  ;;  %v8427_v9 = vld [vmem:[#allocation59_spill] sm:$0xff] }
 0x143   :  { %6342 = vrcp.f32 %v705_v17  ;;  %v6341_v44 = vpop.eup %6340  ;;  %v718_v13 = vadd.f32 1.0, %v6339_v10  ;;  %v8428_v17 = vld [vmem:[#allocation60_spill] sm:$0xff]  ;;  %v8429_v10 = vld [vmem:[#allocation61_spill] sm:$0xff] }
 0x144   :  { %6344 = vrcp.f32 %v711_v31  ;;  %v8425_v31 = vld [vmem:[#allocation57_spill] sm:$0xff] }
 0x145   :  { %6346 = vrcp.f32 %v718_v13  ;;  %v8422_v13 = vld [vmem:[#allocation54_spill] sm:$0xff] }
 0x14d   :  { %v6343_v40 = vpop.eup %6342 }
 0x14e   :  { %v6345_v14 = vpop.eup %6344  ;;  %v722_v4 = vmul.f32 %v6343_v40, %v6341_v44  ;;  %v8420_v44 = vld [vmem:[#allocation52_spill] sm:$0xff]  ;;  %v8430_v40 = vld [vmem:[#allocation62_spill] sm:$0xff] }
 0x14f   :  { %v721_v49 = vmul.f32 0.0, %v6345_v14  ;;  %v6347_v55 = vpop.eup %6346  ;;  %v8424_v14 = vld [vmem:[#allocation56_spill] sm:$0xff] }
 0x151   :  { %v7204_v0 = vadd.f32 %v722_v4, %v721_v49  ;;  %v8423_v49 = vld [vmem:[#allocation55_spill] sm:$0xff] }
 0x152   :  { %v8431_v4 = vld [vmem:[#allocation63_spill] sm:$0xff] }
 0x153   :  { %6348 = vtanh.f32 %v7204_v0 }
 0x15d   :  { %v6349_v3 = vpop.eup %6348 }
 0x15e   :  { %v725_v16 = vmul.f32 %v6349_v3, %v6347_v55  ;;  %v8432_v55 = vld [vmem:[#allocation64_spill] sm:$0xff]  ;;  %v8433_v3 = vld [vmem:[#allocation65_spill] sm:$0xff] }
 0x160   :  { %933 = vmatmul.mubr.f32.vlgmr.msra.gmra.mrb[16].mxu0 %v725_v16  ;;  %1004 = vmatmul.mubr.f32.vlgmr.msra.gmra.mrb[16].mxu1 %v725_v16 }
 0x161   :  { %4864 = vmatpush1.bf16.msra.mxu0 %v6828_v22  ;;  %4896 = vmatpush1.bf16.msra.mxu1 %v6831_v25 }
 0x162   :  { %4866 = vmatprep.subr.bf16.mxu0 %v6835_v29  ;;  %4898 = vmatprep.subr.bf16.mxu1 %v6842_v34 }
 0x163   :  { %1123 = vmatprep.mubr.f32.mxu0 %v8387_v51  ;;  %1194 = vmatprep.mubr.f32.mxu1 %v8387_v51 }
 0x165   :  { %4868 = vmatpush1.bf16.msra.mxu0 %v6844_v35  ;;  %4900 = vmatpush1.bf16.msra.mxu1 %v6848_v38 }
 0x166   :  { %4870 = vmatprep.subr.bf16.mxu0 %v6852_v42  ;;  %4902 = vmatprep.subr.bf16.mxu1 %v6859_v47 }
 0x169   :  { %4872 = vmatpush1.bf16.msra.mxu0 %v6863_v50  ;;  %4904 = vmatpush1.bf16.msra.mxu1 %v6867_v54 }
 0x16a   :  { %4874 = vmatprep.subr.bf16.mxu0 %v6871_v58  ;;  %4906 = vmatprep.subr.bf16.mxu1 %v6875_v61 }
 0x16d   :  { %4876 = vmatpush1.bf16.msra.mxu0 %v6882_v2  ;;  %4908 = vmatpush1.bf16.msra.mxu1 %v6886_v5 }
 0x16e   :  { %4878 = vmatprep.subr.bf16.mxu0 %v6890_v8  ;;  %4910 = vmatprep.subr.bf16.mxu1 %v6894_v11 }
 0x171   :  { %4880 = vmatpush1.bf16.msra.mxu0 %v6901_v15  ;;  %4912 = vmatpush1.bf16.msra.mxu1 %v6905_v19 }
 0x172   :  { %4882 = vmatprep.subr.bf16.mxu0 %v6909_v24  ;;  %4914 = vmatprep.subr.bf16.mxu1 %v6913_v28 }
 0x175   :  { %4884 = vmatpush1.bf16.msra.mxu0 %v6920_v33  ;;  %4916 = vmatpush1.bf16.msra.mxu1 %v6924_v39 }
 0x176   :  { %4886 = vmatprep.subr.bf16.mxu0 %v6928_v43  ;;  %4918 = vmatprep.subr.bf16.mxu1 %v6932_v46 }
 0x179   :  { %4888 = vmatpush1.bf16.msra.mxu0 %v6939_v52  ;;  %4920 = vmatpush1.bf16.msra.mxu1 %v6943_v56 }
 0x17a   :  { %4890 = vmatprep.subr.bf16.mxu0 %v6947_v60  ;;  %4922 = vmatprep.subr.bf16.mxu1 %v6951_v1 }
 0x17d   :  { %4892 = vmatpush1.bf16.msra.mxu0 %v6958_v7  ;;  %4924 = vmatpush1.bf16.msra.mxu1 %v6962_v12 }
 0x17e   :  { %4926 = vmatprep.subr.bf16.mxu0 %v6966_v18  ;;  %4958 = vmatprep.subr.bf16.mxu1 %v6970_v27 }
 0x180   :  { %1124 = vmatmul.mubr.f32.vlgmr.msra.gmra.mrb[2].mxu0 %v725_v16  ;;  %1195 = vmatmul.mubr.f32.vlgmr.msra.gmra.mrb[2].mxu1 %v725_v16  ;;  %v8434_v16 = vld [vmem:[#allocation66_spill] sm:$0xff] }
 0x181   :  { %4928 = vmatpush1.bf16.msra.mxu0 %v6974_v32  ;;  %4960 = vmatpush1.bf16.msra.mxu1 %v6978_v36 }
 0x182   :  { %4930 = vmatprep.subr.bf16.mxu0 %v6980_v37  ;;  %4962 = vmatprep.subr.bf16.mxu1 %v6984_v45 }
 0x183   :  { %1293 = vmatprep.mubr.f32.mxu0 %v8387_v51  ;;  %1364 = vmatprep.mubr.f32.mxu1 %v8387_v51 }
 0x185   :  { %4932 = vmatpush1.bf16.msra.mxu0 %v6990_v57  ;;  %4964 = vmatpush1.bf16.msra.mxu1 %v6994_v59 }
 0x186   :  { %4934 = vmatprep.subr.bf16.mxu0 %v6996_v62  ;;  %4966 = vmatprep.subr.bf16.mxu1 %v6999_v6 }
 0x189   :  { %4936 = vmatpush1.bf16.msra.mxu0 %v7004_v20  ;;  %4968 = vmatpush1.bf16.msra.mxu1 %v7008_v23 }
 0x18a   :  { %4938 = vmatprep.subr.bf16.mxu0 %v7010_v26  ;;  %4970 = vmatprep.subr.bf16.mxu1 %v7013_v41 }
 0x18d   :  { %4940 = vmatpush1.bf16.msra.mxu0 %v8420_v44  ;;  %4972 = vmatpush1.bf16.msra.mxu1 %v8421_v63 }
 0x18e   :  { %4942 = vmatprep.subr.bf16.mxu0 %v8422_v13  ;;  %4974 = vmatprep.subr.bf16.mxu1 %v8423_v49  ;;  %v8444_v13 = vsub.s32 3, %v7175_v53 }
 0x191   :  { %4944 = vmatpush1.bf16.msra.mxu0 %v8424_v14  ;;  %4976 = vmatpush1.bf16.msra.mxu1 %v8425_v31  ;;  %v8436_v31 = vld [vmem:[#allocation68_spill] sm:$0xff] }
 0x192   :  { %4946 = vmatprep.subr.bf16.mxu0 %v8426_v21  ;;  %4978 = vmatprep.subr.bf16.mxu1 %v8427_v9  ;;  %v8437_v21 = vld [vmem:[#allocation69_spill] sm:$0xff]  ;;  %v8438_v9 = vld [vmem:[#allocation70_spill] sm:$0xff] }
 0x195   :  { %4948 = vmatpush1.bf16.msra.mxu0 %v8428_v17  ;;  %4980 = vmatpush1.bf16.msra.mxu1 %v8429_v10  ;;  %v8439_v17 = vld [vmem:[#allocation71_spill] sm:$0xff] }
 0x196   :  { %4950 = vmatprep.subr.bf16.mxu0 %v8430_v40  ;;  %4982 = vmatprep.subr.bf16.mxu1 %v8431_v4  ;;  %v266_v4 = vld [vmem:[%s8121_s6] sm:$0xf] }
 0x197   :  { %v7290_v63 = vrot.slane %v266_v4, %v8444_v13 }
 0x199   :  { %4952 = vmatpush1.bf16.msra.mxu0 %v8432_v55  ;;  %4984 = vmatpush1.bf16.msra.mxu1 %v8433_v3  ;;  %v8440_v55 = vsub.s32 0, %v7175_v53  ;;  %8445 = vst [vmem:[#allocation107_spill] sm:$0xff] %v7290_v63 }
 0x19a   :  { %4954 = vmatprep.subr.bf16.mxu0 %v8434_v16  ;;  %4986 = vmatprep.subr.bf16.mxu1 %v8435_v48  ;;  %v8442_v16 = vsub.s32 1, %v7175_v53 }
 0x19b   :  { %v7280_v40 = vrot.slane %v266_v4, %v8440_v55 }
 0x19c   :  { %v7284_v3 = vrot.slane %v266_v4, %v8442_v16  ;;  %v8446_v16 = vsub.s32 2, %v7175_v53 }
 0x19d   :  { %4956 = vmatpush1.bf16.msra.mxu0 %v8436_v31  ;;  %4988 = vmatpush1.bf16.msra.mxu1 %v8437_v21  ;;  %8441 = vst [vmem:[#allocation105_spill] sm:$0xff] %v7280_v40 }
 0x19e   :  { %4990 = vmatprep.subr.bf16.mxu0 %v8438_v9  ;;  %5022 = vmatprep.subr.bf16.mxu1 %v8439_v17  ;;  %8443 = vst [vmem:[#allocation106_spill] sm:$0xff] %v7284_v3  ;;  %v7295_v44 = vrot.slane %v266_v4, %v8446_v16 }
 0x1a0   :  { %8447 = vst [vmem:[#allocation108_spill] sm:$0xff] %v7295_v44 }
 0x233   :  { %v934_v48 = vpop.f32.mrb[16].mxu0  ;;  %v1005_v31 = vpop.f32.mrb[16].mxu1 }
 0x234   :  { %v1031_v21 = vadd.f32 %v7280_v40, %v934_v48  ;;  %v936_v10 = vpop.f32.mrb[17].mxu0  ;;  %v1007_v9 = vpop.f32.mrb[17].mxu1  ;;  %v1033_v48 = vadd.f32 %v7295_v44, %v1005_v31  ;;  %v8449_v31 = vld [vmem:[#allocation102_spill] sm:$0xff] }
 0x235   :  { %v1032_v17 = vadd.f32 %v7284_v3, %v936_v10  ;;  %v1034_v55 = vadd.f32 %v7290_v63, %v1007_v9 }
 0x236   :  { %v4563_v14 = vmul.f32 -1.442695, %v1031_v21 }
 0x237   :  { %v4564_v49 = vmul.f32 -1.442695, %v1032_v17  ;;  %v4565_v41 = vmul.f32 -1.442695, %v1034_v55 }
 0x238   :  { %6350 = vpow2.f32 %v4563_v14 }
 0x239   :  { %6352 = vpow2.f32 %v4564_v49 }
 0x23a   :  { %6354 = vpow2.f32 %v4565_v41 }
 0x23b   :  { %6356 = vtanh.f32 %v1033_v48 }
 0x242   :  { %v6351_v40 = vpop.eup %6350 }
 0x243   :  { %v6353_v26 = vpop.eup %6352  ;;  %v1038_v10 = vadd.f32 1.0, %v6351_v40 }
 0x244   :  { %v1044_v21 = vadd.f32 1.0, %v6353_v26  ;;  %v6355_v13 = vpop.eup %6354  ;;  %v8450_v26 = vld [vmem:[#allocation103_spill] sm:$0xff] }
 0x245   :  { %6358 = vrcp.f32 %v1038_v10  ;;  %v6357_v14 = vpop.eup %6356  ;;  %v1051_v63 = vadd.f32 1.0, %v6355_v13 }
 0x246   :  { %6360 = vrcp.f32 %v1044_v21 }
 0x247   :  { %6362 = vrcp.f32 %v1051_v63 }
 0x24f   :  { %v6359_v49 = vpop.eup %6358 }
 0x250   :  { %v6361_v17 = vpop.eup %6360  ;;  %v1055_v9 = vmul.f32 %v6359_v49, %v6357_v14  ;;  %v8451_v14 = vld [vmem:[#allocation104_spill] sm:$0xff] }
 0x251   :  { %v1054_v53 = vmul.f32 0.0, %v6361_v17  ;;  %v6363_v49 = vpop.eup %6362 }
 0x253   :  { %v7298_v4 = vadd.f32 %v1055_v9, %v1054_v53  ;;  %v1125_v55 = vpop.f32.mrb[2].mxu0  ;;  %v1196_v16 = vpop.f32.mrb[2].mxu1 }
 0x254   :  { %v6231_v44 = vadd.f32 %v1125_v55, %v8449_v31  ;;  %v1127_v40 = vpop.f32.mrb[3].mxu0  ;;  %v1198_v41 = vpop.f32.mrb[3].mxu1  ;;  %v6247_v53 = vadd.f32 %v1196_v16, %v7201_v30  ;;  %v8456_v16 = vld [vmem:[#allocation76_spill] sm:$0xff] }
 0x255   :  { %8448 = vst [vmem:[#allocation109_spill] sm:$0xff] %v7298_v4  ;;  %6364 = vtanh.f32 %v7298_v4  ;;  %v6232_v48 = vadd.f32 %v1127_v40, %v8450_v26  ;;  %v6248_v13 = vadd.f32 %v1198_v41, %v8451_v14  ;;  %v8452_v4 = vld [vmem:[#allocation72_spill] sm:$0xff]  ;;  %v8455_v41 = vld [vmem:[#allocation75_spill] sm:$0xff] }
 0x256   :  { %v4566_v10 = vmul.f32 -1.442695, %v6231_v44  ;;  %v8453_v44 = vld [vmem:[#allocation73_spill] sm:$0xff] }
 0x257   :  { %v4567_v21 = vmul.f32 -1.442695, %v6232_v48  ;;  %v4568_v9 = vmul.f32 -1.442695, %v6248_v13  ;;  %v8454_v48 = vld [vmem:[#allocation74_spill] sm:$0xff]  ;;  %v8460_v13 = vld [vmem:[#allocation80_spill] sm:$0xff] }
 0x258   :  { %6366 = vpow2.f32 %v4566_v10  ;;  %v8458_v10 = vld [vmem:[#allocation78_spill] sm:$0xff] }
 0x259   :  { %6368 = vpow2.f32 %v4567_v21  ;;  %v8459_v21 = vld [vmem:[#allocation79_spill] sm:$0xff] }
 0x25a   :  { %6370 = vpow2.f32 %v4568_v9 }
 0x25b   :  { %6372 = vtanh.f32 %v6247_v53 }
 0x25f   :  { %v6365_v17 = vpop.eup %6364 }
 0x260   :  { %v1058_v63 = vmul.f32 %v6365_v17, %v6363_v49  ;;  %v8461_v49 = vld [vmem:[#allocation81_spill] sm:$0xff]  ;;  %v8462_v17 = vld [vmem:[#allocation82_spill] sm:$0xff] }
 0x262   :  { %v6367_v3 = vpop.eup %6366  ;;  %1294 = vmatmul.mubr.f32.vlgmr.msra.gmra.mrb[18].mxu0 %v1058_v63  ;;  %1365 = vmatmul.mubr.f32.vlgmr.msra.gmra.mrb[18].mxu1 %v1058_v63 }
 0x263   :  { %v6369_v55 = vpop.eup %6368  ;;  %v1208_v31 = vadd.f32 1.0, %v6367_v3  ;;  %4992 = vmatpush1.bf16.msra.mxu0 %v8452_v4  ;;  %5024 = vmatpush1.bf16.msra.mxu1 %v8453_v44  ;;  %v8457_v3 = vld [vmem:[#allocation77_spill] sm:$0xff] }
 0x264   :  { %v1214_v40 = vadd.f32 1.0, %v6369_v55  ;;  %4994 = vmatprep.subr.bf16.mxu0 %v8454_v48  ;;  %5026 = vmatprep.subr.bf16.mxu1 %v8455_v41  ;;  %v6371_v9 = vpop.eup %6370  ;;  %v8464_v55 = vld [vmem:[#allocation84_spill] sm:$0xff]  ;;  %v8466_v41 = vld [vmem:[#allocation86_spill] sm:$0xff] }
 0x265   :  { %6374 = vrcp.f32 %v1208_v31  ;;  %1435 = vmatprep.mubr.f32.mxu0 %v8387_v51  ;;  %1506 = vmatprep.mubr.f32.mxu1 %v8387_v51  ;;  %v8463_v31 = vld [vmem:[#allocation83_spill] sm:$0xff]  ;;  %v6373_v53 = vpop.eup %6372  ;;  %v8470_v48 = vld [vmem:[#allocation90_spill] sm:$0xff] }
 0x266   :  { %6376 = vrcp.f32 %v1214_v40  ;;  %v8465_v40 = vld [vmem:[#allocation85_spill] sm:$0xff] }
 0x267   :  { %4996 = vmatpush1.bf16.msra.mxu0 %v8456_v16  ;;  %5028 = vmatpush1.bf16.msra.mxu1 %v8457_v3 }
 0x268   :  { %4998 = vmatprep.subr.bf16.mxu0 %v8458_v10  ;;  %5030 = vmatprep.subr.bf16.mxu1 %v8459_v21  ;;  %v1221_v10 = vadd.f32 1.0, %v6371_v9  ;;  %v8467_v21 = vld [vmem:[#allocation87_spill] sm:$0xff]  ;;  %v8472_v9 = vld [vmem:[#allocation92_spill] sm:$0xff] }
 0x26a   :  { %6378 = vrcp.f32 %v1221_v10  ;;  %v8479_v10 = vld [vmem:[#allocation99_spill] sm:$0xff] }
 0x26b   :  { %5000 = vmatpush1.bf16.msra.mxu0 %v8460_v13  ;;  %5032 = vmatpush1.bf16.msra.mxu1 %v8461_v49 }
 0x26c   :  { %5002 = vmatprep.subr.bf16.mxu0 %v8462_v17  ;;  %5034 = vmatprep.subr.bf16.mxu1 %v8463_v31  ;;  %v8468_v17 = vld [vmem:[#allocation88_spill] sm:$0xff]  ;;  %v8469_v31 = vld [vmem:[#allocation89_spill] sm:$0xff] }
 0x26f   :  { %v6375_v63 = vpop.eup %6374  ;;  %5004 = vmatpush1.bf16.msra.mxu0 %v8464_v55  ;;  %5036 = vmatpush1.bf16.msra.mxu1 %v8465_v40  ;;  %v8471_v55 = vld [vmem:[#allocation91_spill] sm:$0xff] }
 0x270   :  { %v6377_v3 = vpop.eup %6376  ;;  %v1225_v16 = vmul.f32 %v6375_v63, %v6373_v53  ;;  %5006 = vmatprep.subr.bf16.mxu0 %v8466_v41  ;;  %5038 = vmatprep.subr.bf16.mxu1 %v8467_v21  ;;  %v8473_v53 = vld [vmem:[#allocation93_spill] sm:$0xff]  ;;  %v8474_v63 = vld [vmem:[#allocation94_spill] sm:$0xff] }
 0x271   :  { %v1224_v49 = vmul.f32 %v6377_v3, %v7204_v0  ;;  %v8475_v0 = vld [vmem:[#allocation95_spill] sm:$0xff]  ;;  %v8477_v3 = vld [vmem:[#allocation97_spill] sm:$0xff] }
 0x273   :  { %v7324_v13 = vadd.f32 %v1225_v16, %v1224_v49  ;;  %5008 = vmatpush1.bf16.msra.mxu0 %v8468_v17  ;;  %5040 = vmatpush1.bf16.msra.mxu1 %v8469_v31  ;;  %v8476_v16 = vld [vmem:[#allocation96_spill] sm:$0xff]  ;;  %v8478_v49 = vld [vmem:[#allocation98_spill] sm:$0xff]  ;;  %v8481_v17 = vld [vmem:[#allocation101_spill] sm:$0xff] }
 0x274   :  { %5010 = vmatprep.subr.bf16.mxu0 %v8470_v48  ;;  %5042 = vmatprep.subr.bf16.mxu1 %v8471_v55  ;;  %v6379_v48 = vpop.eup %6378  ;;  %v8480_v31 = vld [vmem:[#allocation100_spill] sm:$0xff] }
 0x275   :  { %6380 = vtanh.f32 %v7324_v13 }
 0x277   :  { %5012 = vmatpush1.bf16.msra.mxu0 %v8472_v9  ;;  %5044 = vmatpush1.bf16.msra.mxu1 %v8473_v53  ;;  %v8482_v53 = vld [vmem:[#allocation12_spill] sm:$0xff] }
 0x278   :  { %5014 = vmatprep.subr.bf16.mxu0 %v8474_v63  ;;  %5046 = vmatprep.subr.bf16.mxu1 %v8475_v0  ;;  %v8483_v63 = vld [vmem:[#allocation13_spill] sm:$0xff] }
 0x27b   :  { %5016 = vmatpush1.bf16.msra.mxu0 %v8476_v16  ;;  %5048 = vmatpush1.bf16.msra.mxu1 %v8477_v3 }
 0x27c   :  { %5018 = vmatprep.subr.bf16.mxu0 %v8478_v49  ;;  %5050 = vmatprep.subr.bf16.mxu1 %v8479_v10 }
 0x27f   :  { %v6381_v55 = vpop.eup %6380  ;;  %5020 = vmatpush1.bf16.msra.mxu0 %v8480_v31  ;;  %5052 = vmatpush1.bf16.msra.mxu1 %v8481_v17 }
 0x280   :  { %v1228_v9 = vmul.f32 %v6381_v55, %v6379_v48  ;;  %5054 = vmatprep.subr.bf16.mxu0 %v8482_v53  ;;  %5086 = vmatprep.subr.bf16.mxu1 %v8483_v63  ;;  %v8484_v48 = vld [vmem:[#allocation50_spill] sm:$0xff]  ;;  %v8485_v55 = vld [vmem:[#allocation51_spill] sm:$0xff] }
 0x282   :  { %1436 = vmatmul.mubr.f32.vlgmr.msra.gmra.mrb[18].mxu0 %v1228_v9  ;;  %1507 = vmatmul.mubr.f32.vlgmr.msra.gmra.mrb[18].mxu1 %v1228_v9 }
 0x283   :  { %5056 = vmatpush1.bf16.msra.mxu0 %v6828_v22  ;;  %5088 = vmatpush1.bf16.msra.mxu1 %v6831_v25 }
 0x284   :  { %5058 = vmatprep.subr.bf16.mxu0 %v6835_v29  ;;  %5090 = vmatprep.subr.bf16.mxu1 %v6842_v34 }
 0x285   :  { %1605 = vmatprep.mubr.f32.mxu0 %v8387_v51  ;;  %1676 = vmatprep.mubr.f32.mxu1 %v8387_v51 }
 0x287   :  { %5060 = vmatpush1.bf16.msra.mxu0 %v6844_v35  ;;  %5092 = vmatpush1.bf16.msra.mxu1 %v6848_v38 }
 0x288   :  { %5062 = vmatprep.subr.bf16.mxu0 %v6852_v42  ;;  %5094 = vmatprep.subr.bf16.mxu1 %v6859_v47 }
 0x28b   :  { %5064 = vmatpush1.bf16.msra.mxu0 %v6863_v50  ;;  %5096 = vmatpush1.bf16.msra.mxu1 %v6867_v54 }
 0x28c   :  { %5066 = vmatprep.subr.bf16.mxu0 %v6871_v58  ;;  %5098 = vmatprep.subr.bf16.mxu1 %v6875_v61 }
 0x28f   :  { %5068 = vmatpush1.bf16.msra.mxu0 %v6882_v2  ;;  %5100 = vmatpush1.bf16.msra.mxu1 %v6886_v5 }
 0x290   :  { %5070 = vmatprep.subr.bf16.mxu0 %v6890_v8  ;;  %5102 = vmatprep.subr.bf16.mxu1 %v6894_v11 }
 0x293   :  { %5072 = vmatpush1.bf16.msra.mxu0 %v6901_v15  ;;  %5104 = vmatpush1.bf16.msra.mxu1 %v6905_v19 }
 0x294   :  { %5074 = vmatprep.subr.bf16.mxu0 %v6909_v24  ;;  %5106 = vmatprep.subr.bf16.mxu1 %v6913_v28 }
 0x297   :  { %5076 = vmatpush1.bf16.msra.mxu0 %v6920_v33  ;;  %5108 = vmatpush1.bf16.msra.mxu1 %v6924_v39 }
 0x298   :  { %5078 = vmatprep.subr.bf16.mxu0 %v6928_v43  ;;  %5110 = vmatprep.subr.bf16.mxu1 %v6932_v46 }
 0x29b   :  { %5080 = vmatpush1.bf16.msra.mxu0 %v6939_v52  ;;  %5112 = vmatpush1.bf16.msra.mxu1 %v6943_v56 }
 0x29c   :  { %5082 = vmatprep.subr.bf16.mxu0 %v6947_v60  ;;  %5114 = vmatprep.subr.bf16.mxu1 %v6951_v1 }
 0x29f   :  { %5084 = vmatpush1.bf16.msra.mxu0 %v6958_v7  ;;  %5116 = vmatpush1.bf16.msra.mxu1 %v6962_v12 }
 0x2a0   :  { %5118 = vmatprep.subr.bf16.mxu0 %v6966_v18  ;;  %5150 = vmatprep.subr.bf16.mxu1 %v6970_v27  ;;  %v8507_v27 = vld [vmem:[#allocation106_spill] sm:$0xff] }
 0x2a2   :  { %1606 = vmatmul.mubr.f32.vlgmr.msra.gmra.mrb[4].mxu0 %v1228_v9  ;;  %1677 = vmatmul.mubr.f32.vlgmr.msra.gmra.mrb[4].mxu1 %v1228_v9  ;;  %v8486_v9 = vld [vmem:[#allocation52_spill] sm:$0xff] }
 0x2a3   :  { %5120 = vmatpush1.bf16.msra.mxu0 %v6974_v32  ;;  %5152 = vmatpush1.bf16.msra.mxu1 %v6978_v36  ;;  %v8506_v36 = vld [vmem:[#allocation105_spill] sm:$0xff] }
 0x2a4   :  { %5122 = vmatprep.subr.bf16.mxu0 %v6980_v37  ;;  %5154 = vmatprep.subr.bf16.mxu1 %v6984_v45  ;;  %v8487_v45 = vld [vmem:[#allocation53_spill] sm:$0xff]  ;;  %v8488_v37 = vld [vmem:[#allocation54_spill] sm:$0xff] }
 0x2a5   :  { %1775 = vmatprep.mubr.f32.mxu0 %v8387_v51  ;;  %1846 = vmatprep.mubr.f32.mxu1 %v8387_v51 }
 0x2a7   :  { %5124 = vmatpush1.bf16.msra.mxu0 %v6990_v57  ;;  %5156 = vmatpush1.bf16.msra.mxu1 %v6994_v59  ;;  %v8489_v57 = vld [vmem:[#allocation55_spill] sm:$0xff]  ;;  %v8490_v59 = vld [vmem:[#allocation56_spill] sm:$0xff] }
 0x2a8   :  { %5126 = vmatprep.subr.bf16.mxu0 %v6996_v62  ;;  %5158 = vmatprep.subr.bf16.mxu1 %v6999_v6  ;;  %v8491_v62 = vld [vmem:[#allocation57_spill] sm:$0xff]  ;;  %v8492_v6 = vld [vmem:[#allocation58_spill] sm:$0xff] }
 0x2ab   :  { %5128 = vmatpush1.bf16.msra.mxu0 %v7004_v20  ;;  %5160 = vmatpush1.bf16.msra.mxu1 %v7008_v23  ;;  %v8493_v20 = vld [vmem:[#allocation59_spill] sm:$0xff]  ;;  %v8494_v23 = vld [vmem:[#allocation60_spill] sm:$0xff] }
 0x2ac   :  { %5130 = vmatprep.subr.bf16.mxu0 %v8484_v48  ;;  %5162 = vmatprep.subr.bf16.mxu1 %v8485_v55  ;;  %v8495_v48 = vld [vmem:[#allocation61_spill] sm:$0xff]  ;;  %v8496_v55 = vld [vmem:[#allocation62_spill] sm:$0xff] }
 0x2af   :  { %5132 = vmatpush1.bf16.msra.mxu0 %v8486_v9  ;;  %5164 = vmatpush1.bf16.msra.mxu1 %v8487_v45  ;;  %v8497_v9 = vld [vmem:[#allocation63_spill] sm:$0xff]  ;;  %v8498_v45 = vld [vmem:[#allocation64_spill] sm:$0xff] }
 0x2b0   :  { %5134 = vmatprep.subr.bf16.mxu0 %v8488_v37  ;;  %5166 = vmatprep.subr.bf16.mxu1 %v8489_v57  ;;  %v8499_v37 = vld [vmem:[#allocation65_spill] sm:$0xff]  ;;  %v8500_v57 = vld [vmem:[#allocation66_spill] sm:$0xff] }
 0x2b3   :  { %5136 = vmatpush1.bf16.msra.mxu0 %v8490_v59  ;;  %5168 = vmatpush1.bf16.msra.mxu1 %v8491_v62  ;;  %v8501_v59 = vld [vmem:[#allocation67_spill] sm:$0xff]  ;;  %v8502_v62 = vld [vmem:[#allocation68_spill] sm:$0xff] }
 0x2b4   :  { %5138 = vmatprep.subr.bf16.mxu0 %v8492_v6  ;;  %5170 = vmatprep.subr.bf16.mxu1 %v8493_v20  ;;  %v8503_v6 = vld [vmem:[#allocation69_spill] sm:$0xff]  ;;  %v8504_v20 = vld [vmem:[#allocation70_spill] sm:$0xff] }
 0x2b7   :  { %5140 = vmatpush1.bf16.msra.mxu0 %v8494_v23  ;;  %5172 = vmatpush1.bf16.msra.mxu1 %v8495_v48  ;;  %v8505_v23 = vld [vmem:[#allocation71_spill] sm:$0xff] }
 0x2b8   :  { %5142 = vmatprep.subr.bf16.mxu0 %v8496_v55  ;;  %5174 = vmatprep.subr.bf16.mxu1 %v8497_v9 }
 0x2bb   :  { %5144 = vmatpush1.bf16.msra.mxu0 %v8498_v45  ;;  %5176 = vmatpush1.bf16.msra.mxu1 %v8499_v37 }
 0x2bc   :  { %5146 = vmatprep.subr.bf16.mxu0 %v8500_v57  ;;  %5178 = vmatprep.subr.bf16.mxu1 %v8501_v59  ;;  %v8508_v59 = vld [vmem:[#allocation107_spill] sm:$0xff] }
 0x2bf   :  { %5148 = vmatpush1.bf16.msra.mxu0 %v8502_v62  ;;  %5180 = vmatpush1.bf16.msra.mxu1 %v8503_v6  ;;  %v8509_v6 = vld [vmem:[#allocation108_spill] sm:$0xff] }
 0x2c0   :  { %5182 = vmatprep.subr.bf16.mxu0 %v8504_v20  ;;  %5214 = vmatprep.subr.bf16.mxu1 %v8505_v23 }
 0x355   :  { %v1437_v48 = vpop.f32.mrb[18].mxu0  ;;  %v1508_v55 = vpop.f32.mrb[18].mxu1 }
 0x356   :  { %v1513_v9 = vadd.f32 %v1437_v48, %v8506_v36  ;;  %v1439_v32 = vpop.f32.mrb[19].mxu0  ;;  %v1510_v45 = vpop.f32.mrb[19].mxu1  ;;  %v1515_v7 = vadd.f32 %v1508_v55, %v8509_v6  ;;  %v8511_v6 = vld [vmem:[#allocation102_spill] sm:$0xff] }
 0x357   :  { %v1514_v37 = vadd.f32 %v1439_v32, %v8507_v27  ;;  %v1516_v62 = vadd.f32 %v1510_v45, %v8508_v59 }
 0x358   :  { %v4569_v18 = vmul.f32 -1.442695, %v1513_v9 }
 0x359   :  { %v4570_v57 = vmul.f32 -1.442695, %v1514_v37  ;;  %v4571_v12 = vmul.f32 -1.442695, %v1516_v62 }
 0x35a   :  { %6382 = vpow2.f32 %v4569_v18 }
 0x35b   :  { %6384 = vpow2.f32 %v4570_v57  ;;  %v8510_v57 = vld [vmem:[#allocation109_spill] sm:$0xff] }
 0x35c   :  { %6386 = vpow2.f32 %v4571_v12 }
 0x35d   :  { %6388 = vtanh.f32 %v1515_v7 }
 0x364   :  { %v6383_v20 = vpop.eup %6382 }
 0x365   :  { %v6385_v1 = vpop.eup %6384  ;;  %v1520_v23 = vadd.f32 1.0, %v6383_v20 }
 0x366   :  { %v1526_v60 = vadd.f32 1.0, %v6385_v1  ;;  %v6387_v48 = vpop.eup %6386 }
 0x367   :  { %6390 = vrcp.f32 %v1520_v23  ;;  %v6389_v36 = vpop.eup %6388  ;;  %v1533_v18 = vadd.f32 1.0, %v6387_v48 }
 0x368   :  { %6392 = vrcp.f32 %v1526_v60 }
 0x369   :  { %6394 = vrcp.f32 %v1533_v18 }
 0x371   :  { %v6391_v32 = vpop.eup %6390 }
 0x372   :  { %v6393_v9 = vpop.eup %6392  ;;  %v1537_v37 = vmul.f32 %v6391_v32, %v6389_v36 }
 0x373   :  { %v1536_v27 = vmul.f32 %v6393_v9, %v8510_v57  ;;  %v6395_v48 = vpop.eup %6394 }
 0x375   :  { %v7416_v45 = vadd.f32 %v1537_v37, %v1536_v27  ;;  %v1607_v62 = vpop.f32.mrb[4].mxu0  ;;  %v1678_v55 = vpop.f32.mrb[4].mxu1 }
 0x376   :  { %v6233_v20 = vadd.f32 %v1607_v62, %v8511_v6  ;;  %v1609_v12 = vpop.f32.mrb[5].mxu0  ;;  %v1680_v7 = vpop.f32.mrb[5].mxu1  ;;  %v6249_v9 = vadd.f32 %v1678_v55, %v7201_v30  ;;  %v8514_v55 = vld [vmem:[#allocation76_spill] sm:$0xff] }
 0x377   :  { %v6234_v1 = vadd.f32 %v1609_v12, %v8450_v26  ;;  %6396 = vtanh.f32 %v7416_v45  ;;  %v6250_v36 = vadd.f32 %v1680_v7, %v8451_v14  ;;  %v8512_v12 = vld [vmem:[#allocation74_spill] sm:$0xff]  ;;  %v8513_v7 = vld [vmem:[#allocation75_spill] sm:$0xff] }
 0x378   :  { %v4572_v60 = vmul.f32 -1.442695, %v6233_v20 }
 0x379   :  { %v4573_v23 = vmul.f32 -1.442695, %v6234_v1  ;;  %v4574_v32 = vmul.f32 -1.442695, %v6250_v36  ;;  %v8515_v1 = vld [vmem:[#allocation77_spill] sm:$0xff]  ;;  %v8518_v36 = vld [vmem:[#allocation80_spill] sm:$0xff] }
 0x37a   :  { %6398 = vpow2.f32 %v4572_v60  ;;  %v8516_v60 = vld [vmem:[#allocation78_spill] sm:$0xff] }
 0x37b   :  { %6400 = vpow2.f32 %v4573_v23  ;;  %v8517_v23 = vld [vmem:[#allocation79_spill] sm:$0xff] }
 0x37c   :  { %6402 = vpow2.f32 %v4574_v32  ;;  %v8521_v32 = vld [vmem:[#allocation83_spill] sm:$0xff] }
 0x37d   :  { %6404 = vtanh.f32 %v6249_v9 }
 0x381   :  { %v6397_v27 = vpop.eup %6396 }
 0x382   :  { %v1540_v37 = vmul.f32 %v6397_v27, %v6395_v48  ;;  %v8519_v48 = vld [vmem:[#allocation81_spill] sm:$0xff]  ;;  %v8520_v27 = vld [vmem:[#allocation82_spill] sm:$0xff] }
 0x384   :  { %v6399_v18 = vpop.eup %6398  ;;  %1776 = vmatmul.mubr.f32.vlgmr.msra.gmra.mrb[20].mxu0 %v1540_v37  ;;  %1847 = vmatmul.mubr.f32.vlgmr.msra.gmra.mrb[20].mxu1 %v1540_v37 }
 0x385   :  { %v6401_v57 = vpop.eup %6400  ;;  %v1690_v62 = vadd.f32 1.0, %v6399_v18  ;;  %5184 = vmatpush1.bf16.msra.mxu0 %v8452_v4  ;;  %5216 = vmatpush1.bf16.msra.mxu1 %v8453_v44 }
 0x386   :  { %v1696_v20 = vadd.f32 1.0, %v6401_v57  ;;  %5186 = vmatprep.subr.bf16.mxu0 %v8512_v12  ;;  %5218 = vmatprep.subr.bf16.mxu1 %v8513_v7  ;;  %v6403_v9 = vpop.eup %6402  ;;  %v8522_v57 = vld [vmem:[#allocation84_spill] sm:$0xff] }
 0x387   :  { %6406 = vrcp.f32 %v1690_v62  ;;  %1917 = vmatprep.mubr.f32.mxu0 %v8387_v51  ;;  %1988 = vmatprep.mubr.f32.mxu1 %v8387_v51  ;;  %v6405_v37 = vpop.eup %6404 }
 0x388   :  { %6408 = vrcp.f32 %v1696_v20 }
 0x389   :  { %5188 = vmatpush1.bf16.msra.mxu0 %v8514_v55  ;;  %5220 = vmatpush1.bf16.msra.mxu1 %v8515_v1 }
 0x38a   :  { %5190 = vmatprep.subr.bf16.mxu0 %v8516_v60  ;;  %5222 = vmatprep.subr.bf16.mxu1 %v8517_v23  ;;  %v1703_v60 = vadd.f32 1.0, %v6403_v9  ;;  %v8525_v23 = vld [vmem:[#allocation90_spill] sm:$0xff]  ;;  %v8527_v9 = vld [vmem:[#allocation92_spill] sm:$0xff] }
 0x38c   :  { %6410 = vrcp.f32 %v1703_v60 }
 0x38d   :  { %5192 = vmatpush1.bf16.msra.mxu0 %v8518_v36  ;;  %5224 = vmatpush1.bf16.msra.mxu1 %v8519_v48 }
 0x38e   :  { %5194 = vmatprep.subr.bf16.mxu0 %v8520_v27  ;;  %5226 = vmatprep.subr.bf16.mxu1 %v8521_v32  ;;  %v8523_v27 = vld [vmem:[#allocation88_spill] sm:$0xff]  ;;  %v8524_v32 = vld [vmem:[#allocation89_spill] sm:$0xff] }
 0x391   :  { %v6407_v18 = vpop.eup %6406  ;;  %5196 = vmatpush1.bf16.msra.mxu0 %v8522_v57  ;;  %5228 = vmatpush1.bf16.msra.mxu1 %v8465_v40  ;;  %v8526_v57 = vld [vmem:[#allocation91_spill] sm:$0xff] }
 0x392   :  { %v6409_v62 = vpop.eup %6408  ;;  %v1707_v20 = vmul.f32 %v6407_v18, %v6405_v37  ;;  %5198 = vmatprep.subr.bf16.mxu0 %v8466_v41  ;;  %5230 = vmatprep.subr.bf16.mxu1 %v8467_v21  ;;  %v8528_v37 = vld [vmem:[#allocation93_spill] sm:$0xff]  ;;  %v8529_v18 = vld [vmem:[#allocation94_spill] sm:$0xff] }
 0x393   :  { %v1706_v48 = vmul.f32 %v6409_v62, %v7324_v13  ;;  %v8530_v62 = vld [vmem:[#allocation34_spill] sm:$0xff] }
 0x395   :  { %v7442_v36 = vadd.f32 %v1707_v20, %v1706_v48  ;;  %5200 = vmatpush1.bf16.msra.mxu0 %v8523_v27  ;;  %5232 = vmatpush1.bf16.msra.mxu1 %v8524_v32  ;;  %v8531_v20 = vld [vmem:[#allocation35_spill] sm:$0xff] }
 0x396   :  { %5202 = vmatprep.subr.bf16.mxu0 %v8525_v23  ;;  %5234 = vmatprep.subr.bf16.mxu1 %v8526_v57  ;;  %v6411_v13 = vpop.eup %6410 }
 0x397   :  { %6412 = vtanh.f32 %v7442_v36 }
 0x399   :  { %5204 = vmatpush1.bf16.msra.mxu0 %v8527_v9  ;;  %5236 = vmatpush1.bf16.msra.mxu1 %v8528_v37 }
 0x39a   :  { %5206 = vmatprep.subr.bf16.mxu0 %v8529_v18  ;;  %5238 = vmatprep.subr.bf16.mxu1 %v8475_v0 }
 0x39d   :  { %5208 = vmatpush1.bf16.msra.mxu0 %v8476_v16  ;;  %5240 = vmatpush1.bf16.msra.mxu1 %v8477_v3 }
 0x39e   :  { %5210 = vmatprep.subr.bf16.mxu0 %v8478_v49  ;;  %5242 = vmatprep.subr.bf16.mxu1 %v8479_v10 }
 0x3a1   :  { %v6413_v60 = vpop.eup %6412  ;;  %5212 = vmatpush1.bf16.msra.mxu0 %v8480_v31  ;;  %5244 = vmatpush1.bf16.msra.mxu1 %v8481_v17 }
 0x3a2   :  { %5246 = vmatprep.subr.bf16.mxu0 %v8482_v53  ;;  %5278 = vmatprep.subr.bf16.mxu1 %v8483_v63  ;;  %v1710_v48 = vmul.f32 %v6413_v60, %v6411_v13  ;;  %v8532_v13 = vld [vmem:[#allocation36_spill] sm:$0xff]  ;;  %v8533_v60 = vld [vmem:[#allocation37_spill] sm:$0xff] }
 0x3a4   :  { %1918 = vmatmul.mubr.f32.vlgmr.msra.gmra.mrb[20].mxu0 %v1710_v48  ;;  %1989 = vmatmul.mubr.f32.vlgmr.msra.gmra.mrb[20].mxu1 %v1710_v48 }
 0x3a5   :  { %5248 = vmatpush1.bf16.msra.mxu0 %v6828_v22  ;;  %5280 = vmatpush1.bf16.msra.mxu1 %v6831_v25 }
 0x3a6   :  { %5250 = vmatprep.subr.bf16.mxu0 %v6835_v29  ;;  %5282 = vmatprep.subr.bf16.mxu1 %v6842_v34 }
 0x3a7   :  { %2087 = vmatprep.mubr.f32.mxu0 %v8387_v51  ;;  %2158 = vmatprep.mubr.f32.mxu1 %v8387_v51 }
 0x3a9   :  { %5252 = vmatpush1.bf16.msra.mxu0 %v6844_v35  ;;  %5284 = vmatpush1.bf16.msra.mxu1 %v6848_v38 }
 0x3aa   :  { %5254 = vmatprep.subr.bf16.mxu0 %v6852_v42  ;;  %5286 = vmatprep.subr.bf16.mxu1 %v6859_v47 }
 0x3ad   :  { %5256 = vmatpush1.bf16.msra.mxu0 %v6863_v50  ;;  %5288 = vmatpush1.bf16.msra.mxu1 %v6867_v54 }
 0x3ae   :  { %5258 = vmatprep.subr.bf16.mxu0 %v6871_v58  ;;  %5290 = vmatprep.subr.bf16.mxu1 %v6875_v61 }
 0x3b1   :  { %5260 = vmatpush1.bf16.msra.mxu0 %v6882_v2  ;;  %5292 = vmatpush1.bf16.msra.mxu1 %v6886_v5 }
 0x3b2   :  { %5262 = vmatprep.subr.bf16.mxu0 %v6890_v8  ;;  %5294 = vmatprep.subr.bf16.mxu1 %v6894_v11 }
 0x3b5   :  { %5264 = vmatpush1.bf16.msra.mxu0 %v6901_v15  ;;  %5296 = vmatpush1.bf16.msra.mxu1 %v6905_v19  ;;  %v8569_v19 = vld [vmem:[#allocation106_spill] sm:$0xff] }
 0x3b6   :  { %5266 = vmatprep.subr.bf16.mxu0 %v6909_v24  ;;  %5298 = vmatprep.subr.bf16.mxu1 %v6913_v28  ;;  %v8534_v28 = vld [vmem:[#allocation38_spill] sm:$0xff] }
 0x3b9   :  { %5268 = vmatpush1.bf16.msra.mxu0 %v6920_v33  ;;  %5300 = vmatpush1.bf16.msra.mxu1 %v6924_v39  ;;  %v8535_v33 = vld [vmem:[#allocation39_spill] sm:$0xff]  ;;  %v8568_v39 = vld [vmem:[#allocation105_spill] sm:$0xff] }
 0x3ba   :  { %5270 = vmatprep.subr.bf16.mxu0 %v6928_v43  ;;  %5302 = vmatprep.subr.bf16.mxu1 %v6932_v46  ;;  %v8536_v43 = vld [vmem:[#allocation40_spill] sm:$0xff]  ;;  %v8537_v46 = vld [vmem:[#allocation41_spill] sm:$0xff] }
 0x3bd   :  { %5272 = vmatpush1.bf16.msra.mxu0 %v6939_v52  ;;  %5304 = vmatpush1.bf16.msra.mxu1 %v6943_v56  ;;  %v8538_v52 = vld [vmem:[#allocation42_spill] sm:$0xff]  ;;  %v8539_v56 = vld [vmem:[#allocation43_spill] sm:$0xff] }
 0x3be   :  { %5274 = vmatprep.subr.bf16.mxu0 %v8530_v62  ;;  %5306 = vmatprep.subr.bf16.mxu1 %v8531_v20  ;;  %v8549_v20 = vld [vmem:[#allocation53_spill] sm:$0xff]  ;;  %v8550_v62 = vld [vmem:[#allocation54_spill] sm:$0xff] }
 0x3c1   :  { %5276 = vmatpush1.bf16.msra.mxu0 %v8532_v13  ;;  %5308 = vmatpush1.bf16.msra.mxu1 %v8533_v60  ;;  %v8540_v13 = vld [vmem:[#allocation44_spill] sm:$0xff]  ;;  %v8541_v60 = vld [vmem:[#allocation45_spill] sm:$0xff] }
 0x3c2   :  { %5310 = vmatprep.subr.bf16.mxu0 %v8534_v28  ;;  %5342 = vmatprep.subr.bf16.mxu1 %v8535_v33  ;;  %v8542_v28 = vld [vmem:[#allocation46_spill] sm:$0xff]  ;;  %v8543_v33 = vld [vmem:[#allocation47_spill] sm:$0xff] }
 0x3c4   :  { %2088 = vmatmul.mubr.f32.vlgmr.msra.gmra.mrb[6].mxu0 %v1710_v48  ;;  %2159 = vmatmul.mubr.f32.vlgmr.msra.gmra.mrb[6].mxu1 %v1710_v48  ;;  %v8544_v48 = vld [vmem:[#allocation48_spill] sm:$0xff] }
 0x3c5   :  { %5312 = vmatpush1.bf16.msra.mxu0 %v8536_v43  ;;  %5344 = vmatpush1.bf16.msra.mxu1 %v8537_v46  ;;  %v8545_v43 = vld [vmem:[#allocation49_spill] sm:$0xff]  ;;  %v8546_v46 = vld [vmem:[#allocation50_spill] sm:$0xff] }
 0x3c6   :  { %5314 = vmatprep.subr.bf16.mxu0 %v8538_v52  ;;  %5346 = vmatprep.subr.bf16.mxu1 %v8539_v56  ;;  %v8547_v52 = vld [vmem:[#allocation51_spill] sm:$0xff]  ;;  %v8548_v56 = vld [vmem:[#allocation52_spill] sm:$0xff] }
 0x3c7   :  { %2257 = vmatprep.mubr.f32.mxu0 %v8387_v51  ;;  %2328 = vmatprep.mubr.f32.mxu1 %v8387_v51 }
 0x3c9   :  { %5316 = vmatpush1.bf16.msra.mxu0 %v8540_v13  ;;  %5348 = vmatpush1.bf16.msra.mxu1 %v8541_v60  ;;  %v8551_v13 = vld [vmem:[#allocation55_spill] sm:$0xff]  ;;  %v8552_v60 = vld [vmem:[#allocation56_spill] sm:$0xff] }
 0x3ca   :  { %5318 = vmatprep.subr.bf16.mxu0 %v8542_v28  ;;  %5350 = vmatprep.subr.bf16.mxu1 %v8543_v33  ;;  %v8553_v28 = vld [vmem:[#allocation57_spill] sm:$0xff]  ;;  %v8554_v33 = vld [vmem:[#allocation58_spill] sm:$0xff] }
 0x3cd   :  { %5320 = vmatpush1.bf16.msra.mxu0 %v8544_v48  ;;  %5352 = vmatpush1.bf16.msra.mxu1 %v8545_v43  ;;  %v8555_v48 = vld [vmem:[#allocation59_spill] sm:$0xff]  ;;  %v8556_v43 = vld [vmem:[#allocation60_spill] sm:$0xff] }
 0x3ce   :  { %5322 = vmatprep.subr.bf16.mxu0 %v8546_v46  ;;  %5354 = vmatprep.subr.bf16.mxu1 %v8547_v52  ;;  %v8557_v46 = vld [vmem:[#allocation61_spill] sm:$0xff]  ;;  %v8558_v52 = vld [vmem:[#allocation62_spill] sm:$0xff] }
 0x3d1   :  { %5324 = vmatpush1.bf16.msra.mxu0 %v8548_v56  ;;  %5356 = vmatpush1.bf16.msra.mxu1 %v8549_v20  ;;  %v8559_v56 = vld [vmem:[#allocation63_spill] sm:$0xff]  ;;  %v8560_v20 = vld [vmem:[#allocation64_spill] sm:$0xff] }
 0x3d2   :  { %5326 = vmatprep.subr.bf16.mxu0 %v8550_v62  ;;  %5358 = vmatprep.subr.bf16.mxu1 %v8551_v13  ;;  %v8561_v62 = vld [vmem:[#allocation65_spill] sm:$0xff]  ;;  %v8562_v13 = vld [vmem:[#allocation66_spill] sm:$0xff] }
 0x3d5   :  { %5328 = vmatpush1.bf16.msra.mxu0 %v8552_v60  ;;  %5360 = vmatpush1.bf16.msra.mxu1 %v8553_v28  ;;  %v8563_v60 = vld [vmem:[#allocation67_spill] sm:$0xff]  ;;  %v8564_v28 = vld [vmem:[#allocation68_spill] sm:$0xff] }
 0x3d6   :  { %5330 = vmatprep.subr.bf16.mxu0 %v8554_v33  ;;  %5362 = vmatprep.subr.bf16.mxu1 %v8555_v48  ;;  %v8565_v33 = vld [vmem:[#allocation69_spill] sm:$0xff]  ;;  %v8566_v48 = vld [vmem:[#allocation70_spill] sm:$0xff] }
 0x3d9   :  { %5332 = vmatpush1.bf16.msra.mxu0 %v8556_v43  ;;  %5364 = vmatpush1.bf16.msra.mxu1 %v8557_v46  ;;  %v8567_v43 = vld [vmem:[#allocation71_spill] sm:$0xff] }
 0x3da   :  { %5334 = vmatprep.subr.bf16.mxu0 %v8558_v52  ;;  %5366 = vmatprep.subr.bf16.mxu1 %v8559_v56 }
 0x3dd   :  { %5336 = vmatpush1.bf16.msra.mxu0 %v8560_v20  ;;  %5368 = vmatpush1.bf16.msra.mxu1 %v8561_v62 }
 0x3de   :  { %5338 = vmatprep.subr.bf16.mxu0 %v8562_v13  ;;  %5370 = vmatprep.subr.bf16.mxu1 %v8563_v60 }
 0x3e1   :  { %5340 = vmatpush1.bf16.msra.mxu0 %v8564_v28  ;;  %5372 = vmatpush1.bf16.msra.mxu1 %v8565_v33  ;;  %v8570_v33 = vld [vmem:[#allocation108_spill] sm:$0xff] }
 0x3e2   :  { %5374 = vmatprep.subr.bf16.mxu0 %v8566_v48  ;;  %5406 = vmatprep.subr.bf16.mxu1 %v8567_v43 }
 0x477   :  { %v1919_v46 = vpop.f32.mrb[20].mxu0  ;;  %v1990_v52 = vpop.f32.mrb[20].mxu1 }
 0x478   :  { %v1995_v56 = vadd.f32 %v1919_v46, %v8568_v39  ;;  %v1921_v24 = vpop.f32.mrb[21].mxu0  ;;  %v1992_v20 = vpop.f32.mrb[21].mxu1  ;;  %v1997_v11 = vadd.f32 %v1990_v52, %v8570_v33 }
 0x479   :  { %v1996_v62 = vadd.f32 %v1921_v24, %v8569_v19  ;;  %v1998_v28 = vadd.f32 %v1992_v20, %v8508_v59 }
 0x47a   :  { %v4575_v15 = vmul.f32 -1.442695, %v1995_v56 }
 0x47b   :  { %v4576_v13 = vmul.f32 -1.442695, %v1996_v62  ;;  %v4577_v60 = vmul.f32 -1.442695, %v1998_v28 }
 0x47c   :  { %6414 = vpow2.f32 %v4575_v15 }
 0x47d   :  { %6416 = vpow2.f32 %v4576_v13 }
 0x47e   :  { %6418 = vpow2.f32 %v4577_v60 }
 0x47f   :  { %6420 = vtanh.f32 %v1997_v11 }
 0x486   :  { %v6415_v48 = vpop.eup %6414 }
 0x487   :  { %v6417_v8 = vpop.eup %6416  ;;  %v2002_v43 = vadd.f32 1.0, %v6415_v48 }
 0x488   :  { %v2008_v5 = vadd.f32 1.0, %v6417_v8  ;;  %v6419_v46 = vpop.eup %6418 }
 0x489   :  { %6422 = vrcp.f32 %v2002_v43  ;;  %v6421_v39 = vpop.eup %6420  ;;  %v2015_v15 = vadd.f32 1.0, %v6419_v46 }
 0x48a   :  { %6424 = vrcp.f32 %v2008_v5 }
 0x48b   :  { %6426 = vrcp.f32 %v2015_v15 }
 0x493   :  { %v6423_v24 = vpop.eup %6422 }
 0x494   :  { %v6425_v56 = vpop.eup %6424  ;;  %v2019_v62 = vmul.f32 %v6423_v24, %v6421_v39 }
 0x495   :  { %v2018_v13 = vmul.f32 %v6425_v56, %v7416_v45  ;;  %v6427_v45 = vpop.eup %6426 }
 0x497   :  { %v7534_v20 = vadd.f32 %v2019_v62, %v2018_v13  ;;  %v2089_v28 = vpop.f32.mrb[6].mxu0  ;;  %v2160_v52 = vpop.f32.mrb[6].mxu1 }
 0x498   :  { %v6235_v48 = vadd.f32 %v2089_v28, %v8511_v6  ;;  %v2091_v60 = vpop.f32.mrb[7].mxu0  ;;  %v2162_v11 = vpop.f32.mrb[7].mxu1  ;;  %v6251_v56 = vadd.f32 %v2160_v52, %v7201_v30  ;;  %v8571_v52 = vld [vmem:[#allocation78_spill] sm:$0xff] }
 0x499   :  { %v6236_v8 = vadd.f32 %v2091_v60, %v8450_v26  ;;  %6428 = vtanh.f32 %v7534_v20  ;;  %v6252_v39 = vadd.f32 %v2162_v11, %v8451_v14  ;;  %v8572_v60 = vld [vmem:[#allocation79_spill] sm:$0xff]  ;;  %v8573_v11 = vld [vmem:[#allocation80_spill] sm:$0xff] }
 0x49a   :  { %v4578_v5 = vmul.f32 -1.442695, %v6235_v48 }
 0x49b   :  { %v4579_v43 = vmul.f32 -1.442695, %v6236_v8  ;;  %v4580_v24 = vmul.f32 -1.442695, %v6252_v39  ;;  %v8574_v8 = vld [vmem:[#allocation81_spill] sm:$0xff] }
 0x49c   :  { %6430 = vpow2.f32 %v4578_v5  ;;  %v8575_v5 = vld [vmem:[#allocation82_spill] sm:$0xff] }
 0x49d   :  { %6432 = vpow2.f32 %v4579_v43  ;;  %v8576_v43 = vld [vmem:[#allocation83_spill] sm:$0xff] }
 0x49e   :  { %6434 = vpow2.f32 %v4580_v24  ;;  %v8577_v24 = vld [vmem:[#allocation84_spill] sm:$0xff] }
 0x49f   :  { %6436 = vtanh.f32 %v6251_v56 }
 0x4a3   :  { %v6429_v46 = vpop.eup %6428 }
 0x4a4   :  { %v2022_v62 = vmul.f32 %v6429_v46, %v6427_v45 }
 0x4a6   :  { %v6431_v15 = vpop.eup %6430  ;;  %2258 = vmatmul.mubr.f32.vlgmr.msra.gmra.mrb[22].mxu0 %v2022_v62  ;;  %2329 = vmatmul.mubr.f32.vlgmr.msra.gmra.mrb[22].mxu1 %v2022_v62 }
 0x4a7   :  { %v6433_v13 = vpop.eup %6432  ;;  %v2172_v28 = vadd.f32 1.0, %v6431_v15  ;;  %5376 = vmatpush1.bf16.msra.mxu0 %v8452_v4  ;;  %5408 = vmatpush1.bf16.msra.mxu1 %v8453_v44 }
 0x4a8   :  { %v2178_v48 = vadd.f32 1.0, %v6433_v13  ;;  %5378 = vmatprep.subr.bf16.mxu0 %v8512_v12  ;;  %5410 = vmatprep.subr.bf16.mxu1 %v8513_v7  ;;  %v6435_v39 = vpop.eup %6434 }
 0x4a9   :  { %6438 = vrcp.f32 %v2172_v28  ;;  %2399 = vmatprep.mubr.f32.mxu0 %v8387_v51  ;;  %2470 = vmatprep.mubr.f32.mxu1 %v8387_v51  ;;  %v6437_v45 = vpop.eup %6436  ;;  %v2185_v15 = vadd.f32 1.0, %v6435_v39 }
 0x4aa   :  { %6440 = vrcp.f32 %v2178_v48 }
 0x4ab   :  { %5380 = vmatpush1.bf16.msra.mxu0 %v8514_v55  ;;  %5412 = vmatpush1.bf16.msra.mxu1 %v8515_v1  ;;  %6442 = vrcp.f32 %v2185_v15  ;;  %v8582_v15 = vld [vmem:[#allocation25_spill] sm:$0xff] }
 0x4ac   :  { %5382 = vmatprep.subr.bf16.mxu0 %v8571_v52  ;;  %5414 = vmatprep.subr.bf16.mxu1 %v8572_v60 }
 0x4af   :  { %5384 = vmatpush1.bf16.msra.mxu0 %v8573_v11  ;;  %5416 = vmatpush1.bf16.msra.mxu1 %v8574_v8 }
 0x4b0   :  { %5386 = vmatprep.subr.bf16.mxu0 %v8575_v5  ;;  %5418 = vmatprep.subr.bf16.mxu1 %v8576_v43 }
 0x4b3   :  { %v6439_v46 = vpop.eup %6438  ;;  %5388 = vmatpush1.bf16.msra.mxu0 %v8577_v24  ;;  %5420 = vmatpush1.bf16.msra.mxu1 %v8465_v40 }
 0x4b4   :  { %v6441_v56 = vpop.eup %6440  ;;  %v2189_v62 = vmul.f32 %v6439_v46, %v6437_v45  ;;  %5390 = vmatprep.subr.bf16.mxu0 %v8466_v41  ;;  %5422 = vmatprep.subr.bf16.mxu1 %v8467_v21  ;;  %v8578_v45 = vld [vmem:[#allocation21_spill] sm:$0xff]  ;;  %v8579_v46 = vld [vmem:[#allocation22_spill] sm:$0xff] }
 0x4b5   :  { %v2188_v13 = vmul.f32 %v6441_v56, %v7442_v36  ;;  %v6443_v36 = vpop.eup %6442  ;;  %v8580_v56 = vld [vmem:[#allocation23_spill] sm:$0xff] }
 0x4b7   :  { %v7560_v28 = vadd.f32 %v2189_v62, %v2188_v13  ;;  %5392 = vmatpush1.bf16.msra.mxu0 %v8523_v27  ;;  %5424 = vmatpush1.bf16.msra.mxu1 %v8524_v32  ;;  %v8581_v62 = vld [vmem:[#allocation24_spill] sm:$0xff]  ;;  %v8583_v13 = vld [vmem:[#allocation26_spill] sm:$0xff] }
 0x4b8   :  { %5394 = vmatprep.subr.bf16.mxu0 %v8525_v23  ;;  %5426 = vmatprep.subr.bf16.mxu1 %v8526_v57 }
 0x4b9   :  { %6444 = vtanh.f32 %v7560_v28 }
 0x4bb   :  { %5396 = vmatpush1.bf16.msra.mxu0 %v8527_v9  ;;  %5428 = vmatpush1.bf16.msra.mxu1 %v8528_v37 }
 0x4bc   :  { %5398 = vmatprep.subr.bf16.mxu0 %v8529_v18  ;;  %5430 = vmatprep.subr.bf16.mxu1 %v8475_v0 }
 0x4bf   :  { %5400 = vmatpush1.bf16.msra.mxu0 %v8476_v16  ;;  %5432 = vmatpush1.bf16.msra.mxu1 %v8477_v3 }
 0x4c0   :  { %5402 = vmatprep.subr.bf16.mxu0 %v8478_v49  ;;  %5434 = vmatprep.subr.bf16.mxu1 %v8479_v10 }
 0x4c3   :  { %v6445_v48 = vpop.eup %6444  ;;  %5404 = vmatpush1.bf16.msra.mxu0 %v8480_v31  ;;  %5436 = vmatpush1.bf16.msra.mxu1 %v8481_v17 }
 0x4c4   :  { %v2192_v39 = vmul.f32 %v6445_v48, %v6443_v36  ;;  %5438 = vmatprep.subr.bf16.mxu0 %v8482_v53  ;;  %5470 = vmatprep.subr.bf16.mxu1 %v8483_v63  ;;  %v8584_v36 = vld [vmem:[#allocation27_spill] sm:$0xff]  ;;  %v8585_v48 = vld [vmem:[#allocation28_spill] sm:$0xff] }
 0x4c6   :  { %2400 = vmatmul.mubr.f32.vlgmr.msra.gmra.mrb[22].mxu0 %v2192_v39  ;;  %2471 = vmatmul.mubr.f32.vlgmr.msra.gmra.mrb[22].mxu1 %v2192_v39 }
 0x4c7   :  { %5440 = vmatpush1.bf16.msra.mxu0 %v6828_v22  ;;  %5472 = vmatpush1.bf16.msra.mxu1 %v6831_v25 }
 0x4c8   :  { %5442 = vmatprep.subr.bf16.mxu0 %v6835_v29  ;;  %5474 = vmatprep.subr.bf16.mxu1 %v6842_v34 }
 0x4c9   :  { %2569 = vmatprep.mubr.f32.mxu0 %v8387_v51  ;;  %2640 = vmatprep.mubr.f32.mxu1 %v8387_v51 }
 0x4cb   :  { %5444 = vmatpush1.bf16.msra.mxu0 %v6844_v35  ;;  %5476 = vmatpush1.bf16.msra.mxu1 %v6848_v38 }
 0x4cc   :  { %5446 = vmatprep.subr.bf16.mxu0 %v6852_v42  ;;  %5478 = vmatprep.subr.bf16.mxu1 %v6859_v47 }
 0x4cf   :  { %5448 = vmatpush1.bf16.msra.mxu0 %v6863_v50  ;;  %5480 = vmatpush1.bf16.msra.mxu1 %v6867_v54 }
 0x4d0   :  { %5450 = vmatprep.subr.bf16.mxu0 %v6871_v58  ;;  %5482 = vmatprep.subr.bf16.mxu1 %v6875_v61  ;;  %v8586_v58 = vld [vmem:[#allocation29_spill] sm:$0xff]  ;;  %v8587_v61 = vld [vmem:[#allocation30_spill] sm:$0xff] }
 0x4d3   :  { %5452 = vmatpush1.bf16.msra.mxu0 %v6882_v2  ;;  %5484 = vmatpush1.bf16.msra.mxu1 %v8578_v45  ;;  %v8588_v2 = vld [vmem:[#allocation31_spill] sm:$0xff]  ;;  %v8589_v45 = vld [vmem:[#allocation32_spill] sm:$0xff] }
 0x4d4   :  { %5454 = vmatprep.subr.bf16.mxu0 %v8579_v46  ;;  %5486 = vmatprep.subr.bf16.mxu1 %v8580_v56  ;;  %v8590_v46 = vld [vmem:[#allocation33_spill] sm:$0xff]  ;;  %v8591_v56 = vld [vmem:[#allocation34_spill] sm:$0xff] }
 0x4d7   :  { %5456 = vmatpush1.bf16.msra.mxu0 %v8581_v62  ;;  %5488 = vmatpush1.bf16.msra.mxu1 %v8582_v15  ;;  %v8592_v62 = vld [vmem:[#allocation35_spill] sm:$0xff]  ;;  %v8593_v15 = vld [vmem:[#allocation36_spill] sm:$0xff] }
 0x4d8   :  { %5458 = vmatprep.subr.bf16.mxu0 %v8583_v13  ;;  %5490 = vmatprep.subr.bf16.mxu1 %v8584_v36  ;;  %v8594_v13 = vld [vmem:[#allocation37_spill] sm:$0xff]  ;;  %v8595_v36 = vld [vmem:[#allocation38_spill] sm:$0xff] }
 0x4db   :  { %5460 = vmatpush1.bf16.msra.mxu0 %v8585_v48  ;;  %5492 = vmatpush1.bf16.msra.mxu1 %v8586_v58  ;;  %v8596_v48 = vld [vmem:[#allocation39_spill] sm:$0xff]  ;;  %v8629_v58 = vld [vmem:[#allocation105_spill] sm:$0xff] }
 0x4dc   :  { %5462 = vmatprep.subr.bf16.mxu0 %v8587_v61  ;;  %5494 = vmatprep.subr.bf16.mxu1 %v8588_v2  ;;  %v8597_v61 = vld [vmem:[#allocation40_spill] sm:$0xff]  ;;  %v8598_v2 = vld [vmem:[#allocation41_spill] sm:$0xff] }
 0x4df   :  { %5464 = vmatpush1.bf16.msra.mxu0 %v8589_v45  ;;  %5496 = vmatpush1.bf16.msra.mxu1 %v8590_v46  ;;  %v8599_v45 = vld [vmem:[#allocation42_spill] sm:$0xff]  ;;  %v8600_v46 = vld [vmem:[#allocation43_spill] sm:$0xff] }
 0x4e0   :  { %5466 = vmatprep.subr.bf16.mxu0 %v8591_v56  ;;  %5498 = vmatprep.subr.bf16.mxu1 %v8592_v62  ;;  %v8610_v62 = vld [vmem:[#allocation53_spill] sm:$0xff]  ;;  %v8611_v56 = vld [vmem:[#allocation54_spill] sm:$0xff] }
 0x4e3   :  { %5468 = vmatpush1.bf16.msra.mxu0 %v8593_v15  ;;  %5500 = vmatpush1.bf16.msra.mxu1 %v8594_v13  ;;  %v8601_v15 = vld [vmem:[#allocation44_spill] sm:$0xff]  ;;  %v8602_v13 = vld [vmem:[#allocation45_spill] sm:$0xff] }
 0x4e4   :  { %5502 = vmatprep.subr.bf16.mxu0 %v8595_v36  ;;  %5534 = vmatprep.subr.bf16.mxu1 %v8596_v48  ;;  %v8603_v36 = vld [vmem:[#allocation46_spill] sm:$0xff]  ;;  %v8604_v48 = vld [vmem:[#allocation47_spill] sm:$0xff] }
 0x4e6   :  { %2570 = vmatmul.mubr.f32.vlgmr.msra.gmra.mrb[8].mxu0 %v2192_v39  ;;  %2641 = vmatmul.mubr.f32.vlgmr.msra.gmra.mrb[8].mxu1 %v2192_v39  ;;  %v8605_v39 = vld [vmem:[#allocation48_spill] sm:$0xff] }
 0x4e7   :  { %5504 = vmatpush1.bf16.msra.mxu0 %v8597_v61  ;;  %5536 = vmatpush1.bf16.msra.mxu1 %v8598_v2  ;;  %v8606_v61 = vld [vmem:[#allocation49_spill] sm:$0xff]  ;;  %v8607_v2 = vld [vmem:[#allocation50_spill] sm:$0xff] }
 0x4e8   :  { %5506 = vmatprep.subr.bf16.mxu0 %v8599_v45  ;;  %5538 = vmatprep.subr.bf16.mxu1 %v8600_v46  ;;  %v8608_v45 = vld [vmem:[#allocation51_spill] sm:$0xff]  ;;  %v8609_v46 = vld [vmem:[#allocation52_spill] sm:$0xff] }
 0x4e9   :  { %2739 = vmatprep.mubr.f32.mxu0 %v8387_v51  ;;  %2810 = vmatprep.mubr.f32.mxu1 %v8387_v51 }
 0x4eb   :  { %5508 = vmatpush1.bf16.msra.mxu0 %v8601_v15  ;;  %5540 = vmatpush1.bf16.msra.mxu1 %v8602_v13  ;;  %v8612_v15 = vld [vmem:[#allocation55_spill] sm:$0xff]  ;;  %v8613_v13 = vld [vmem:[#allocation56_spill] sm:$0xff] }
 0x4ec   :  { %5510 = vmatprep.subr.bf16.mxu0 %v8603_v36  ;;  %5542 = vmatprep.subr.bf16.mxu1 %v8604_v48  ;;  %v8614_v36 = vld [vmem:[#allocation57_spill] sm:$0xff]  ;;  %v8615_v48 = vld [vmem:[#allocation58_spill] sm:$0xff] }
 0x4ef   :  { %5512 = vmatpush1.bf16.msra.mxu0 %v8605_v39  ;;  %5544 = vmatpush1.bf16.msra.mxu1 %v8606_v61  ;;  %v8616_v39 = vld [vmem:[#allocation59_spill] sm:$0xff]  ;;  %v8617_v61 = vld [vmem:[#allocation60_spill] sm:$0xff] }
 0x4f0   :  { %5514 = vmatprep.subr.bf16.mxu0 %v8607_v2  ;;  %5546 = vmatprep.subr.bf16.mxu1 %v8608_v45  ;;  %v8618_v2 = vld [vmem:[#allocation61_spill] sm:$0xff]  ;;  %v8619_v45 = vld [vmem:[#allocation62_spill] sm:$0xff] }
 0x4f3   :  { %5516 = vmatpush1.bf16.msra.mxu0 %v8609_v46  ;;  %5548 = vmatpush1.bf16.msra.mxu1 %v8610_v62  ;;  %v8620_v46 = vld [vmem:[#allocation63_spill] sm:$0xff]  ;;  %v8621_v62 = vld [vmem:[#allocation64_spill] sm:$0xff] }
 0x4f4   :  { %5518 = vmatprep.subr.bf16.mxu0 %v8611_v56  ;;  %5550 = vmatprep.subr.bf16.mxu1 %v8612_v15  ;;  %v8622_v56 = vld [vmem:[#allocation65_spill] sm:$0xff]  ;;  %v8623_v15 = vld [vmem:[#allocation66_spill] sm:$0xff] }
 0x4f7   :  { %5520 = vmatpush1.bf16.msra.mxu0 %v8613_v13  ;;  %5552 = vmatpush1.bf16.msra.mxu1 %v8614_v36  ;;  %v8624_v13 = vld [vmem:[#allocation67_spill] sm:$0xff]  ;;  %v8625_v36 = vld [vmem:[#allocation68_spill] sm:$0xff] }
 0x4f8   :  { %5522 = vmatprep.subr.bf16.mxu0 %v8615_v48  ;;  %5554 = vmatprep.subr.bf16.mxu1 %v8616_v39  ;;  %v8626_v48 = vld [vmem:[#allocation69_spill] sm:$0xff]  ;;  %v8627_v39 = vld [vmem:[#allocation70_spill] sm:$0xff] }
 0x4fb   :  { %5524 = vmatpush1.bf16.msra.mxu0 %v8617_v61  ;;  %5556 = vmatpush1.bf16.msra.mxu1 %v8618_v2  ;;  %v8628_v61 = vld [vmem:[#allocation71_spill] sm:$0xff] }
 0x4fc   :  { %5526 = vmatprep.subr.bf16.mxu0 %v8619_v45  ;;  %5558 = vmatprep.subr.bf16.mxu1 %v8620_v46 }
 0x4ff   :  { %5528 = vmatpush1.bf16.msra.mxu0 %v8621_v62  ;;  %5560 = vmatpush1.bf16.msra.mxu1 %v8622_v56 }
 0x500   :  { %5530 = vmatprep.subr.bf16.mxu0 %v8623_v15  ;;  %5562 = vmatprep.subr.bf16.mxu1 %v8624_v13 }
 0x503   :  { %5532 = vmatpush1.bf16.msra.mxu0 %v8625_v36  ;;  %5564 = vmatpush1.bf16.msra.mxu1 %v8626_v48 }
 0x504   :  { %5566 = vmatprep.subr.bf16.mxu0 %v8627_v39  ;;  %5598 = vmatprep.subr.bf16.mxu1 %v8628_v61 }
 0x599   :  { %v2401_v2 = vpop.f32.mrb[22].mxu0  ;;  %v2472_v45 = vpop.f32.mrb[22].mxu1 }
 0x59a   :  { %v2477_v46 = vadd.f32 %v2401_v2, %v8629_v58  ;;  %v2403_v54 = vpop.f32.mrb[23].mxu0  ;;  %v2474_v62 = vpop.f32.mrb[23].mxu1  ;;  %v2479_v48 = vadd.f32 %v2472_v45, %v8570_v33 }
 0x59b   :  { %v2478_v56 = vadd.f32 %v2403_v54, %v8569_v19  ;;  %v2480_v36 = vadd.f32 %v2474_v62, %v8508_v59 }
 0x59c   :  { %v4581_v50 = vmul.f32 -1.442695, %v2477_v46 }
 0x59d   :  { %v4582_v15 = vmul.f32 -1.442695, %v2478_v56  ;;  %v4583_v13 = vmul.f32 -1.442695, %v2480_v36 }
 0x59e   :  { %6446 = vpow2.f32 %v4581_v50 }
 0x59f   :  { %6448 = vpow2.f32 %v4582_v15 }
 0x5a0   :  { %6450 = vpow2.f32 %v4583_v13 }
 0x5a1   :  { %6452 = vtanh.f32 %v2479_v48 }
 0x5a8   :  { %v6447_v39 = vpop.eup %6446 }
 0x5a9   :  { %v6449_v47 = vpop.eup %6448  ;;  %v2484_v61 = vadd.f32 1.0, %v6447_v39 }
 0x5aa   :  { %v2490_v42 = vadd.f32 1.0, %v6449_v47  ;;  %v6451_v2 = vpop.eup %6450 }
 0x5ab   :  { %6454 = vrcp.f32 %v2484_v61  ;;  %v6453_v58 = vpop.eup %6452  ;;  %v2497_v50 = vadd.f32 1.0, %v6451_v2 }
 0x5ac   :  { %6456 = vrcp.f32 %v2490_v42 }
 0x5ad   :  { %6458 = vrcp.f32 %v2497_v50 }
 0x5b5   :  { %v6455_v54 = vpop.eup %6454 }
 0x5b6   :  { %v6457_v46 = vpop.eup %6456  ;;  %v2501_v56 = vmul.f32 %v6455_v54, %v6453_v58 }
 0x5b7   :  { %v2500_v15 = vmul.f32 %v6457_v46, %v7534_v20  ;;  %v6459_v20 = vpop.eup %6458 }
 0x5b9   :  { %v7652_v62 = vadd.f32 %v2501_v56, %v2500_v15  ;;  %v2571_v36 = vpop.f32.mrb[8].mxu0  ;;  %v2642_v45 = vpop.f32.mrb[8].mxu1 }
 0x5ba   :  { %v6237_v39 = vadd.f32 %v2571_v36, %v8511_v6  ;;  %v2573_v13 = vpop.f32.mrb[9].mxu0  ;;  %v2644_v48 = vpop.f32.mrb[9].mxu1  ;;  %v6253_v46 = vadd.f32 %v2642_v45, %v7201_v30 }
 0x5bb   :  { %v6238_v47 = vadd.f32 %v2573_v13, %v8450_v26  ;;  %6460 = vtanh.f32 %v7652_v62  ;;  %v6254_v58 = vadd.f32 %v2644_v48, %v8451_v14 }
 0x5bc   :  { %v4584_v42 = vmul.f32 -1.442695, %v6237_v39 }
 0x5bd   :  { %v4585_v61 = vmul.f32 -1.442695, %v6238_v47  ;;  %v4586_v54 = vmul.f32 -1.442695, %v6254_v58 }
 0x5be   :  { %6462 = vpow2.f32 %v4584_v42 }
 0x5bf   :  { %6464 = vpow2.f32 %v4585_v61 }
 0x5c0   :  { %6466 = vpow2.f32 %v4586_v54 }
 0x5c1   :  { %6468 = vtanh.f32 %v6253_v46  ;;  %v8630_v46 = vld [vmem:[#allocation14_spill] sm:$0xff] }
 0x5c5   :  { %v6461_v2 = vpop.eup %6460 }
 0x5c6   :  { %v2504_v56 = vmul.f32 %v6461_v2, %v6459_v20 }
 0x5c8   :  { %v6463_v50 = vpop.eup %6462  ;;  %2740 = vmatmul.mubr.f32.vlgmr.msra.gmra.mrb[24].mxu0 %v2504_v56  ;;  %2811 = vmatmul.mubr.f32.vlgmr.msra.gmra.mrb[24].mxu1 %v2504_v56  ;;  %v8631_v56 = vld [vmem:[#allocation15_spill] sm:$0xff] }
 0x5c9   :  { %v6465_v15 = vpop.eup %6464  ;;  %v2654_v36 = vadd.f32 1.0, %v6463_v50  ;;  %5568 = vmatpush1.bf16.msra.mxu0 %v8452_v4  ;;  %5600 = vmatpush1.bf16.msra.mxu1 %v8453_v44  ;;  %v8632_v50 = vld [vmem:[#allocation16_spill] sm:$0xff] }
 0x5ca   :  { %v2660_v39 = vadd.f32 1.0, %v6465_v15  ;;  %5570 = vmatprep.subr.bf16.mxu0 %v8512_v12  ;;  %5602 = vmatprep.subr.bf16.mxu1 %v8513_v7  ;;  %v6467_v45 = vpop.eup %6466  ;;  %v8633_v15 = vld [vmem:[#allocation17_spill] sm:$0xff] }
 0x5cb   :  { %6470 = vrcp.f32 %v2654_v36  ;;  %2881 = vmatprep.mubr.f32.mxu0 %v8387_v51  ;;  %2952 = vmatprep.mubr.f32.mxu1 %v8387_v51  ;;  %v6469_v13 = vpop.eup %6468  ;;  %v2667_v61 = vadd.f32 1.0, %v6467_v45  ;;  %v8634_v36 = vld [vmem:[#allocation18_spill] sm:$0xff]  ;;  %v8636_v45 = vld [vmem:[#allocation20_spill] sm:$0xff] }
 0x5cc   :  { %6472 = vrcp.f32 %v2660_v39  ;;  %v8635_v39 = vld [vmem:[#allocation19_spill] sm:$0xff] }
 0x5cd   :  { %5572 = vmatpush1.bf16.msra.mxu0 %v8514_v55  ;;  %5604 = vmatpush1.bf16.msra.mxu1 %v8515_v1  ;;  %6474 = vrcp.f32 %v2667_v61  ;;  %v8641_v61 = vld [vmem:[#allocation25_spill] sm:$0xff] }
 0x5ce   :  { %5574 = vmatprep.subr.bf16.mxu0 %v8571_v52  ;;  %5606 = vmatprep.subr.bf16.mxu1 %v8572_v60 }
 0x5d1   :  { %5576 = vmatpush1.bf16.msra.mxu0 %v8573_v11  ;;  %5608 = vmatpush1.bf16.msra.mxu1 %v8574_v8 }
 0x5d2   :  { %5578 = vmatprep.subr.bf16.mxu0 %v8575_v5  ;;  %5610 = vmatprep.subr.bf16.mxu1 %v8576_v43 }
 0x5d5   :  { %v6471_v48 = vpop.eup %6470  ;;  %5580 = vmatpush1.bf16.msra.mxu0 %v8577_v24  ;;  %5612 = vmatpush1.bf16.msra.mxu1 %v8465_v40 }
 0x5d6   :  { %v6473_v47 = vpop.eup %6472  ;;  %v2671_v42 = vmul.f32 %v6471_v48, %v6469_v13  ;;  %5582 = vmatprep.subr.bf16.mxu0 %v8466_v41  ;;  %5614 = vmatprep.subr.bf16.mxu1 %v8467_v21  ;;  %v8637_v13 = vld [vmem:[#allocation21_spill] sm:$0xff]  ;;  %v8638_v48 = vld [vmem:[#allocation22_spill] sm:$0xff] }
 0x5d7   :  { %v2670_v58 = vmul.f32 %v6473_v47, %v7560_v28  ;;  %v6475_v28 = vpop.eup %6474  ;;  %v8639_v47 = vld [vmem:[#allocation23_spill] sm:$0xff] }
 0x5d9   :  { %v7678_v20 = vadd.f32 %v2671_v42, %v2670_v58  ;;  %5584 = vmatpush1.bf16.msra.mxu0 %v8523_v27  ;;  %5616 = vmatpush1.bf16.msra.mxu1 %v8524_v32  ;;  %v8640_v42 = vld [vmem:[#allocation24_spill] sm:$0xff]  ;;  %v8642_v58 = vld [vmem:[#allocation26_spill] sm:$0xff] }
 0x5da   :  { %5586 = vmatprep.subr.bf16.mxu0 %v8525_v23  ;;  %5618 = vmatprep.subr.bf16.mxu1 %v8526_v57 }
 0x5db   :  { %6476 = vtanh.f32 %v7678_v20 }
 0x5dd   :  { %5588 = vmatpush1.bf16.msra.mxu0 %v8527_v9  ;;  %5620 = vmatpush1.bf16.msra.mxu1 %v8528_v37 }
 0x5de   :  { %5590 = vmatprep.subr.bf16.mxu0 %v8529_v18  ;;  %5622 = vmatprep.subr.bf16.mxu1 %v8475_v0 }
 0x5e1   :  { %5592 = vmatpush1.bf16.msra.mxu0 %v8476_v16  ;;  %5624 = vmatpush1.bf16.msra.mxu1 %v8477_v3 }
 0x5e2   :  { %5594 = vmatprep.subr.bf16.mxu0 %v8478_v49  ;;  %5626 = vmatprep.subr.bf16.mxu1 %v8479_v10 }
 0x5e5   :  { %v6477_v2 = vpop.eup %6476  ;;  %5596 = vmatpush1.bf16.msra.mxu0 %v8480_v31  ;;  %5628 = vmatpush1.bf16.msra.mxu1 %v8481_v17 }
 0x5e6   :  { %5630 = vmatprep.subr.bf16.mxu0 %v8482_v53  ;;  %5662 = vmatprep.subr.bf16.mxu1 %v8483_v63  ;;  %v2674_v54 = vmul.f32 %v6477_v2, %v6475_v28  ;;  %v8643_v28 = vld [vmem:[#allocation27_spill] sm:$0xff]  ;;  %v8644_v2 = vld [vmem:[#allocation28_spill] sm:$0xff] }
 0x5e8   :  { %2882 = vmatmul.mubr.f32.vlgmr.msra.gmra.mrb[24].mxu0 %v2674_v54  ;;  %2953 = vmatmul.mubr.f32.vlgmr.msra.gmra.mrb[24].mxu1 %v2674_v54 }
 0x5e9   :  { %5632 = vmatpush1.bf16.msra.mxu0 %v6828_v22  ;;  %5664 = vmatpush1.bf16.msra.mxu1 %v6831_v25 }
 0x5ea   :  { %5634 = vmatprep.subr.bf16.mxu0 %v6835_v29  ;;  %5666 = vmatprep.subr.bf16.mxu1 %v6842_v34 }
 0x5eb   :  { %3051 = vmatprep.mubr.f32.mxu0 %v8387_v51  ;;  %3122 = vmatprep.mubr.f32.mxu1 %v8387_v51 }
 0x5ed   :  { %5636 = vmatpush1.bf16.msra.mxu0 %v6844_v35  ;;  %5668 = vmatpush1.bf16.msra.mxu1 %v6848_v38 }
 0x5ee   :  { %5638 = vmatprep.subr.bf16.mxu0 %v8630_v46  ;;  %5670 = vmatprep.subr.bf16.mxu1 %v8631_v56 }
 0x5f1   :  { %5640 = vmatpush1.bf16.msra.mxu0 %v8632_v50  ;;  %5672 = vmatpush1.bf16.msra.mxu1 %v8633_v15 }
 0x5f2   :  { %5642 = vmatprep.subr.bf16.mxu0 %v8634_v36  ;;  %5674 = vmatprep.subr.bf16.mxu1 %v8635_v39  ;;  %v8645_v36 = vld [vmem:[#allocation29_spill] sm:$0xff]  ;;  %v8646_v39 = vld [vmem:[#allocation30_spill] sm:$0xff] }
 0x5f5   :  { %5644 = vmatpush1.bf16.msra.mxu0 %v8636_v45  ;;  %5676 = vmatpush1.bf16.msra.mxu1 %v8637_v13  ;;  %v8647_v45 = vld [vmem:[#allocation31_spill] sm:$0xff]  ;;  %v8648_v13 = vld [vmem:[#allocation32_spill] sm:$0xff] }
 0x5f6   :  { %5646 = vmatprep.subr.bf16.mxu0 %v8638_v48  ;;  %5678 = vmatprep.subr.bf16.mxu1 %v8639_v47  ;;  %v8649_v48 = vld [vmem:[#allocation33_spill] sm:$0xff]  ;;  %v8650_v47 = vld [vmem:[#allocation34_spill] sm:$0xff] }
 0x5f9   :  { %5648 = vmatpush1.bf16.msra.mxu0 %v8640_v42  ;;  %5680 = vmatpush1.bf16.msra.mxu1 %v8641_v61  ;;  %v8651_v42 = vld [vmem:[#allocation35_spill] sm:$0xff]  ;;  %v8652_v61 = vld [vmem:[#allocation36_spill] sm:$0xff] }
 0x5fa   :  { %5650 = vmatprep.subr.bf16.mxu0 %v8642_v58  ;;  %5682 = vmatprep.subr.bf16.mxu1 %v8643_v28  ;;  %v8653_v58 = vld [vmem:[#allocation37_spill] sm:$0xff]  ;;  %v8654_v28 = vld [vmem:[#allocation38_spill] sm:$0xff] }
 0x5fd   :  { %5652 = vmatpush1.bf16.msra.mxu0 %v8644_v2  ;;  %5684 = vmatpush1.bf16.msra.mxu1 %v8645_v36  ;;  %v8655_v2 = vld [vmem:[#allocation39_spill] sm:$0xff]  ;;  %v8688_v36 = vld [vmem:[#allocation105_spill] sm:$0xff] }
 0x5fe   :  { %5654 = vmatprep.subr.bf16.mxu0 %v8646_v39  ;;  %5686 = vmatprep.subr.bf16.mxu1 %v8647_v45  ;;  %v8656_v39 = vld [vmem:[#allocation40_spill] sm:$0xff]  ;;  %v8657_v45 = vld [vmem:[#allocation41_spill] sm:$0xff] }
 0x601   :  { %5656 = vmatpush1.bf16.msra.mxu0 %v8648_v13  ;;  %5688 = vmatpush1.bf16.msra.mxu1 %v8649_v48  ;;  %v8658_v13 = vld [vmem:[#allocation42_spill] sm:$0xff]  ;;  %v8659_v48 = vld [vmem:[#allocation43_spill] sm:$0xff] }
 0x602   :  { %5658 = vmatprep.subr.bf16.mxu0 %v8650_v47  ;;  %5690 = vmatprep.subr.bf16.mxu1 %v8651_v42  ;;  %v8669_v42 = vld [vmem:[#allocation53_spill] sm:$0xff]  ;;  %v8670_v47 = vld [vmem:[#allocation54_spill] sm:$0xff] }
 0x605   :  { %5660 = vmatpush1.bf16.msra.mxu0 %v8652_v61  ;;  %5692 = vmatpush1.bf16.msra.mxu1 %v8653_v58  ;;  %v8660_v61 = vld [vmem:[#allocation44_spill] sm:$0xff]  ;;  %v8661_v58 = vld [vmem:[#allocation45_spill] sm:$0xff] }
 0x606   :  { %5694 = vmatprep.subr.bf16.mxu0 %v8654_v28  ;;  %5726 = vmatprep.subr.bf16.mxu1 %v8655_v2  ;;  %v8662_v28 = vld [vmem:[#allocation46_spill] sm:$0xff]  ;;  %v8663_v2 = vld [vmem:[#allocation47_spill] sm:$0xff] }
 0x608   :  { %3052 = vmatmul.mubr.f32.vlgmr.msra.gmra.mrb[10].mxu0 %v2674_v54  ;;  %3123 = vmatmul.mubr.f32.vlgmr.msra.gmra.mrb[10].mxu1 %v2674_v54  ;;  %v8664_v54 = vld [vmem:[#allocation48_spill] sm:$0xff] }
 0x609   :  { %5696 = vmatpush1.bf16.msra.mxu0 %v8656_v39  ;;  %5728 = vmatpush1.bf16.msra.mxu1 %v8657_v45  ;;  %v8665_v39 = vld [vmem:[#allocation49_spill] sm:$0xff]  ;;  %v8666_v45 = vld [vmem:[#allocation50_spill] sm:$0xff] }
 0x60a   :  { %5698 = vmatprep.subr.bf16.mxu0 %v8658_v13  ;;  %5730 = vmatprep.subr.bf16.mxu1 %v8659_v48  ;;  %v8667_v13 = vld [vmem:[#allocation51_spill] sm:$0xff]  ;;  %v8668_v48 = vld [vmem:[#allocation52_spill] sm:$0xff] }
 0x60b   :  { %3221 = vmatprep.mubr.f32.mxu0 %v8387_v51  ;;  %3292 = vmatprep.mubr.f32.mxu1 %v8387_v51 }
 0x60d   :  { %5700 = vmatpush1.bf16.msra.mxu0 %v8660_v61  ;;  %5732 = vmatpush1.bf16.msra.mxu1 %v8661_v58  ;;  %v8671_v61 = vld [vmem:[#allocation55_spill] sm:$0xff]  ;;  %v8672_v58 = vld [vmem:[#allocation56_spill] sm:$0xff] }
 0x60e   :  { %5702 = vmatprep.subr.bf16.mxu0 %v8662_v28  ;;  %5734 = vmatprep.subr.bf16.mxu1 %v8663_v2  ;;  %v8673_v28 = vld [vmem:[#allocation57_spill] sm:$0xff]  ;;  %v8674_v2 = vld [vmem:[#allocation58_spill] sm:$0xff] }
 0x611   :  { %5704 = vmatpush1.bf16.msra.mxu0 %v8664_v54  ;;  %5736 = vmatpush1.bf16.msra.mxu1 %v8665_v39  ;;  %v8675_v54 = vld [vmem:[#allocation59_spill] sm:$0xff]  ;;  %v8676_v39 = vld [vmem:[#allocation60_spill] sm:$0xff] }
 0x612   :  { %5706 = vmatprep.subr.bf16.mxu0 %v8666_v45  ;;  %5738 = vmatprep.subr.bf16.mxu1 %v8667_v13  ;;  %v8677_v45 = vld [vmem:[#allocation61_spill] sm:$0xff]  ;;  %v8678_v13 = vld [vmem:[#allocation62_spill] sm:$0xff] }
 0x615   :  { %5708 = vmatpush1.bf16.msra.mxu0 %v8668_v48  ;;  %5740 = vmatpush1.bf16.msra.mxu1 %v8669_v42  ;;  %v8679_v48 = vld [vmem:[#allocation63_spill] sm:$0xff]  ;;  %v8680_v42 = vld [vmem:[#allocation64_spill] sm:$0xff] }
 0x616   :  { %5710 = vmatprep.subr.bf16.mxu0 %v8670_v47  ;;  %5742 = vmatprep.subr.bf16.mxu1 %v8671_v61  ;;  %v8681_v47 = vld [vmem:[#allocation65_spill] sm:$0xff]  ;;  %v8682_v61 = vld [vmem:[#allocation66_spill] sm:$0xff] }
 0x619   :  { %5712 = vmatpush1.bf16.msra.mxu0 %v8672_v58  ;;  %5744 = vmatpush1.bf16.msra.mxu1 %v8673_v28  ;;  %v8683_v58 = vld [vmem:[#allocation67_spill] sm:$0xff]  ;;  %v8684_v28 = vld [vmem:[#allocation68_spill] sm:$0xff] }
 0x61a   :  { %5714 = vmatprep.subr.bf16.mxu0 %v8674_v2  ;;  %5746 = vmatprep.subr.bf16.mxu1 %v8675_v54  ;;  %v8685_v2 = vld [vmem:[#allocation69_spill] sm:$0xff]  ;;  %v8686_v54 = vld [vmem:[#allocation70_spill] sm:$0xff] }
 0x61d   :  { %5716 = vmatpush1.bf16.msra.mxu0 %v8676_v39  ;;  %5748 = vmatpush1.bf16.msra.mxu1 %v8677_v45  ;;  %v8687_v39 = vld [vmem:[#allocation71_spill] sm:$0xff] }
 0x61e   :  { %5718 = vmatprep.subr.bf16.mxu0 %v8678_v13  ;;  %5750 = vmatprep.subr.bf16.mxu1 %v8679_v48 }
 0x621   :  { %5720 = vmatpush1.bf16.msra.mxu0 %v8680_v42  ;;  %5752 = vmatpush1.bf16.msra.mxu1 %v8681_v47 }
 0x622   :  { %5722 = vmatprep.subr.bf16.mxu0 %v8682_v61  ;;  %5754 = vmatprep.subr.bf16.mxu1 %v8683_v58 }
 0x625   :  { %5724 = vmatpush1.bf16.msra.mxu0 %v8684_v28  ;;  %5756 = vmatpush1.bf16.msra.mxu1 %v8685_v2 }
 0x626   :  { %5758 = vmatprep.subr.bf16.mxu0 %v8686_v54  ;;  %5790 = vmatprep.subr.bf16.mxu1 %v8687_v39 }
 0x6bb   :  { %v2883_v45 = vpop.f32.mrb[24].mxu0  ;;  %v2954_v13 = vpop.f32.mrb[24].mxu1 }
 0x6bc   :  { %v2959_v48 = vadd.f32 %v2883_v45, %v8688_v36  ;;  %v2885_v15 = vpop.f32.mrb[25].mxu0  ;;  %v2956_v42 = vpop.f32.mrb[25].mxu1  ;;  %v2961_v2 = vadd.f32 %v2954_v13, %v8570_v33 }
 0x6bd   :  { %v2960_v47 = vadd.f32 %v2885_v15, %v8569_v19  ;;  %v2962_v28 = vadd.f32 %v2956_v42, %v8508_v59 }
 0x6be   :  { %v4587_v50 = vmul.f32 -1.442695, %v2959_v48 }
 0x6bf   :  { %v4588_v61 = vmul.f32 -1.442695, %v2960_v47  ;;  %v4589_v58 = vmul.f32 -1.442695, %v2962_v28 }
 0x6c0   :  { %6478 = vpow2.f32 %v4587_v50 }
 0x6c1   :  { %6480 = vpow2.f32 %v4588_v61 }
 0x6c2   :  { %6482 = vpow2.f32 %v4589_v58 }
 0x6c3   :  { %6484 = vtanh.f32 %v2961_v2 }
 0x6ca   :  { %v6479_v54 = vpop.eup %6478 }
 0x6cb   :  { %v6481_v56 = vpop.eup %6480  ;;  %v2966_v39 = vadd.f32 1.0, %v6479_v54 }
 0x6cc   :  { %v2972_v46 = vadd.f32 1.0, %v6481_v56  ;;  %v6483_v45 = vpop.eup %6482 }
 0x6cd   :  { %6486 = vrcp.f32 %v2966_v39  ;;  %v6485_v36 = vpop.eup %6484  ;;  %v2979_v50 = vadd.f32 1.0, %v6483_v45 }
 0x6ce   :  { %6488 = vrcp.f32 %v2972_v46 }
 0x6cf   :  { %6490 = vrcp.f32 %v2979_v50 }
 0x6d7   :  { %v6487_v15 = vpop.eup %6486 }
 0x6d8   :  { %v6489_v48 = vpop.eup %6488  ;;  %v2983_v47 = vmul.f32 %v6487_v15, %v6485_v36 }
 0x6d9   :  { %v2982_v61 = vmul.f32 %v6489_v48, %v7652_v62  ;;  %v6491_v62 = vpop.eup %6490 }
 0x6db   :  { %v7770_v42 = vadd.f32 %v2983_v47, %v2982_v61  ;;  %v3053_v28 = vpop.f32.mrb[10].mxu0  ;;  %v3124_v13 = vpop.f32.mrb[10].mxu1 }
 0x6dc   :  { %v6239_v54 = vadd.f32 %v3053_v28, %v8511_v6  ;;  %v3055_v58 = vpop.f32.mrb[11].mxu0  ;;  %v3126_v2 = vpop.f32.mrb[11].mxu1  ;;  %v6255_v48 = vadd.f32 %v3124_v13, %v7201_v30 }
 0x6dd   :  { %v6240_v56 = vadd.f32 %v3055_v58, %v8450_v26  ;;  %6492 = vtanh.f32 %v7770_v42  ;;  %v6256_v36 = vadd.f32 %v3126_v2, %v8451_v14 }
 0x6de   :  { %v4590_v46 = vmul.f32 -1.442695, %v6239_v54 }
 0x6df   :  { %v4591_v39 = vmul.f32 -1.442695, %v6240_v56  ;;  %v4592_v15 = vmul.f32 -1.442695, %v6256_v36 }
 0x6e0   :  { %6494 = vpow2.f32 %v4590_v46 }
 0x6e1   :  { %6496 = vpow2.f32 %v4591_v39 }
 0x6e2   :  { %6498 = vpow2.f32 %v4592_v15 }
 0x6e3   :  { %6500 = vtanh.f32 %v6255_v48  ;;  %v8689_v48 = vld [vmem:[#allocation14_spill] sm:$0xff] }
 0x6e7   :  { %v6493_v45 = vpop.eup %6492 }
 0x6e8   :  { %v2986_v47 = vmul.f32 %v6493_v45, %v6491_v62 }
 0x6ea   :  { %v6495_v50 = vpop.eup %6494  ;;  %3222 = vmatmul.mubr.f32.vlgmr.msra.gmra.mrb[26].mxu0 %v2986_v47  ;;  %3293 = vmatmul.mubr.f32.vlgmr.msra.gmra.mrb[26].mxu1 %v2986_v47  ;;  %v8690_v47 = vld [vmem:[#allocation15_spill] sm:$0xff] }
 0x6eb   :  { %v6497_v61 = vpop.eup %6496  ;;  %v3136_v28 = vadd.f32 1.0, %v6495_v50  ;;  %5760 = vmatpush1.bf16.msra.mxu0 %v8452_v4  ;;  %5792 = vmatpush1.bf16.msra.mxu1 %v8453_v44  ;;  %v8691_v50 = vld [vmem:[#allocation16_spill] sm:$0xff] }
 0x6ec   :  { %v3142_v54 = vadd.f32 1.0, %v6497_v61  ;;  %5762 = vmatprep.subr.bf16.mxu0 %v8512_v12  ;;  %5794 = vmatprep.subr.bf16.mxu1 %v8513_v7  ;;  %v6499_v13 = vpop.eup %6498  ;;  %v8692_v61 = vld [vmem:[#allocation17_spill] sm:$0xff] }
 0x6ed   :  { %6502 = vrcp.f32 %v3136_v28  ;;  %3363 = vmatprep.mubr.f32.mxu0 %v8387_v51  ;;  %3434 = vmatprep.mubr.f32.mxu1 %v8387_v51  ;;  %v6501_v58 = vpop.eup %6500  ;;  %v3149_v39 = vadd.f32 1.0, %v6499_v13  ;;  %v8693_v28 = vld [vmem:[#allocation18_spill] sm:$0xff]  ;;  %v8695_v13 = vld [vmem:[#allocation20_spill] sm:$0xff] }
 0x6ee   :  { %6504 = vrcp.f32 %v3142_v54  ;;  %v8694_v54 = vld [vmem:[#allocation19_spill] sm:$0xff] }
 0x6ef   :  { %5764 = vmatpush1.bf16.msra.mxu0 %v8514_v55  ;;  %5796 = vmatpush1.bf16.msra.mxu1 %v8515_v1  ;;  %6506 = vrcp.f32 %v3149_v39  ;;  %v8700_v39 = vld [vmem:[#allocation25_spill] sm:$0xff] }
 0x6f0   :  { %5766 = vmatprep.subr.bf16.mxu0 %v8571_v52  ;;  %5798 = vmatprep.subr.bf16.mxu1 %v8572_v60 }
 0x6f3   :  { %5768 = vmatpush1.bf16.msra.mxu0 %v8573_v11  ;;  %5800 = vmatpush1.bf16.msra.mxu1 %v8574_v8 }
 0x6f4   :  { %5770 = vmatprep.subr.bf16.mxu0 %v8575_v5  ;;  %5802 = vmatprep.subr.bf16.mxu1 %v8576_v43 }
 0x6f7   :  { %v6503_v2 = vpop.eup %6502  ;;  %5772 = vmatpush1.bf16.msra.mxu0 %v8577_v24  ;;  %5804 = vmatpush1.bf16.msra.mxu1 %v8465_v40 }
 0x6f8   :  { %v6505_v56 = vpop.eup %6504  ;;  %v3153_v46 = vmul.f32 %v6503_v2, %v6501_v58  ;;  %5774 = vmatprep.subr.bf16.mxu0 %v8466_v41  ;;  %5806 = vmatprep.subr.bf16.mxu1 %v8467_v21  ;;  %v8696_v58 = vld [vmem:[#allocation21_spill] sm:$0xff]  ;;  %v8697_v2 = vld [vmem:[#allocation22_spill] sm:$0xff] }
 0x6f9   :  { %v3152_v36 = vmul.f32 %v6505_v56, %v7678_v20  ;;  %v6507_v20 = vpop.eup %6506  ;;  %v8698_v56 = vld [vmem:[#allocation23_spill] sm:$0xff] }
 0x6fb   :  { %v7796_v62 = vadd.f32 %v3153_v46, %v3152_v36  ;;  %5776 = vmatpush1.bf16.msra.mxu0 %v8523_v27  ;;  %5808 = vmatpush1.bf16.msra.mxu1 %v8524_v32  ;;  %v8699_v46 = vld [vmem:[#allocation24_spill] sm:$0xff]  ;;  %v8701_v36 = vld [vmem:[#allocation26_spill] sm:$0xff] }
 0x6fc   :  { %5778 = vmatprep.subr.bf16.mxu0 %v8525_v23  ;;  %5810 = vmatprep.subr.bf16.mxu1 %v8526_v57 }
 0x6fd   :  { %6508 = vtanh.f32 %v7796_v62 }
 0x6ff   :  { %5780 = vmatpush1.bf16.msra.mxu0 %v8527_v9  ;;  %5812 = vmatpush1.bf16.msra.mxu1 %v8528_v37 }
 0x700   :  { %5782 = vmatprep.subr.bf16.mxu0 %v8529_v18  ;;  %5814 = vmatprep.subr.bf16.mxu1 %v8475_v0 }
 0x703   :  { %5784 = vmatpush1.bf16.msra.mxu0 %v8476_v16  ;;  %5816 = vmatpush1.bf16.msra.mxu1 %v8477_v3 }
 0x704   :  { %5786 = vmatprep.subr.bf16.mxu0 %v8478_v49  ;;  %5818 = vmatprep.subr.bf16.mxu1 %v8479_v10 }
 0x707   :  { %v6509_v45 = vpop.eup %6508  ;;  %5788 = vmatpush1.bf16.msra.mxu0 %v8480_v31  ;;  %5820 = vmatpush1.bf16.msra.mxu1 %v8481_v17 }
 0x708   :  { %v3156_v15 = vmul.f32 %v6509_v45, %v6507_v20  ;;  %5822 = vmatprep.subr.bf16.mxu0 %v8482_v53  ;;  %5854 = vmatprep.subr.bf16.mxu1 %v8483_v63  ;;  %v8702_v20 = vld [vmem:[#allocation27_spill] sm:$0xff]  ;;  %v8703_v45 = vld [vmem:[#allocation28_spill] sm:$0xff] }
 0x70a   :  { %3364 = vmatmul.mubr.f32.vlgmr.msra.gmra.mrb[26].mxu0 %v3156_v15  ;;  %3435 = vmatmul.mubr.f32.vlgmr.msra.gmra.mrb[26].mxu1 %v3156_v15 }
 0x70b   :  { %5824 = vmatpush1.bf16.msra.mxu0 %v6828_v22  ;;  %5856 = vmatpush1.bf16.msra.mxu1 %v6831_v25 }
 0x70c   :  { %5826 = vmatprep.subr.bf16.mxu0 %v6835_v29  ;;  %5858 = vmatprep.subr.bf16.mxu1 %v6842_v34 }
 0x70d   :  { %3533 = vmatprep.mubr.f32.mxu0 %v8387_v51  ;;  %3604 = vmatprep.mubr.f32.mxu1 %v8387_v51 }
 0x70f   :  { %5828 = vmatpush1.bf16.msra.mxu0 %v6844_v35  ;;  %5860 = vmatpush1.bf16.msra.mxu1 %v6848_v38 }
 0x710   :  { %5830 = vmatprep.subr.bf16.mxu0 %v8689_v48  ;;  %5862 = vmatprep.subr.bf16.mxu1 %v8690_v47 }
 0x713   :  { %5832 = vmatpush1.bf16.msra.mxu0 %v8691_v50  ;;  %5864 = vmatpush1.bf16.msra.mxu1 %v8692_v61 }
 0x714   :  { %5834 = vmatprep.subr.bf16.mxu0 %v8693_v28  ;;  %5866 = vmatprep.subr.bf16.mxu1 %v8694_v54  ;;  %v8704_v28 = vld [vmem:[#allocation29_spill] sm:$0xff]  ;;  %v8705_v54 = vld [vmem:[#allocation30_spill] sm:$0xff] }
 0x717   :  { %5836 = vmatpush1.bf16.msra.mxu0 %v8695_v13  ;;  %5868 = vmatpush1.bf16.msra.mxu1 %v8696_v58  ;;  %v8706_v13 = vld [vmem:[#allocation31_spill] sm:$0xff]  ;;  %v8707_v58 = vld [vmem:[#allocation32_spill] sm:$0xff] }
 0x718   :  { %5838 = vmatprep.subr.bf16.mxu0 %v8697_v2  ;;  %5870 = vmatprep.subr.bf16.mxu1 %v8698_v56  ;;  %v8708_v2 = vld [vmem:[#allocation33_spill] sm:$0xff]  ;;  %v8709_v56 = vld [vmem:[#allocation34_spill] sm:$0xff] }
 0x71b   :  { %5840 = vmatpush1.bf16.msra.mxu0 %v8699_v46  ;;  %5872 = vmatpush1.bf16.msra.mxu1 %v8700_v39  ;;  %v8710_v46 = vld [vmem:[#allocation35_spill] sm:$0xff]  ;;  %v8711_v39 = vld [vmem:[#allocation36_spill] sm:$0xff] }
 0x71c   :  { %5842 = vmatprep.subr.bf16.mxu0 %v8701_v36  ;;  %5874 = vmatprep.subr.bf16.mxu1 %v8702_v20  ;;  %v8712_v36 = vld [vmem:[#allocation37_spill] sm:$0xff]  ;;  %v8713_v20 = vld [vmem:[#allocation38_spill] sm:$0xff] }
 0x71f   :  { %5844 = vmatpush1.bf16.msra.mxu0 %v8703_v45  ;;  %5876 = vmatpush1.bf16.msra.mxu1 %v8704_v28  ;;  %v8714_v45 = vld [vmem:[#allocation39_spill] sm:$0xff]  ;;  %v8747_v28 = vld [vmem:[#allocation105_spill] sm:$0xff] }
 0x720   :  { %5846 = vmatprep.subr.bf16.mxu0 %v8705_v54  ;;  %5878 = vmatprep.subr.bf16.mxu1 %v8706_v13  ;;  %v8715_v54 = vld [vmem:[#allocation40_spill] sm:$0xff]  ;;  %v8716_v13 = vld [vmem:[#allocation41_spill] sm:$0xff] }
 0x723   :  { %5848 = vmatpush1.bf16.msra.mxu0 %v8707_v58  ;;  %5880 = vmatpush1.bf16.msra.mxu1 %v8708_v2  ;;  %v8717_v58 = vld [vmem:[#allocation42_spill] sm:$0xff]  ;;  %v8718_v2 = vld [vmem:[#allocation43_spill] sm:$0xff] }
 0x724   :  { %5850 = vmatprep.subr.bf16.mxu0 %v8709_v56  ;;  %5882 = vmatprep.subr.bf16.mxu1 %v8710_v46  ;;  %v8728_v46 = vld [vmem:[#allocation53_spill] sm:$0xff]  ;;  %v8729_v56 = vld [vmem:[#allocation54_spill] sm:$0xff] }
 0x727   :  { %5852 = vmatpush1.bf16.msra.mxu0 %v8711_v39  ;;  %5884 = vmatpush1.bf16.msra.mxu1 %v8712_v36  ;;  %v8719_v39 = vld [vmem:[#allocation44_spill] sm:$0xff]  ;;  %v8720_v36 = vld [vmem:[#allocation45_spill] sm:$0xff] }
 0x728   :  { %5886 = vmatprep.subr.bf16.mxu0 %v8713_v20  ;;  %5918 = vmatprep.subr.bf16.mxu1 %v8714_v45  ;;  %v8721_v20 = vld [vmem:[#allocation46_spill] sm:$0xff]  ;;  %v8722_v45 = vld [vmem:[#allocation47_spill] sm:$0xff] }
 0x72a   :  { %3534 = vmatmul.mubr.f32.vlgmr.msra.gmra.mrb[12].mxu0 %v3156_v15  ;;  %3605 = vmatmul.mubr.f32.vlgmr.msra.gmra.mrb[12].mxu1 %v3156_v15  ;;  %v8723_v15 = vld [vmem:[#allocation48_spill] sm:$0xff] }
 0x72b   :  { %5888 = vmatpush1.bf16.msra.mxu0 %v8715_v54  ;;  %5920 = vmatpush1.bf16.msra.mxu1 %v8716_v13  ;;  %v8724_v54 = vld [vmem:[#allocation49_spill] sm:$0xff]  ;;  %v8725_v13 = vld [vmem:[#allocation50_spill] sm:$0xff] }
 0x72c   :  { %5890 = vmatprep.subr.bf16.mxu0 %v8717_v58  ;;  %5922 = vmatprep.subr.bf16.mxu1 %v8718_v2  ;;  %v8726_v58 = vld [vmem:[#allocation51_spill] sm:$0xff]  ;;  %v8727_v2 = vld [vmem:[#allocation52_spill] sm:$0xff] }
 0x72d   :  { %3703 = vmatprep.mubr.f32.mxu0 %v8387_v51  ;;  %3774 = vmatprep.mubr.f32.mxu1 %v8387_v51 }
 0x72f   :  { %5892 = vmatpush1.bf16.msra.mxu0 %v8719_v39  ;;  %5924 = vmatpush1.bf16.msra.mxu1 %v8720_v36  ;;  %v8730_v39 = vld [vmem:[#allocation55_spill] sm:$0xff]  ;;  %v8731_v36 = vld [vmem:[#allocation56_spill] sm:$0xff] }
 0x730   :  { %5894 = vmatprep.subr.bf16.mxu0 %v8721_v20  ;;  %5926 = vmatprep.subr.bf16.mxu1 %v8722_v45  ;;  %v8732_v20 = vld [vmem:[#allocation57_spill] sm:$0xff]  ;;  %v8733_v45 = vld [vmem:[#allocation58_spill] sm:$0xff] }
 0x733   :  { %5896 = vmatpush1.bf16.msra.mxu0 %v8723_v15  ;;  %5928 = vmatpush1.bf16.msra.mxu1 %v8724_v54  ;;  %v8734_v15 = vld [vmem:[#allocation59_spill] sm:$0xff]  ;;  %v8735_v54 = vld [vmem:[#allocation60_spill] sm:$0xff] }
 0x734   :  { %5898 = vmatprep.subr.bf16.mxu0 %v8725_v13  ;;  %5930 = vmatprep.subr.bf16.mxu1 %v8726_v58  ;;  %v8736_v13 = vld [vmem:[#allocation61_spill] sm:$0xff]  ;;  %v8737_v58 = vld [vmem:[#allocation62_spill] sm:$0xff] }
 0x737   :  { %5900 = vmatpush1.bf16.msra.mxu0 %v8727_v2  ;;  %5932 = vmatpush1.bf16.msra.mxu1 %v8728_v46  ;;  %v8738_v2 = vld [vmem:[#allocation63_spill] sm:$0xff]  ;;  %v8739_v46 = vld [vmem:[#allocation64_spill] sm:$0xff] }
 0x738   :  { %5902 = vmatprep.subr.bf16.mxu0 %v8729_v56  ;;  %5934 = vmatprep.subr.bf16.mxu1 %v8730_v39  ;;  %v8740_v56 = vld [vmem:[#allocation65_spill] sm:$0xff]  ;;  %v8741_v39 = vld [vmem:[#allocation66_spill] sm:$0xff] }
 0x73b   :  { %5904 = vmatpush1.bf16.msra.mxu0 %v8731_v36  ;;  %5936 = vmatpush1.bf16.msra.mxu1 %v8732_v20  ;;  %v8742_v36 = vld [vmem:[#allocation67_spill] sm:$0xff]  ;;  %v8743_v20 = vld [vmem:[#allocation68_spill] sm:$0xff] }
 0x73c   :  { %5906 = vmatprep.subr.bf16.mxu0 %v8733_v45  ;;  %5938 = vmatprep.subr.bf16.mxu1 %v8734_v15  ;;  %v8744_v45 = vld [vmem:[#allocation69_spill] sm:$0xff]  ;;  %v8745_v15 = vld [vmem:[#allocation70_spill] sm:$0xff] }
 0x73f   :  { %5908 = vmatpush1.bf16.msra.mxu0 %v8735_v54  ;;  %5940 = vmatpush1.bf16.msra.mxu1 %v8736_v13  ;;  %v8746_v54 = vld [vmem:[#allocation71_spill] sm:$0xff] }
 0x740   :  { %5910 = vmatprep.subr.bf16.mxu0 %v8737_v58  ;;  %5942 = vmatprep.subr.bf16.mxu1 %v8738_v2 }
 0x743   :  { %5912 = vmatpush1.bf16.msra.mxu0 %v8739_v46  ;;  %5944 = vmatpush1.bf16.msra.mxu1 %v8740_v56 }
 0x744   :  { %5914 = vmatprep.subr.bf16.mxu0 %v8741_v39  ;;  %5946 = vmatprep.subr.bf16.mxu1 %v8742_v36 }
 0x747   :  { %5916 = vmatpush1.bf16.msra.mxu0 %v8743_v20  ;;  %5948 = vmatpush1.bf16.msra.mxu1 %v8744_v45 }
 0x748   :  { %5950 = vmatprep.subr.bf16.mxu0 %v8745_v15  ;;  %5982 = vmatprep.subr.bf16.mxu1 %v8746_v54 }
 0x7dd   :  { %v3365_v13 = vpop.f32.mrb[26].mxu0  ;;  %v3436_v58 = vpop.f32.mrb[26].mxu1 }
 0x7de   :  { %v3441_v2 = vadd.f32 %v3365_v13, %v8747_v28  ;;  %v3367_v61 = vpop.f32.mrb[27].mxu0  ;;  %v3438_v46 = vpop.f32.mrb[27].mxu1  ;;  %v3443_v45 = vadd.f32 %v3436_v58, %v8570_v33 }
 0x7df   :  { %v3442_v56 = vadd.f32 %v3367_v61, %v8569_v19  ;;  %v3444_v20 = vadd.f32 %v3438_v46, %v8508_v59 }
 0x7e0   :  { %v4593_v50 = vmul.f32 -1.442695, %v3441_v2 }
 0x7e1   :  { %v4594_v39 = vmul.f32 -1.442695, %v3442_v56  ;;  %v4595_v36 = vmul.f32 -1.442695, %v3444_v20 }
 0x7e2   :  { %6510 = vpow2.f32 %v4593_v50 }
 0x7e3   :  { %6512 = vpow2.f32 %v4594_v39 }
 0x7e4   :  { %6514 = vpow2.f32 %v4595_v36 }
 0x7e5   :  { %6516 = vtanh.f32 %v3443_v45 }
 0x7ec   :  { %v6511_v15 = vpop.eup %6510 }
 0x7ed   :  { %v6513_v47 = vpop.eup %6512  ;;  %v3448_v54 = vadd.f32 1.0, %v6511_v15 }
 0x7ee   :  { %v3454_v48 = vadd.f32 1.0, %v6513_v47  ;;  %v6515_v13 = vpop.eup %6514 }
 0x7ef   :  { %6518 = vrcp.f32 %v3448_v54  ;;  %v6517_v28 = vpop.eup %6516  ;;  %v3461_v50 = vadd.f32 1.0, %v6515_v13 }
 0x7f0   :  { %6520 = vrcp.f32 %v3454_v48 }
 0x7f1   :  { %6522 = vrcp.f32 %v3461_v50 }
 0x7f9   :  { %v6519_v61 = vpop.eup %6518 }
 0x7fa   :  { %v6521_v2 = vpop.eup %6520  ;;  %v3465_v56 = vmul.f32 %v6519_v61, %v6517_v28 }
 0x7fb   :  { %v3464_v39 = vmul.f32 %v6521_v2, %v7770_v42  ;;  %v6523_v42 = vpop.eup %6522 }
 0x7fd   :  { %v7888_v46 = vadd.f32 %v3465_v56, %v3464_v39  ;;  %v3535_v20 = vpop.f32.mrb[12].mxu0  ;;  %v3606_v58 = vpop.f32.mrb[12].mxu1 }
 0x7fe   :  { %v6241_v15 = vadd.f32 %v3535_v20, %v8511_v6  ;;  %v3537_v36 = vpop.f32.mrb[13].mxu0  ;;  %v3608_v45 = vpop.f32.mrb[13].mxu1  ;;  %v6257_v2 = vadd.f32 %v3606_v58, %v7201_v30 }
 0x7ff   :  { %v6242_v47 = vadd.f32 %v3537_v36, %v8450_v26  ;;  %6524 = vtanh.f32 %v7888_v46  ;;  %v6258_v28 = vadd.f32 %v3608_v45, %v8451_v14 }
 0x800   :  { %v4596_v48 = vmul.f32 -1.442695, %v6241_v15 }
 0x801   :  { %v4597_v54 = vmul.f32 -1.442695, %v6242_v47  ;;  %v4598_v61 = vmul.f32 -1.442695, %v6258_v28 }
 0x802   :  { %6526 = vpow2.f32 %v4596_v48 }
 0x803   :  { %6528 = vpow2.f32 %v4597_v54 }
 0x804   :  { %6530 = vpow2.f32 %v4598_v61 }
 0x805   :  { %6532 = vtanh.f32 %v6257_v2  ;;  %v8750_v2 = vld [vmem:[#allocation16_spill] sm:$0xff] }
 0x809   :  { %v6525_v13 = vpop.eup %6524 }
 0x80a   :  { %v3468_v56 = vmul.f32 %v6525_v13, %v6523_v42 }
 0x80c   :  { %v6527_v50 = vpop.eup %6526  ;;  %3704 = vmatmul.mubr.f32.vlgmr.msra.gmra.mrb[28].mxu0 %v3468_v56  ;;  %3775 = vmatmul.mubr.f32.vlgmr.msra.gmra.mrb[28].mxu1 %v3468_v56  ;;  %v8755_v56 = vld [vmem:[#allocation21_spill] sm:$0xff] }
 0x80d   :  { %v6529_v39 = vpop.eup %6528  ;;  %v3618_v20 = vadd.f32 1.0, %v6527_v50  ;;  %5952 = vmatpush1.bf16.msra.mxu0 %v8452_v4  ;;  %5984 = vmatpush1.bf16.msra.mxu1 %v8453_v44  ;;  %v8756_v50 = vld [vmem:[#allocation22_spill] sm:$0xff] }
 0x80e   :  { %v3624_v15 = vadd.f32 1.0, %v6529_v39  ;;  %5954 = vmatprep.subr.bf16.mxu0 %v8512_v12  ;;  %5986 = vmatprep.subr.bf16.mxu1 %v8513_v7  ;;  %v6531_v58 = vpop.eup %6530  ;;  %v8759_v39 = vld [vmem:[#allocation25_spill] sm:$0xff] }
 0x80f   :  { %6534 = vrcp.f32 %v3618_v20  ;;  %3845 = vmatprep.mubr.f32.mxu0 %v8387_v51  ;;  %3916 = vmatprep.mubr.f32.mxu1 %v8387_v51  ;;  %v6533_v36 = vpop.eup %6532  ;;  %v3631_v54 = vadd.f32 1.0, %v6531_v58  ;;  %v8760_v20 = vld [vmem:[#allocation26_spill] sm:$0xff]  ;;  %v8762_v58 = vld [vmem:[#allocation28_spill] sm:$0xff] }
 0x810   :  { %6536 = vrcp.f32 %v3624_v15  ;;  %v8761_v15 = vld [vmem:[#allocation27_spill] sm:$0xff] }
 0x811   :  { %5956 = vmatpush1.bf16.msra.mxu0 %v8514_v55  ;;  %5988 = vmatpush1.bf16.msra.mxu1 %v8515_v1  ;;  %6538 = vrcp.f32 %v3631_v54  ;;  %v8767_v54 = vld [vmem:[#allocation33_spill] sm:$0xff] }
 0x812   :  { %5958 = vmatprep.subr.bf16.mxu0 %v8571_v52  ;;  %5990 = vmatprep.subr.bf16.mxu1 %v8572_v60 }
 0x815   :  { %5960 = vmatpush1.bf16.msra.mxu0 %v8573_v11  ;;  %5992 = vmatpush1.bf16.msra.mxu1 %v8574_v8 }
 0x816   :  { %5962 = vmatprep.subr.bf16.mxu0 %v8575_v5  ;;  %5994 = vmatprep.subr.bf16.mxu1 %v8576_v43 }
 0x819   :  { %v6535_v45 = vpop.eup %6534  ;;  %5964 = vmatpush1.bf16.msra.mxu0 %v8577_v24  ;;  %5996 = vmatpush1.bf16.msra.mxu1 %v8465_v40 }
 0x81a   :  { %v6537_v47 = vpop.eup %6536  ;;  %v3635_v48 = vmul.f32 %v6535_v45, %v6533_v36  ;;  %5966 = vmatprep.subr.bf16.mxu0 %v8466_v41  ;;  %5998 = vmatprep.subr.bf16.mxu1 %v8467_v21  ;;  %v8763_v36 = vld [vmem:[#allocation29_spill] sm:$0xff]  ;;  %v8764_v45 = vld [vmem:[#allocation30_spill] sm:$0xff] }
 0x81b   :  { %v3634_v28 = vmul.f32 %v6537_v47, %v7796_v62  ;;  %v6539_v62 = vpop.eup %6538  ;;  %v8765_v47 = vld [vmem:[#allocation31_spill] sm:$0xff] }
 0x81d   :  { %v7914_v42 = vadd.f32 %v3635_v48, %v3634_v28  ;;  %5968 = vmatpush1.bf16.msra.mxu0 %v8523_v27  ;;  %6000 = vmatpush1.bf16.msra.mxu1 %v8524_v32  ;;  %v8766_v48 = vld [vmem:[#allocation32_spill] sm:$0xff]  ;;  %v8768_v28 = vld [vmem:[#allocation34_spill] sm:$0xff] }
 0x81e   :  { %5970 = vmatprep.subr.bf16.mxu0 %v8525_v23  ;;  %6002 = vmatprep.subr.bf16.mxu1 %v8526_v57 }
 0x81f   :  { %6540 = vtanh.f32 %v7914_v42 }
 0x821   :  { %5972 = vmatpush1.bf16.msra.mxu0 %v8527_v9  ;;  %6004 = vmatpush1.bf16.msra.mxu1 %v8528_v37 }
 0x822   :  { %5974 = vmatprep.subr.bf16.mxu0 %v8529_v18  ;;  %6006 = vmatprep.subr.bf16.mxu1 %v8475_v0 }
 0x825   :  { %5976 = vmatpush1.bf16.msra.mxu0 %v8476_v16  ;;  %6008 = vmatpush1.bf16.msra.mxu1 %v8477_v3 }
 0x826   :  { %5978 = vmatprep.subr.bf16.mxu0 %v8478_v49  ;;  %6010 = vmatprep.subr.bf16.mxu1 %v8479_v10 }
 0x829   :  { %v6541_v13 = vpop.eup %6540  ;;  %5980 = vmatpush1.bf16.msra.mxu0 %v8480_v31  ;;  %6012 = vmatpush1.bf16.msra.mxu1 %v8481_v17 }
 0x82a   :  { %6014 = vmatprep.subr.bf16.mxu0 %v8482_v53  ;;  %6046 = vmatprep.subr.bf16.mxu1 %v8483_v63  ;;  %v3638_v61 = vmul.f32 %v6541_v13, %v6539_v62  ;;  %v8748_v53 = vld [vmem:[#allocation14_spill] sm:$0xff]  ;;  %v8749_v63 = vld [vmem:[#allocation15_spill] sm:$0xff]  ;;  %v8770_v13 = vld [vmem:[#allocation36_spill] sm:$0xff] }
 0x82b   :  { %v8769_v62 = vld [vmem:[#allocation35_spill] sm:$0xff] }
 0x82c   :  { %3846 = vmatmul.mubr.f32.vlgmr.msra.gmra.mrb[28].mxu0 %v3638_v61  ;;  %3917 = vmatmul.mubr.f32.vlgmr.msra.gmra.mrb[28].mxu1 %v3638_v61 }
 0x82d   :  { %6016 = vmatpush1.bf16.msra.mxu0 %v6828_v22  ;;  %6048 = vmatpush1.bf16.msra.mxu1 %v6831_v25  ;;  %v8751_v22 = vld [vmem:[#allocation17_spill] sm:$0xff]  ;;  %v8752_v25 = vld [vmem:[#allocation18_spill] sm:$0xff] }
 0x82e   :  { %6018 = vmatprep.subr.bf16.mxu0 %v6835_v29  ;;  %6050 = vmatprep.subr.bf16.mxu1 %v6842_v34  ;;  %v8753_v29 = vld [vmem:[#allocation19_spill] sm:$0xff]  ;;  %v8754_v34 = vld [vmem:[#allocation20_spill] sm:$0xff] }
 0x82f   :  { %4015 = vmatprep.mubr.f32.mxu0 %v8387_v51  ;;  %4086 = vmatprep.mubr.f32.mxu1 %v8387_v51 }
 0x831   :  { %6020 = vmatpush1.bf16.msra.mxu0 %v6844_v35  ;;  %6052 = vmatpush1.bf16.msra.mxu1 %v6848_v38  ;;  %v8757_v35 = vld [vmem:[#allocation23_spill] sm:$0xff]  ;;  %v8758_v38 = vld [vmem:[#allocation24_spill] sm:$0xff] }
 0x832   :  { %6022 = vmatprep.subr.bf16.mxu0 %v8748_v53  ;;  %6054 = vmatprep.subr.bf16.mxu1 %v8749_v63  ;;  %v8771_v53 = vld [vmem:[#allocation37_spill] sm:$0xff]  ;;  %v8772_v63 = vld [vmem:[#allocation38_spill] sm:$0xff] }
 0x835   :  { %6024 = vmatpush1.bf16.msra.mxu0 %v8750_v2  ;;  %6056 = vmatpush1.bf16.msra.mxu1 %v8751_v22  ;;  %v8773_v2 = vld [vmem:[#allocation39_spill] sm:$0xff]  ;;  %v8774_v22 = vld [vmem:[#allocation40_spill] sm:$0xff] }
 0x836   :  { %6026 = vmatprep.subr.bf16.mxu0 %v8752_v25  ;;  %6058 = vmatprep.subr.bf16.mxu1 %v8753_v29  ;;  %v8775_v25 = vld [vmem:[#allocation41_spill] sm:$0xff]  ;;  %v8776_v29 = vld [vmem:[#allocation42_spill] sm:$0xff] }
 0x839   :  { %6028 = vmatpush1.bf16.msra.mxu0 %v8754_v34  ;;  %6060 = vmatpush1.bf16.msra.mxu1 %v8755_v56  ;;  %v8777_v34 = vld [vmem:[#allocation43_spill] sm:$0xff]  ;;  %v8778_v56 = vld [vmem:[#allocation44_spill] sm:$0xff] }
 0x83a   :  { %6030 = vmatprep.subr.bf16.mxu0 %v8756_v50  ;;  %6062 = vmatprep.subr.bf16.mxu1 %v8757_v35  ;;  %v8779_v50 = vld [vmem:[#allocation45_spill] sm:$0xff]  ;;  %v8780_v35 = vld [vmem:[#allocation46_spill] sm:$0xff] }
 0x83d   :  { %6032 = vmatpush1.bf16.msra.mxu0 %v8758_v38  ;;  %6064 = vmatpush1.bf16.msra.mxu1 %v8759_v39  ;;  %v8781_v38 = vld [vmem:[#allocation47_spill] sm:$0xff]  ;;  %v8783_v39 = vld [vmem:[#allocation49_spill] sm:$0xff] }
 0x83e   :  { %6034 = vmatprep.subr.bf16.mxu0 %v8760_v20  ;;  %6066 = vmatprep.subr.bf16.mxu1 %v8761_v15  ;;  %v8784_v20 = vld [vmem:[#allocation50_spill] sm:$0xff]  ;;  %v8785_v15 = vld [vmem:[#allocation51_spill] sm:$0xff] }
 0x841   :  { %6036 = vmatpush1.bf16.msra.mxu0 %v8762_v58  ;;  %6068 = vmatpush1.bf16.msra.mxu1 %v8763_v36  ;;  %v8786_v58 = vld [vmem:[#allocation52_spill] sm:$0xff]  ;;  %v8787_v36 = vld [vmem:[#allocation53_spill] sm:$0xff] }
 0x842   :  { %6038 = vmatprep.subr.bf16.mxu0 %v8764_v45  ;;  %6070 = vmatprep.subr.bf16.mxu1 %v8765_v47  ;;  %v8788_v45 = vld [vmem:[#allocation54_spill] sm:$0xff]  ;;  %v8789_v47 = vld [vmem:[#allocation55_spill] sm:$0xff] }
 0x845   :  { %6040 = vmatpush1.bf16.msra.mxu0 %v8766_v48  ;;  %6072 = vmatpush1.bf16.msra.mxu1 %v8767_v54  ;;  %v8790_v48 = vld [vmem:[#allocation56_spill] sm:$0xff]  ;;  %v8791_v54 = vld [vmem:[#allocation57_spill] sm:$0xff] }
 0x846   :  { %6042 = vmatprep.subr.bf16.mxu0 %v8768_v28  ;;  %6074 = vmatprep.subr.bf16.mxu1 %v8769_v62  ;;  %v8792_v28 = vld [vmem:[#allocation58_spill] sm:$0xff]  ;;  %v8793_v62 = vld [vmem:[#allocation59_spill] sm:$0xff] }
 0x849   :  { %6044 = vmatpush1.bf16.msra.mxu0 %v8770_v13  ;;  %6076 = vmatpush1.bf16.msra.mxu1 %v8771_v53  ;;  %v8794_v13 = vld [vmem:[#allocation60_spill] sm:$0xff]  ;;  %v8795_v53 = vld [vmem:[#allocation61_spill] sm:$0xff] }
 0x84a   :  { %6078 = vmatprep.subr.bf16.mxu0 %v8772_v63  ;;  %6110 = vmatprep.subr.bf16.mxu1 %v8773_v2  ;;  %v8796_v63 = vld [vmem:[#allocation62_spill] sm:$0xff]  ;;  %v8797_v2 = vld [vmem:[#allocation63_spill] sm:$0xff] }
 0x84c   :  { %4016 = vmatmul.mubr.f32.vlgmr.msra.gmra.mrb[14].mxu0 %v3638_v61  ;;  %4087 = vmatmul.mubr.f32.vlgmr.msra.gmra.mrb[14].mxu1 %v3638_v61  ;;  %v8782_v61 = vld [vmem:[#allocation48_spill] sm:$0xff] }
 0x84d   :  { %6080 = vmatpush1.bf16.msra.mxu0 %v8774_v22  ;;  %6112 = vmatpush1.bf16.msra.mxu1 %v8775_v25  ;;  %v8798_v22 = vld [vmem:[#allocation64_spill] sm:$0xff]  ;;  %v8799_v25 = vld [vmem:[#allocation65_spill] sm:$0xff] }
 0x84e   :  { %6082 = vmatprep.subr.bf16.mxu0 %v8776_v29  ;;  %6114 = vmatprep.subr.bf16.mxu1 %v8777_v34  ;;  %v8800_v29 = vld [vmem:[#allocation66_spill] sm:$0xff]  ;;  %v8801_v34 = vld [vmem:[#allocation67_spill] sm:$0xff] }
 0x84f   :  { %4185 = vmatprep.mubr.f32.mxu0 %v8387_v51  ;;  %4256 = vmatprep.mubr.f32.mxu1 %v8387_v51 }
 0x851   :  { %6084 = vmatpush1.bf16.msra.mxu0 %v8778_v56  ;;  %6116 = vmatpush1.bf16.msra.mxu1 %v8779_v50  ;;  %v8802_v56 = vld [vmem:[#allocation68_spill] sm:$0xff]  ;;  %v8803_v50 = vld [vmem:[#allocation69_spill] sm:$0xff] }
 0x852   :  { %6086 = vmatprep.subr.bf16.mxu0 %v8780_v35  ;;  %6118 = vmatprep.subr.bf16.mxu1 %v8781_v38  ;;  %v8804_v35 = vld [vmem:[#allocation70_spill] sm:$0xff]  ;;  %v8805_v38 = vld [vmem:[#allocation71_spill] sm:$0xff] }
 0x855   :  { %6088 = vmatpush1.bf16.msra.mxu0 %v8782_v61  ;;  %6120 = vmatpush1.bf16.msra.mxu1 %v8783_v39 }
 0x856   :  { %6090 = vmatprep.subr.bf16.mxu0 %v8784_v20  ;;  %6122 = vmatprep.subr.bf16.mxu1 %v8785_v15  ;;  %v8806_v20 = vld [vmem:[#allocation105_spill] sm:$0xff] }
 0x859   :  { %6092 = vmatpush1.bf16.msra.mxu0 %v8786_v58  ;;  %6124 = vmatpush1.bf16.msra.mxu1 %v8787_v36 }
 0x85a   :  { %6094 = vmatprep.subr.bf16.mxu0 %v8788_v45  ;;  %6126 = vmatprep.subr.bf16.mxu1 %v8789_v47 }
 0x85d   :  { %6096 = vmatpush1.bf16.msra.mxu0 %v8790_v48  ;;  %6128 = vmatpush1.bf16.msra.mxu1 %v8791_v54 }
 0x85e   :  { %6098 = vmatprep.subr.bf16.mxu0 %v8792_v28  ;;  %6130 = vmatprep.subr.bf16.mxu1 %v8793_v62 }
 0x861   :  { %6100 = vmatpush1.bf16.msra.mxu0 %v8794_v13  ;;  %6132 = vmatpush1.bf16.msra.mxu1 %v8795_v53 }
 0x862   :  { %6102 = vmatprep.subr.bf16.mxu0 %v8796_v63  ;;  %6134 = vmatprep.subr.bf16.mxu1 %v8797_v2 }
 0x865   :  { %6104 = vmatpush1.bf16.msra.mxu0 %v8798_v22  ;;  %6136 = vmatpush1.bf16.msra.mxu1 %v8799_v25 }
 0x866   :  { %6106 = vmatprep.subr.bf16.mxu0 %v8800_v29  ;;  %6138 = vmatprep.subr.bf16.mxu1 %v8801_v34 }
 0x869   :  { %6108 = vmatpush1.bf16.msra.mxu0 %v8802_v56  ;;  %6140 = vmatpush1.bf16.msra.mxu1 %v8803_v50 }
 0x86a   :  { %6142 = vmatprep.subr.bf16.mxu0 %v8804_v35  ;;  %6174 = vmatprep.subr.bf16.mxu1 %v8805_v38 }
 0x8ff   :  { %v3847_v61 = vpop.f32.mrb[28].mxu0  ;;  %v3918_v39 = vpop.f32.mrb[28].mxu1 }
 0x900   :  { %v3923_v15 = vadd.f32 %v3847_v61, %v8806_v20  ;;  %v3849_v58 = vpop.f32.mrb[29].mxu0  ;;  %v3920_v36 = vpop.f32.mrb[29].mxu1  ;;  %v3925_v62 = vadd.f32 %v3918_v39, %v8570_v33 }
 0x901   :  { %v3924_v45 = vadd.f32 %v3849_v58, %v8569_v19  ;;  %v3926_v54 = vadd.f32 %v3920_v36, %v8508_v59 }
 0x902   :  { %v4599_v47 = vmul.f32 -1.442695, %v3923_v15 }
 0x903   :  { %v4600_v48 = vmul.f32 -1.442695, %v3924_v45  ;;  %v4601_v28 = vmul.f32 -1.442695, %v3926_v54 }
 0x904   :  { %6542 = vpow2.f32 %v4599_v47 }
 0x905   :  { %6544 = vpow2.f32 %v4600_v48 }
 0x906   :  { %6546 = vpow2.f32 %v4601_v28 }
 0x907   :  { %6548 = vtanh.f32 %v3925_v62 }
 0x90e   :  { %v6543_v13 = vpop.eup %6542 }
 0x90f   :  { %v6545_v53 = vpop.eup %6544  ;;  %v3930_v63 = vadd.f32 1.0, %v6543_v13 }
 0x910   :  { %v3936_v2 = vadd.f32 1.0, %v6545_v53  ;;  %v6547_v22 = vpop.eup %6546 }
 0x911   :  { %6550 = vrcp.f32 %v3930_v63  ;;  %v6549_v25 = vpop.eup %6548  ;;  %v3943_v50 = vadd.f32 1.0, %v6547_v22  ;;  %v4447_v22 = vld [vmem:[%s8122_s7 + $0x70] sm:$0xff] }
 0x912   :  { %6552 = vrcp.f32 %v3936_v2 }
 0x913   :  { %6554 = vrcp.f32 %v3943_v50 }
 0x91b   :  { %v6551_v29 = vpop.eup %6550 }
 0x91c   :  { %v6553_v34 = vpop.eup %6552  ;;  %v3947_v56 = vmul.f32 %v6551_v29, %v6549_v25  ;;  %v4448_v25 = vld [vmem:[%s8122_s7 + $0x78] sm:$0xff] }
 0x91d   :  { %v3946_v35 = vmul.f32 %v6553_v34, %v7888_v46  ;;  %v6555_v46 = vpop.eup %6554  ;;  %v6227_v29 = vpack.c.bf16 %v4448_v25, %v4447_v22 }
 0x91f   :  { %v8006_v38 = vadd.f32 %v3947_v56, %v3946_v35  ;;  %v4017_v61 = vpop.f32.mrb[14].mxu0  ;;  %v4088_v39 = vpop.f32.mrb[14].mxu1 }
 0x920   :  { %v6243_v15 = vadd.f32 %v4017_v61, %v8511_v6  ;;  %v4019_v58 = vpop.f32.mrb[15].mxu0  ;;  %v4090_v36 = vpop.f32.mrb[15].mxu1  ;;  %v6259_v13 = vadd.f32 %v4088_v39, %v7201_v30 }
 0x921   :  { %v6244_v45 = vadd.f32 %v4019_v58, %v8450_v26  ;;  %6556 = vtanh.f32 %v8006_v38  ;;  %v6260_v54 = vadd.f32 %v4090_v36, %v8451_v14 }
 0x922   :  { %v4602_v47 = vmul.f32 -1.442695, %v6243_v15 }
 0x923   :  { %v4603_v48 = vmul.f32 -1.442695, %v6244_v45  ;;  %v4604_v62 = vmul.f32 -1.442695, %v6260_v54 }
 0x924   :  { %6558 = vpow2.f32 %v4602_v47 }
 0x925   :  { %6560 = vpow2.f32 %v4603_v48 }
 0x926   :  { %6562 = vpow2.f32 %v4604_v62 }
 0x927   :  { %6564 = vtanh.f32 %v6259_v13 }
 0x92b   :  { %v6557_v28 = vpop.eup %6556 }
 0x92c   :  { %v3950_v53 = vmul.f32 %v6557_v28, %v6555_v46 }
 0x92e   :  { %v6559_v63 = vpop.eup %6558  ;;  %4186 = vmatmul.mubr.f32.vlgmr.msra.gmra.mrb[30].mxu0 %v3950_v53  ;;  %4257 = vmatmul.mubr.f32.vlgmr.msra.gmra.mrb[30].mxu1 %v3950_v53 }
 0x92f   :  { %v6561_v6 = vpop.eup %6560  ;;  %v4100_v2 = vadd.f32 1.0, %v6559_v63  ;;  %6144 = vmatpush1.bf16.msra.mxu0 %v8452_v4  ;;  %6176 = vmatpush1.bf16.msra.mxu1 %v8453_v44 }
 0x930   :  { %v4106_v26 = vadd.f32 1.0, %v6561_v6  ;;  %6146 = vmatprep.subr.bf16.mxu0 %v8512_v12  ;;  %6178 = vmatprep.subr.bf16.mxu1 %v8513_v7  ;;  %v6563_v30 = vpop.eup %6562 }
 0x931   :  { %6566 = vrcp.f32 %v4100_v2  ;;  %4327 = vmatprep.mubr.f32.mxu0 %v8387_v51  ;;  %4398 = vmatprep.mubr.f32.mxu1 %v8387_v51  ;;  %v6565_v4 = vpop.eup %6564  ;;  %v4113_v7 = vadd.f32 1.0, %v6563_v30 }
 0x932   :  { %6568 = vrcp.f32 %v4106_v26  ;;  %v4608_v26 = vld [vmem:[%s8123_s8] ss:$0 sm:$0xff] }
 0x933   :  { %6148 = vmatpush1.bf16.msra.mxu0 %v8514_v55  ;;  %6180 = vmatpush1.bf16.msra.mxu1 %v8515_v1  ;;  %6570 = vrcp.f32 %v4113_v7 }
 0x934   :  { %6150 = vmatprep.subr.bf16.mxu0 %v8571_v52  ;;  %6182 = vmatprep.subr.bf16.mxu1 %v8572_v60  ;;  %v4442_v52 = vld [vmem:[%s8122_s7 + $0x48] sm:$0xff] }
 0x937   :  { %6152 = vmatpush1.bf16.msra.mxu0 %v8573_v11  ;;  %6184 = vmatpush1.bf16.msra.mxu1 %v8574_v8  ;;  %v4443_v11 = vld [vmem:[%s8122_s7 + $0x50] sm:$0xff]  ;;  %v4444_v8 = vld [vmem:[%s8122_s7 + $0x58] sm:$0xff] }
 0x938   :  { %6154 = vmatprep.subr.bf16.mxu0 %v8575_v5  ;;  %6186 = vmatprep.subr.bf16.mxu1 %v8576_v43  ;;  %v4445_v5 = vld [vmem:[%s8122_s7 + $0x60] sm:$0xff]  ;;  %v6221_v43 = vpack.c.bf16 %v4444_v8, %v4443_v11 }
 0x93b   :  { %v6567_v14 = vpop.eup %6566  ;;  %6156 = vmatpush1.bf16.msra.mxu0 %v8577_v24  ;;  %6188 = vmatpush1.bf16.msra.mxu1 %v8465_v40  ;;  %v4446_v24 = vld [vmem:[%s8122_s7 + $0x68] sm:$0xff] }
 0x93c   :  { %v6569_v44 = vpop.eup %6568  ;;  %v4117_v12 = vmul.f32 %v6567_v14, %v6565_v4  ;;  %6158 = vmatprep.subr.bf16.mxu0 %v8466_v41  ;;  %6190 = vmatprep.subr.bf16.mxu1 %v8467_v21 }
 0x93d   :  { %v4116_v55 = vmul.f32 %v6569_v44, %v7914_v42  ;;  %v6571_v41 = vpop.eup %6570  ;;  %v6224_v42 = vpack.c.bf16 %v4446_v24, %v4445_v5 }
 0x93f   :  { %v4118_v1 = vadd.f32 %v4117_v12, %v4116_v55  ;;  %6160 = vmatpush1.bf16.msra.mxu0 %v8523_v27  ;;  %6192 = vmatpush1.bf16.msra.mxu1 %v8524_v32  ;;  %v4438_v27 = vld [vmem:[%s8122_s7 + $0x28] sm:$0xff] }
 0x940   :  { %6162 = vmatprep.subr.bf16.mxu0 %v8525_v23  ;;  %6194 = vmatprep.subr.bf16.mxu1 %v8526_v57  ;;  %v4437_v23 = vld [vmem:[%s8122_s7 + $0x20] sm:$0xff]  ;;  %v4439_v57 = vld [vmem:[%s8122_s7 + $0x30] sm:$0xff] }
 0x941   :  { %6572 = vtanh.f32 %v4118_v1  ;;  %v6212_v32 = vpack.c.bf16 %v4438_v27, %v4437_v23 }
 0x943   :  { %6164 = vmatpush1.bf16.msra.mxu0 %v8527_v9  ;;  %6196 = vmatpush1.bf16.msra.mxu1 %v8528_v37  ;;  %v4440_v9 = vld [vmem:[%s8122_s7 + $0x38] sm:$0xff] }
 0x944   :  { %6166 = vmatprep.subr.bf16.mxu0 %v8529_v18  ;;  %6198 = vmatprep.subr.bf16.mxu1 %v8475_v0  ;;  %v4433_v0 = vld [vmem:[%s8122_s7] sm:$0xff]  ;;  %v6215_v37 = vpack.c.bf16 %v4440_v9, %v4439_v57 }
 0x945   :  { %v4441_v18 = vld [vmem:[%s8122_s7 + $0x40] sm:$0xff] }
 0x946   :  { %v6218_v60 = vpack.c.bf16 %v4442_v52, %v4441_v18 }
 0x947   :  { %6168 = vmatpush1.bf16.msra.mxu0 %v8476_v16  ;;  %6200 = vmatpush1.bf16.msra.mxu1 %v8477_v3  ;;  %v4434_v16 = vld [vmem:[%s8122_s7 + $0x8] sm:$0xff] }
 0x948   :  { %6170 = vmatprep.subr.bf16.mxu0 %v8478_v49  ;;  %6202 = vmatprep.subr.bf16.mxu1 %v8479_v10  ;;  %v6206_v3 = vpack.c.bf16 %v4434_v16, %v4433_v0  ;;  %v6690_v49 = vmov 0.0|0.0  }
 0x94b   :  { %v6573_v21 = vpop.eup %6572  ;;  %6172 = vmatpush1.bf16.msra.mxu0 %v8480_v31  ;;  %6204 = vmatpush1.bf16.msra.mxu1 %v8481_v17  ;;  %v4435_v17 = vld [vmem:[%s8122_s7 + $0x10] sm:$0xff]  ;;  %v4436_v31 = vld [vmem:[%s8122_s7 + $0x18] sm:$0xff] }
 0x94c   :  { %v4120_v40 = vmul.f32 %v6573_v21, %v6571_v41  ;;  %6205 = vmatprep.subr.bf16.mxu0 %v6690_v49  ;;  %v6209_v10 = vpack.c.bf16 %v4436_v31, %v4435_v17 }
 0x94e   :  { %4328 = vmatmul.mubr.f32.vlgmr.msra.gmra.mrb[30].mxu0 %v4120_v40  ;;  %4399 = vmatmul.mubr.f32.vlgmr.msra.gmra.mrb[30].mxu1 %v4120_v40 }
 0x94f   :  { %6207 = vmatpush3.bf16.msra.mxu0 %v6206_v3  ;;  %4658 = vmatprep.mubr.msk.f32.mxu0 %vm6691_vm1, %v8387_v51 }
 0x950   :  { %6208 = vmatprep.subr.bf16.mxu0 %v6690_v49 }
 0x953   :  { %6210 = vmatpush3.bf16.msra.mxu0 %v6209_v10 }
 0x954   :  { %6211 = vmatprep.subr.bf16.mxu0 %v6690_v49 }
 0x957   :  { %6213 = vmatpush3.bf16.msra.mxu0 %v6212_v32 }
 0x958   :  { %6214 = vmatprep.subr.bf16.mxu0 %v6690_v49 }
 0x95b   :  { %6216 = vmatpush3.bf16.msra.mxu0 %v6215_v37 }
 0x95c   :  { %6217 = vmatprep.subr.bf16.mxu0 %v6690_v49 }
 0x95f   :  { %6219 = vmatpush3.bf16.msra.mxu0 %v6218_v60 }
 0x960   :  { %6220 = vmatprep.subr.bf16.mxu0 %v6690_v49 }
 0x963   :  { %6222 = vmatpush3.bf16.msra.mxu0 %v6221_v43 }
 0x964   :  { %6223 = vmatprep.subr.bf16.mxu0 %v6690_v49 }
 0x967   :  { %6225 = vmatpush3.bf16.msra.mxu0 %v6224_v42 }
 0x968   :  { %6226 = vmatprep.subr.bf16.mxu0 %v6690_v49 }
 0x96b   :  { %6228 = vmatpush3.bf16.msra.mxu0 %v6227_v29 }
 0xa21   :  { %v4329_v34 = vpop.f32.mrb[30].mxu0  ;;  %v4400_v56 = vpop.f32.mrb[30].mxu1 }
 0xa22   :  { %v4405_v50 = vadd.f32 %v4329_v34, %v8806_v20  ;;  %v4331_v51 = vpop.f32.mrb[31].mxu0  ;;  %v4402_v35 = vpop.f32.mrb[31].mxu1  ;;  %v4407_v45 = vadd.f32 %v4400_v56, %v8570_v33 }
 0xa23   :  { %v4406_v61 = vadd.f32 %v4331_v51, %v8569_v19  ;;  %v4408_v58 = vadd.f32 %v4402_v35, %v8508_v59 }
 0xa24   :  { %v4605_v39 = vmul.f32 -1.442695, %v4405_v50 }
 0xa25   :  { %v4606_v15 = vmul.f32 -1.442695, %v4406_v61  ;;  %v4607_v36 = vmul.f32 -1.442695, %v4408_v58 }
 0xa26   :  { %6574 = vpow2.f32 %v4605_v39 }
 0xa27   :  { %6576 = vpow2.f32 %v4606_v15 }
 0xa28   :  { %6578 = vpow2.f32 %v4607_v36 }
 0xa29   :  { %6580 = vtanh.f32 %v4407_v45 }
 0xa30   :  { %v6575_v47 = vpop.eup %6574 }
 0xa31   :  { %v6577_v48 = vpop.eup %6576  ;;  %v4412_v54 = vadd.f32 1.0, %v6575_v47 }
 0xa32   :  { %v4418_v46 = vadd.f32 1.0, %v6577_v48  ;;  %v6579_v20 = vpop.eup %6578 }
 0xa33   :  { %6582 = vrcp.f32 %v4412_v54  ;;  %v6581_v28 = vpop.eup %6580  ;;  %v4425_v53 = vadd.f32 1.0, %v6579_v20 }
 0xa34   :  { %6584 = vrcp.f32 %v4418_v46 }
 0xa35   :  { %6586 = vrcp.f32 %v4425_v53 }
 0xa3d   :  { %v6583_v19 = vpop.eup %6582 }
 0xa3e   :  { %v6585_v62 = vpop.eup %6584  ;;  %v4429_v13 = vmul.f32 %v6583_v19, %v6581_v28 }
 0xa3f   :  { %v4428_v63 = vmul.f32 %v6585_v62, %v8006_v38  ;;  %v6587_v33 = vpop.eup %6586 }
 0xa41   :  { %v4430_v59 = vadd.f32 %v4429_v13, %v4428_v63 }
 0xa43   :  { %6588 = vtanh.f32 %v4430_v59 }
 0xa4d   :  { %v6589_v6 = vpop.eup %6588 }
 0xa4e   :  { %v4432_v2 = vmul.f32 %v6589_v6, %v6587_v33 }
 0xa50   :  { %4659 = vmatmul.mubr.f32.vlgmr.msra.gmra.mrb[32].mxu0 %v4432_v2 }
 0xb23   :  { %v4522_v30 = vpop.f32.mrb[32].mxu0 }
 0xb24   :  { %v4523_v4 = vadd.f32 %v4608_v26, %v4522_v30  ;;  %v4660_v14 = vpop.f32.mrb[33].mxu0 }
 0xb26   :  { %4527 = vst.msk [vmem:[#allocation8] sm:$0xff] %vm4526_vm2, %v4523_v4 }
 0xb27   :  { %6667 = shalt.err (!%p6664_p0)
}
 0xb28   :  { %s6668_s1 = scalar_lea.hbm %s8124_s9, 128 }
 0xb29   :  { %p6669_p1 = scmp.ne.s32.totalorder %s8124_s9, %s6668_s1  ;;  %p6672_p2 = scmp.lt.u32.totalorder %s6668_s1, %s8124_s9 }
 0xb2b   :  { %p6674_p3 = pnand %p6672_p2, %p6669_p1 }
 0xb2d   :  { %6677 = shalt.err (!%p6674_p3)
}
 0xb2e   :  { %4537 = dma.vmem_to_hbm [thread:$0]  %s4535_s16, 128, %s8124_s9, [#allocation4]  }
 0xb2f   :  { %6682 = dma.done.wait [#allocation4], 128  }
 0xb30   :  { %6683 = vsyncadd [#allocation4], 4294967168 }
 0xb31   :  { %4541 = vsyncpa [#allocation3], 1 }
 0xb32   :  { %4542 = vsyncpa [#allocation6], 1 }
 0xb33   :  { %4543 = vsyncpa [#allocation4], 1 }

</bundles_post_ra>
